<compile_context>
chip_gen: v7x
topology: tpu7x:2x2x1
jax: 0.10.0
libtpu: 0.0.40
codegen_flags: <defaults>
</compile_context>

<pallas_src>
import functools

import jax
import jax.numpy as jnp
from jax import lax
from jax.experimental import pallas as pl
from jax.experimental.pallas import tpu as pltpu

DROPOUT_P = 0.2
N_EMB = 384


def _round_up(x, m):
    return (x + m - 1) // m * m


def _mix_u32(x):
    """lowbias32 integer hash (uint32 -> uint32), pure VPU ops."""
    x = x ^ (x >> jnp.uint32(16))
    x = x * jnp.uint32(0x7FEB352D)
    x = x ^ (x >> jnp.uint32(15))
    x = x * jnp.uint32(0x846CA68B)
    x = x ^ (x >> jnp.uint32(16))
    return x


def _ffn_kernel(seed_ref, x_ref, w1_ref, b1_ref, w2_ref, b2_ref, o_ref,
                *, training: bool, dropout_p: float):
    # x_ref: (tm, D), w1_ref: (D, H), b1_ref: (1, H), w2_ref: (H, D), b2_ref: (1, D)
    x = x_ref[...]  # keep native dtype; MXU accumulates in f32 below

    # Linear 1 + ReLU (f32 accumulate)
    h = jnp.dot(x, w1_ref[...], preferred_element_type=jnp.float32)
    h = h + b1_ref[...].astype(jnp.float32)
    h = jnp.maximum(h, 0.0)
    # Cast back to weight dtype so GEMM2 runs at full MXU rate for bf16 weights
    # (no-op / full precision when weights are f32).
    h = h.astype(w2_ref.dtype)

    # Linear 2
    y = jnp.dot(h, w2_ref[...], preferred_element_type=jnp.float32)
    y = y + b2_ref[...].astype(jnp.float32)
    y = y.astype(o_ref.dtype)

    if training and dropout_p > 0.0:
        tm, d = y.shape
        # Counter-based PRNG: hash(seed, global_row, col).  Grid-invariant
        # (independent of the tiling) and portable (pure jnp bit ops).
        row = lax.broadcasted_iota(jnp.uint32, (tm, d), 0)
        col = lax.broadcasted_iota(jnp.uint32, (tm, d), 1)
        grow = (pl.program_id(0) * tm).astype(jnp.uint32) + row
        seed = seed_ref[0].astype(jnp.uint32)
        ctr = (grow * jnp.uint32(0x01000193)) ^ (col * jnp.uint32(0x9E3779B9)) ^ seed
        bits = _mix_u32(ctr)
        # Top 24 bits -> signed-safe int compare (avoids unsigned cmp paths).
        r = (bits >> jnp.uint32(8)).astype(jnp.int32)            # in [0, 2^24)
        thresh = jnp.int32(int(round(dropout_p * float(1 << 24))))
        keep = (r >= thresh).astype(y.dtype)
        scale = jnp.asarray(1.0 / (1.0 - dropout_p), dtype=y.dtype)
        y = y * (keep * scale)

    o_ref[...] = y


def feed_forward(x, w1, b1, w2, b2, *, seed=0, training=True,
                 dropout_p=DROPOUT_P, tm=256):
    """x: (..., n_emb). Matches PyTorch FeedForward.forward semantics."""
    if dropout_p >= 1.0:
        raise ValueError("dropout_p must be < 1.0")
    orig_shape = x.shape
    D = orig_shape[-1]
    H = w1.shape[1]
    x2 = x.reshape(-1, D)
    M = x2.shape[0]

    # Clamp the row tile for tiny inputs, then pad M up to a tile multiple.
    tm_eff = min(tm, max(8, _round_up(M, 8)))
    Mp = _round_up(M, tm_eff)
    if Mp != M:
        x2 = jnp.pad(x2, ((0, Mp - M), (0, 0)))

    b1_2d = b1.reshape(1, H)
    b2_2d = b2.reshape(1, D)
    seed_arr = jnp.array([seed], dtype=jnp.int32)

    kernel = functools.partial(_ffn_kernel, training=training, dropout_p=dropout_p)

    # NOTE: W1/W2 have constant index_maps so they are fetched once and stay
    # VMEM-resident.  For very large D/H on v7x (64 MiB VMEM), store weights
    # in bf16 and/or single-buffer them (pipeline_mode=pl.Buffered(1)).
    out = pl.pallas_call(
        kernel,
        out_shape=jax.ShapeDtypeStruct((Mp, D), x.dtype),
        grid_spec=pltpu.PrefetchScalarGridSpec(
            num_scalar_prefetch=1,
            grid=(Mp // tm_eff,),
            in_specs=[
                pl.BlockSpec((tm_eff, D), lambda i, seed: (i, 0)),   # x tile
                pl.BlockSpec((D, H), lambda i, seed: (0, 0)),        # W1 (resident)
                pl.BlockSpec((1, H), lambda i, seed: (0, 0)),        # b1
                pl.BlockSpec((H, D), lambda i, seed: (0, 0)),        # W2 (resident)
                pl.BlockSpec((1, D), lambda i, seed: (0, 0)),        # b2
            ],
            out_specs=pl.BlockSpec((tm_eff, D), lambda i, seed: (i, 0)),
        ),
        compiler_params=pltpu.CompilerParams(
            dimension_semantics=("parallel",)),
    )(seed_arr, x2, w1, b1_2d, w2, b2_2d)

    if Mp != M:
        out = out[:M]
    return out.reshape(orig_shape)


def init_params(key, n_emb, dtype=jnp.float32):
    """Deterministic init mimicking nn.Linear's uniform(-1/sqrt(fan_in), ...)."""
    h = 4 * n_emb
    k1, k2, k3, k4 = jax.random.split(key, 4)
    lim1 = 1.0 / jnp.sqrt(n_emb)
    lim2 = 1.0 / jnp.sqrt(h)
    w1 = jax.random.uniform(k1, (n_emb, h), dtype, -lim1, lim1)
    b1 = jax.random.uniform(k2, (h,), dtype, -lim1, lim1)
    w2 = jax.random.uniform(k3, (h, n_emb), dtype, -lim2, lim2)
    b2 = jax.random.uniform(k4, (n_emb,), dtype, -lim2, lim2)
    return w1, b1, w2, b2


if __name__ == "__main__":
    # Small shapes consistent with the module: (batch, seq, n_emb=384).
    B, T, n_emb = 2, 8, N_EMB
    key = jax.random.PRNGKey(0)
    kx, kp = jax.random.split(key)
    x = jax.random.normal(kx, (B, T, n_emb), jnp.float32)
    w1, b1, w2, b2 = init_params(kp, n_emb)

    # Eval-mode (no dropout) check against a pure-JAX reference.
    y_eval = feed_forward(x, w1, b1, w2, b2, training=False)
    y_ref = jnp.maximum(x @ w1 + b1, 0.0) @ w2 + b2
    assert jnp.allclose(y_eval, y_ref, atol=2e-4, rtol=2e-4), "mismatch vs reference"

    # Train-mode forward (dropout p=0.2 applied in-kernel).
    y_train = feed_forward(x, w1, b1, w2, b2, seed=1234, training=True)
    y_train = jax.block_until_ready(y_train)

    # Loose sanity check on the dropout rate (wide bounds to avoid flakiness).
    zero_frac = float(jnp.mean((y_train == 0.0).astype(jnp.float32)))
    assert 0.05 < zero_frac < 0.5, f"unexpected dropout zero fraction {zero_frac}"

    print("KERNEL_OK")
</pallas_src>

<mosaic_0001>
module attributes {stable_mosaic.version = 11 : i64} {
  func.func @_ffn_kernel(%arg0: i32, %arg1: memref<1xi32, #tpu.memory_space<smem>>, %arg2: memref<16x384xf32, #tpu.memory_space<vmem>>, %arg3: memref<384x1536xf32, #tpu.memory_space<vmem>>, %arg4: memref<1x1536xf32, #tpu.memory_space<vmem>>, %arg5: memref<1536x384xf32, #tpu.memory_space<vmem>>, %arg6: memref<1x384xf32, #tpu.memory_space<vmem>>, %arg7: memref<16x384xf32, #tpu.memory_space<vmem>>) attributes {dimension_semantics = [#tpu.dimension_semantics<parallel>], iteration_bounds = array<i64: 1>, scalar_prefetch = 1 : i64, scratch_operands = 0 : i64, tpu.core_type = #tpu.core_type<tc>, window_params = [{transform_indices = @transform_0, window_bounds = array<i64: 16, 384>}, {pipeline_mode = #tpu.pipeline_mode<synchronous>, transform_indices = @transform_1, window_bounds = array<i64: 384, 1536>}, {pipeline_mode = #tpu.pipeline_mode<synchronous>, transform_indices = @transform_2, window_bounds = array<i64: 1, 1536>}, {pipeline_mode = #tpu.pipeline_mode<synchronous>, transform_indices = @transform_3, window_bounds = array<i64: 1536, 384>}, {pipeline_mode = #tpu.pipeline_mode<synchronous>, transform_indices = @transform_4, window_bounds = array<i64: 1, 384>}, {transform_indices = @transform_5, window_bounds = array<i64: 16, 384>}]} {
    %c0 = arith.constant 0 : index
    %c0_0 = arith.constant 0 : index
    %0 = vector.load %arg2[%c0, %c0_0] : memref<16x384xf32, #tpu.memory_space<vmem>>, vector<16x384xf32>
    %c0_1 = arith.constant 0 : index
    %c0_2 = arith.constant 0 : index
    %1 = vector.load %arg3[%c0_1, %c0_2] : memref<384x1536xf32, #tpu.memory_space<vmem>>, vector<384x1536xf32>
    %cst = arith.constant dense<0.000000e+00> : vector<16x1536xf32>
    %2 = tpu.matmul %0, %1, %cst {dimension_numbers = #tpu.dot_dimension_numbers<[1], [0], [0], [1], [0, 0, 1, 1], [], []>} : vector<16x384xf32>, vector<384x1536xf32>, vector<16x1536xf32> -> vector<16x1536xf32>
    %c0_3 = arith.constant 0 : index
    %c0_4 = arith.constant 0 : index
    %3 = vector.load %arg4[%c0_3, %c0_4] : memref<1x1536xf32, #tpu.memory_space<vmem>>, vector<1x1536xf32>
    %4 = vector.broadcast %3 : vector<1x1536xf32> to vector<16x1536xf32>
    %5 = arith.addf %2, %4 : vector<16x1536xf32>
    %cst_5 = arith.constant 0.000000e+00 : f32
    %6 = vector.broadcast %cst_5 : f32 to vector<16x1536xf32>
    %7 = arith.maximumf %5, %6 : vector<16x1536xf32>
    %c0_6 = arith.constant 0 : index
    %c0_7 = arith.constant 0 : index
    %8 = vector.load %arg5[%c0_6, %c0_7] : memref<1536x384xf32, #tpu.memory_space<vmem>>, vector<1536x384xf32>
    %cst_8 = arith.constant dense<0.000000e+00> : vector<16x384xf32>
    %9 = tpu.matmul %7, %8, %cst_8 {dimension_numbers = #tpu.dot_dimension_numbers<[1], [0], [0], [1], [0, 0, 1, 1], [], []>} : vector<16x1536xf32>, vector<1536x384xf32>, vector<16x384xf32> -> vector<16x384xf32>
    %c0_9 = arith.constant 0 : index
    %c0_10 = arith.constant 0 : index
    %10 = vector.load %arg6[%c0_9, %c0_10] : memref<1x384xf32, #tpu.memory_space<vmem>>, vector<1x384xf32>
    %11 = vector.broadcast %10 : vector<1x384xf32> to vector<16x384xf32>
    %12 = arith.addf %9, %11 : vector<16x384xf32>
    %c0_11 = arith.constant 0 : index
    %c0_12 = arith.constant 0 : index
    %13 = vector.load %arg7[%c0_11, %c0_12] : memref<16x384xf32, #tpu.memory_space<vmem>>, vector<16x384xf32>
    tpu.vector_store %arg7[%c0_11, %c0_12], %12 {strides = array<i32>} : memref<16x384xf32, #tpu.memory_space<vmem>>, vector<16x384xf32>,
    return
  }
  func.func @transform_0(%arg0: i32, %arg1: memref<1xi32, #tpu.memory_space<smem>>) -> (i32, i32) {
    %c0_i32 = arith.constant 0 : i32
    %c0_i32_0 = arith.constant 0 : i32
    return %arg0, %c0_i32 : i32, i32
  }
  func.func @transform_1(%arg0: i32, %arg1: memref<1xi32, #tpu.memory_space<smem>>) -> (i32, i32) {
    %c0_i32 = arith.constant 0 : i32
    %c0_i32_0 = arith.constant 0 : i32
    %c0_i32_1 = arith.constant 0 : i32
    return %c0_i32, %c0_i32_0 : i32, i32
  }
  func.func @transform_2(%arg0: i32, %arg1: memref<1xi32, #tpu.memory_space<smem>>) -> (i32, i32) {
    %c0_i32 = arith.constant 0 : i32
    %c0_i32_0 = arith.constant 0 : i32
    %c0_i32_1 = arith.constant 0 : i32
    return %c0_i32, %c0_i32_0 : i32, i32
  }
  func.func @transform_3(%arg0: i32, %arg1: memref<1xi32, #tpu.memory_space<smem>>) -> (i32, i32) {
    %c0_i32 = arith.constant 0 : i32
    %c0_i32_0 = arith.constant 0 : i32
    %c0_i32_1 = arith.constant 0 : i32
    return %c0_i32, %c0_i32_0 : i32, i32
  }
  func.func @transform_4(%arg0: i32, %arg1: memref<1xi32, #tpu.memory_space<smem>>) -> (i32, i32) {
    %c0_i32 = arith.constant 0 : i32
    %c0_i32_0 = arith.constant 0 : i32
    %c0_i32_1 = arith.constant 0 : i32
    return %c0_i32, %c0_i32_0 : i32, i32
  }
  func.func @transform_5(%arg0: i32, %arg1: memref<1xi32, #tpu.memory_space<smem>>) -> (i32, i32) {
    %c0_i32 = arith.constant 0 : i32
    %c0_i32_0 = arith.constant 0 : i32
    return %arg0, %c0_i32 : i32, i32
  }
}

</mosaic_0001>

<bundles_post_ra>
// kernel: tpu_custom_call.1
= control target key start
LH: loop header
LB: loop body
LE: loop exit
PB: predicated region body
PF: predicated region fallthrough
CT: control target
= control target key end

     0   :  { %12 = vsyncpa [#allocation5], 0  ;;  %s5235_s0 = inlined_call_operand.<no memory space> [shape: s32[1], index: 0, kind: input, shape index: {}]   ;;  %s5236_s1 = inlined_call_operand.hbm [shape: f32[16,384], index: 1, kind: input, shape index: {}]   ;;  %s5237_s2 = inlined_call_operand.hbm [shape: f32[384,1536], index: 2, kind: input, shape index: {}]   ;;  %s5238_s3 = inlined_call_operand.hbm [shape: f32[1,1536], index: 3, kind: input, shape index: {}]   ;;  %s5239_s4 = inlined_call_operand.hbm [shape: f32[1536,384], index: 4, kind: input, shape index: {}]   ;;  %s5240_s5 = inlined_call_operand.hbm [shape: f32[1,384], index: 5, kind: input, shape index: {}]   ;;  %s5241_s6 = inlined_call_operand.hbm [shape: f32[16,384], index: 6, kind: output, shape index: {}]  }
   0x1   :  { %13 = vsyncpa [#allocation8], 0 }
   0x2   :  { %14 = vsyncpa [#allocation11], 0 }
   0x3   :  { %15 = vsyncpa [#allocation6], 0  ;;  %s4822_s0 = smov [#allocation7]   ;;  %s4682_s24 = scalar_lea.hbm %s5237_s2, 73728 }
   0x4   :  { %s33_s21 = sshll.u32 %s4822_s0, 4  ;;  %p4683_p0 = scmp.ne.s32.totalorder %s5237_s2, %s4682_s24  ;;  %s34_s21 = int_to_ptr.vmem [resolvable:$true] %s33_s21 }
   0x5   :  { %p4686_p1 = scmp.lt.u32.totalorder %s4682_s24, %s5237_s2 }
   0x7   :  { %p4688_p2 = pnand %p4686_p1, %p4683_p0 }
   0x9   :  { %4691 = shalt.err (!%p4688_p2)
}
   0xa   :  { %s4692_s29 = scalar_lea.vmem %s34_s21, 73728  ;;  %p4697_p4 = scmp.lt.s32.totalorder %s34_s21, %s34_s21 }
   0xb   :  { %p4693_p3 = scmp.ne.s32.totalorder %s34_s21, %s4692_s29  ;;  %p4698_p5 = scmp.lt.s32.totalorder %s4692_s29, %s4692_s29 }
   0xd   :  { %p4699_p6 = por %p4698_p5, %p4697_p4 }
   0xf   :  { %p4700_p7 = pnand %p4699_p6, %p4693_p3 }
  0x11   :  { %4703 = shalt.err (!%p4700_p7)
}
  0x12   :  { %s4823_s30 = smov 1536   ;;  %s4824_s7 = smov 96  }
  0x13   :  { %39 = dma.hbm_to_vmem [thread:$0]  %s5237_s2, 73728, %s34_s21, [#allocation8], %s4823_s30, %s4823_s30, %s4824_s7  }
  0x14   :  { %s4825_s10 = smov [#allocation10]   ;;  %s4826_s12 = smov [#allocation4]  }
  0x15   :  { %s55_s11 = sshll.u32 %s4825_s10, 4  ;;  %s21_s13 = sshll.u32 %s4826_s12, 4  ;;  %s56_s11 = int_to_ptr.vmem [resolvable:$true] %s55_s11  ;;  %s22_s13 = int_to_ptr.vmem [resolvable:$true] %s21_s13 }
  0x16   :  { %s4704_s16 = scalar_lea.hbm %s5239_s4, 73728 }
  0x17   :  { %p4705_p8 = scmp.ne.s32.totalorder %s5239_s4, %s4704_s16  ;;  %p4708_p9 = scmp.lt.u32.totalorder %s4704_s16, %s5239_s4 }
  0x19   :  { %p4710_p10 = pnand %p4708_p9, %p4705_p8 }
  0x1b   :  { %4713 = shalt.err (!%p4710_p10)
}
  0x1c   :  { %s4714_s2 = scalar_lea.vmem %s56_s11, 73728  ;;  %p4719_p12 = scmp.lt.s32.totalorder %s56_s11, %s56_s11 }
  0x1d   :  { %p4715_p11 = scmp.ne.s32.totalorder %s56_s11, %s4714_s2  ;;  %p4720_p13 = scmp.lt.s32.totalorder %s4714_s2, %s4714_s2 }
  0x1f   :  { %p4721_p0 = por %p4720_p13, %p4719_p12 }
  0x21   :  { %p4722_p1 = pnand %p4721_p0, %p4715_p11 }
  0x23   :  { %4725 = shalt.err (!%p4722_p1)
}
  0x24   :  { %s4827_s0 = smov 384   ;;  %s4828_s21 = smov 24  }
  0x25   :  { %61 = dma.hbm_to_vmem [thread:$0]  %s5239_s4, 73728, %s56_s11, [#allocation11], %s4827_s0, %s4827_s0, %s4828_s21  }
  0x26   :  { %s4726_s26 = scalar_lea.hbm %s5236_s1, 768 }
  0x27   :  { %p4727_p2 = scmp.ne.s32.totalorder %s5236_s1, %s4726_s26  ;;  %p4730_p3 = scmp.lt.u32.totalorder %s4726_s26, %s5236_s1 }
  0x29   :  { %p4732_p4 = pnand %p4730_p3, %p4727_p2 }
  0x2b   :  { %4735 = shalt.err (!%p4732_p4)
}
  0x2c   :  { %s4736_s7 = scalar_lea.vmem %s22_s13, 768  ;;  %p4741_p6 = scmp.lt.s32.totalorder %s22_s13, %s22_s13 }
  0x2d   :  { %p4737_p5 = scmp.ne.s32.totalorder %s22_s13, %s4736_s7  ;;  %p4742_p7 = scmp.lt.s32.totalorder %s4736_s7, %s4736_s7 }
  0x2f   :  { %p4743_p8 = por %p4742_p7, %p4741_p6 }
  0x31   :  { %p4744_p9 = pnand %p4743_p8, %p4737_p5 }
  0x33   :  { %4747 = shalt.err (!%p4744_p9)
}
  0x34   :  { %27 = dma.hbm_to_vmem [thread:$0]  %s5236_s1, 768, %s22_s13, [#allocation5], %s4827_s0, %s4827_s0, %s4828_s21  }
  0x35   :  { %s4829_s9 = smov [#allocation9]   ;;  %s4830_s11 = smov [#allocation12]  }
  0x36   :  { %s46_s10 = sshll.u32 %s4829_s9, 4  ;;  %s68_s12 = sshll.u32 %s4830_s11, 4  ;;  %s47_s10 = int_to_ptr.vmem [resolvable:$true] %s46_s10  ;;  %s69_s12 = int_to_ptr.vmem [resolvable:$true] %s68_s12 }
  0x37   :  { %s4748_s16 = scalar_lea.hbm %s5238_s3, 192 }
  0x38   :  { %p4749_p10 = scmp.ne.s32.totalorder %s5238_s3, %s4748_s16  ;;  %p4752_p11 = scmp.lt.u32.totalorder %s4748_s16, %s5238_s3 }
  0x3a   :  { %p4754_p12 = pnand %p4752_p11, %p4749_p10 }
  0x3c   :  { %4757 = shalt.err (!%p4754_p12)
}
  0x3d   :  { %s4758_s1 = scalar_lea.vmem %s47_s10, 192  ;;  %p4763_p0 = scmp.lt.s32.totalorder %s47_s10, %s47_s10 }
  0x3e   :  { %p4759_p13 = scmp.ne.s32.totalorder %s47_s10, %s4758_s1  ;;  %p4764_p1 = scmp.lt.s32.totalorder %s4758_s1, %s4758_s1 }
  0x40   :  { %p4765_p2 = por %p4764_p1, %p4763_p0 }
  0x42   :  { %p4766_p3 = pnand %p4765_p2, %p4759_p13 }
  0x44   :  { %4769 = shalt.err (!%p4766_p3)
}
  0x45   :  { %49 = dma.hbm_to_vmem [thread:$0]  %s5238_s3, 192, %s47_s10, [#allocation8]  }
  0x46   :  { %s4770_s24 = scalar_lea.hbm %s5240_s5, 48 }
  0x47   :  { %p4771_p4 = scmp.ne.s32.totalorder %s5240_s5, %s4770_s24  ;;  %p4774_p5 = scmp.lt.u32.totalorder %s4770_s24, %s5240_s5 }
  0x49   :  { %p4776_p6 = pnand %p4774_p5, %p4771_p4 }
  0x4b   :  { %4779 = shalt.err (!%p4776_p6)
}
  0x4c   :  { %s4780_s29 = scalar_lea.vmem %s69_s12, 48  ;;  %s4784_s30 = scalar_lea.vmem %s69_s12, 64 }
  0x4d   :  { %p4781_p7 = scmp.ne.s32.totalorder %s69_s12, %s4780_s29  ;;  %p4785_p8 = scmp.lt.s32.totalorder %s69_s12, %s69_s12 }
  0x4e   :  { %p4786_p9 = scmp.lt.s32.totalorder %s4784_s30, %s4780_s29 }
  0x50   :  { %p4787_p10 = por %p4786_p9, %p4785_p8 }
  0x52   :  { %p4788_p11 = pnand %p4787_p10, %p4781_p7 }
  0x54   :  { %4791 = shalt.err (!%p4788_p11)
}
  0x55   :  { %71 = dma.hbm_to_vmem [thread:$0]  %s5240_s5, 48, %s69_s12, [#allocation11]  }
  0x56   :  { %4814 = dma.done.wait [#allocation5], 768  }
  0x57   :  { %4815 = vsyncadd [#allocation5], 4294966528 }
  0x58   :  { %4816 = dma.done.wait [#allocation8], 73920  }
  0x59   :  { %4817 = vsyncadd [#allocation8], 4294893376 }
  0x5a   :  { %4818 = dma.done.wait [#allocation11], 73776  }
  0x5b   :  { %4819 = vsyncadd [#allocation11], 4294893520  ;;  %v94_v0 = vld [vmem:[#allocation7 + $0x8] sm:$0xff]  ;;  %v93_v2 = vld [vmem:[#allocation7] sm:$0xff]  ;;  %s4832_s5 = smov [#allocation13]  }
  0x5c   :  { %v106_v1 = vld [vmem:[#allocation7 + $0x68] sm:$0xff]  ;;  %v105_v4 = vld [vmem:[#allocation7 + $0x60] sm:$0xff]  ;;  %v4934_v57 = vld [vmem:[#allocation4 + $0x8] sm:$0xff]  ;;  %s3197_s4 = sshll.u32 %s4832_s5, 4  ;;  %s3198_s4 = int_to_ptr.vmem [resolvable:$true] %s3197_s4 }
  0x5d   :  { %v3439_v3 = vpack.c.bf16 %v106_v1, %v94_v0  ;;  %v118_v5 = vld [vmem:[#allocation7 + $0xc8] sm:$0xff]  ;;  %v3441_v7 = vpack.c.bf16 %v105_v4, %v93_v2  ;;  %v117_v9 = vld [vmem:[#allocation7 + $0xc0] sm:$0xff]  ;;  %797 = vmatprep.mubr.f32.mxu1 %v4934_v57  ;;  %1105 = vmatprep.mubr.f32.mxu0 %v4934_v57  ;;  %s4792_s8 = scalar_lea.vmem %s3198_s4, 768  ;;  %p4797_p13 = scmp.lt.s32.totalorder %s3198_s4, %s3198_s4 }
  0x5e   :  { %v130_v6 = vld [vmem:[#allocation7 + $0x128] sm:$0xff]  ;;  %v129_v10 = vld [vmem:[#allocation7 + $0x120] sm:$0xff]  ;;  %p4793_p12 = scmp.ne.s32.totalorder %s3198_s4, %s4792_s8  ;;  %p4798_p0 = scmp.lt.s32.totalorder %s4792_s8, %s4792_s8 }
  0x5f   :  { %v3443_v8 = vpack.c.bf16 %v130_v6, %v118_v5  ;;  %v142_v11 = vld [vmem:[#allocation7 + $0x188] sm:$0xff]  ;;  %3440 = vmatprep.subr.bf16.mxu1 %v3439_v3  ;;  %v3445_v13 = vpack.c.bf16 %v129_v10, %v117_v9  ;;  %v141_v15 = vld [vmem:[#allocation7 + $0x180] sm:$0xff] }
  0x60   :  { %v154_v12 = vld [vmem:[#allocation7 + $0x1e8] sm:$0xff]  ;;  %3442 = vmatpush1.bf16.msra.mxu1 %v3441_v7  ;;  %v153_v16 = vld [vmem:[#allocation7 + $0x1e0] sm:$0xff]  ;;  %p4799_p1 = por %p4798_p0, %p4797_p13 }
  0x61   :  { %3444 = vmatprep.subr.bf16.mxu1 %v3443_v8  ;;  %v3447_v14 = vpack.c.bf16 %v154_v12, %v142_v11  ;;  %v166_v17 = vld [vmem:[#allocation7 + $0x248] sm:$0xff]  ;;  %v3449_v19 = vpack.c.bf16 %v153_v16, %v141_v15  ;;  %v165_v21 = vld [vmem:[#allocation7 + $0x240] sm:$0xff] }
  0x62   :  { %v178_v18 = vld [vmem:[#allocation7 + $0x2a8] sm:$0xff]  ;;  %v177_v22 = vld [vmem:[#allocation7 + $0x2a0] sm:$0xff]  ;;  %p4800_p2 = pnand %p4799_p1, %p4793_p12 }
  0x63   :  { %v3451_v20 = vpack.c.bf16 %v178_v18, %v166_v17  ;;  %v190_v23 = vld [vmem:[#allocation7 + $0x308] sm:$0xff]  ;;  %v3453_v25 = vpack.c.bf16 %v177_v22, %v165_v21  ;;  %v189_v27 = vld [vmem:[#allocation7 + $0x300] sm:$0xff] }
  0x64   :  { %3446 = vmatpush1.bf16.msra.mxu1 %v3445_v13  ;;  %v202_v24 = vld [vmem:[#allocation7 + $0x368] sm:$0xff]  ;;  %v201_v28 = vld [vmem:[#allocation7 + $0x360] sm:$0xff] }
  0x65   :  { %3448 = vmatprep.subr.bf16.mxu1 %v3447_v14  ;;  %v3455_v26 = vpack.c.bf16 %v202_v24, %v190_v23  ;;  %v214_v29 = vld [vmem:[#allocation7 + $0x3c8] sm:$0xff]  ;;  %v3457_v31 = vpack.c.bf16 %v201_v28, %v189_v27  ;;  %v213_v33 = vld [vmem:[#allocation7 + $0x3c0] sm:$0xff] }
  0x66   :  { %v226_v30 = vld [vmem:[#allocation7 + $0x428] sm:$0xff]  ;;  %v225_v34 = vld [vmem:[#allocation7 + $0x420] sm:$0xff] }
  0x67   :  { %v3459_v32 = vpack.c.bf16 %v226_v30, %v214_v29  ;;  %v238_v35 = vld [vmem:[#allocation7 + $0x488] sm:$0xff]  ;;  %v3461_v37 = vpack.c.bf16 %v225_v34, %v213_v33  ;;  %v97_v40 = vld [vmem:[#allocation7 + $0x20] sm:$0xff] }
  0x68   :  { %3450 = vmatpush1.bf16.msra.mxu1 %v3449_v19  ;;  %v250_v36 = vld [vmem:[#allocation7 + $0x4e8] sm:$0xff]  ;;  %v237_v42 = vld [vmem:[#allocation7 + $0x480] sm:$0xff] }
  0x69   :  { %3452 = vmatprep.subr.bf16.mxu1 %v3451_v20  ;;  %v98_v38 = vld [vmem:[#allocation7 + $0x28] sm:$0xff]  ;;  %v3463_v41 = vpack.c.bf16 %v250_v36, %v238_v35  ;;  %v249_v43 = vld [vmem:[#allocation7 + $0x4e0] sm:$0xff] }
  0x6a   :  { %v110_v39 = vld [vmem:[#allocation7 + $0x88] sm:$0xff]  ;;  %v109_v45 = vld [vmem:[#allocation7 + $0x80] sm:$0xff]  ;;  %v3465_v53 = vpack.c.bf16 %v249_v43, %v237_v42 }
  0x6b   :  { %v3631_v44 = vpack.c.bf16 %v110_v39, %v98_v38  ;;  %v262_v46 = vld [vmem:[#allocation7 + $0x548] sm:$0xff]  ;;  %v3633_v48 = vpack.c.bf16 %v109_v45, %v97_v40  ;;  %v121_v51 = vld [vmem:[#allocation7 + $0xe0] sm:$0xff] }
  0x6c   :  { %3454 = vmatpush1.bf16.msra.mxu1 %v3453_v25  ;;  %v274_v47 = vld [vmem:[#allocation7 + $0x5a8] sm:$0xff]  ;;  %v133_v52 = vld [vmem:[#allocation7 + $0x140] sm:$0xff] }
  0x6d   :  { %3456 = vmatprep.subr.bf16.mxu1 %v3455_v26  ;;  %v122_v49 = vld [vmem:[#allocation7 + $0xe8] sm:$0xff]  ;;  %3632 = vmatprep.subr.bf16.mxu0 %v3631_v44  ;;  %v261_v54 = vld [vmem:[#allocation7 + $0x540] sm:$0xff]  ;;  %v3637_v56 = vpack.c.bf16 %v133_v52, %v121_v51  ;;  %v3467_v58 = vpack.c.bf16 %v274_v47, %v262_v46 }
  0x6e   :  { %v134_v50 = vld [vmem:[#allocation7 + $0x148] sm:$0xff]  ;;  %3634 = vmatpush1.bf16.msra.mxu0 %v3633_v48  ;;  %v273_v59 = vld [vmem:[#allocation7 + $0x5a0] sm:$0xff] }
  0x6f   :  { %v3635_v55 = vpack.c.bf16 %v134_v50, %v122_v49  ;;  %v286_v60 = vld [vmem:[#allocation7 + $0x608] sm:$0xff]  ;;  %v145_v0 = vld [vmem:[#allocation7 + $0x1a0] sm:$0xff]  ;;  %v3469_v3 = vpack.c.bf16 %v273_v59, %v261_v54 }
  0x70   :  { %3458 = vmatpush1.bf16.msra.mxu1 %v3457_v31  ;;  %v298_v61 = vld [vmem:[#allocation7 + $0x668] sm:$0xff]  ;;  %v157_v2 = vld [vmem:[#allocation7 + $0x200] sm:$0xff] }
  0x71   :  { %3460 = vmatprep.subr.bf16.mxu1 %v3459_v32  ;;  %3636 = vmatprep.subr.bf16.mxu0 %v3635_v55  ;;  %v146_v62 = vld [vmem:[#allocation7 + $0x1a8] sm:$0xff]  ;;  %v285_v4 = vld [vmem:[#allocation7 + $0x600] sm:$0xff]  ;;  %v3641_v6 = vpack.c.bf16 %v157_v2, %v145_v0  ;;  %v3471_v8 = vpack.c.bf16 %v298_v61, %v286_v60 }
  0x72   :  { %v158_v63 = vld [vmem:[#allocation7 + $0x208] sm:$0xff]  ;;  %v297_v5 = vld [vmem:[#allocation7 + $0x660] sm:$0xff]  ;;  %3638 = vmatpush1.bf16.msra.mxu0 %v3637_v56 }
  0x73   :  { %v3639_v1 = vpack.c.bf16 %v158_v63, %v146_v62  ;;  %v170_v7 = vld [vmem:[#allocation7 + $0x268] sm:$0xff]  ;;  %v169_v10 = vld [vmem:[#allocation7 + $0x260] sm:$0xff]  ;;  %v3473_v17 = vpack.c.bf16 %v297_v5, %v285_v4 }
  0x74   :  { %3462 = vmatpush1.bf16.msra.mxu1 %v3461_v37  ;;  %v182_v9 = vld [vmem:[#allocation7 + $0x2c8] sm:$0xff]  ;;  %v181_v11 = vld [vmem:[#allocation7 + $0x2c0] sm:$0xff] }
  0x75   :  { %3464 = vmatprep.subr.bf16.mxu1 %v3463_v41  ;;  %3640 = vmatprep.subr.bf16.mxu0 %v3639_v1  ;;  %v310_v12 = vld [vmem:[#allocation7 + $0x6c8] sm:$0xff]  ;;  %v3643_v14 = vpack.c.bf16 %v182_v9, %v170_v7  ;;  %v309_v18 = vld [vmem:[#allocation7 + $0x6c0] sm:$0xff]  ;;  %v3645_v20 = vpack.c.bf16 %v181_v11, %v169_v10 }
  0x76   :  { %v322_v13 = vld [vmem:[#allocation7 + $0x728] sm:$0xff]  ;;  %v321_v19 = vld [vmem:[#allocation7 + $0x720] sm:$0xff]  ;;  %3642 = vmatpush1.bf16.msra.mxu0 %v3641_v6 }
  0x77   :  { %v194_v15 = vld [vmem:[#allocation7 + $0x328] sm:$0xff]  ;;  %v3475_v21 = vpack.c.bf16 %v322_v13, %v310_v12  ;;  %3644 = vmatprep.subr.bf16.mxu0 %v3643_v14  ;;  %v193_v24 = vld [vmem:[#allocation7 + $0x320] sm:$0xff]  ;;  %v3477_v29 = vpack.c.bf16 %v321_v19, %v309_v18 }
  0x78   :  { %3466 = vmatpush1.bf16.msra.mxu1 %v3465_v53  ;;  %v206_v16 = vld [vmem:[#allocation7 + $0x388] sm:$0xff]  ;;  %v205_v25 = vld [vmem:[#allocation7 + $0x380] sm:$0xff] }
  0x79   :  { %3468 = vmatprep.subr.bf16.mxu1 %v3467_v58  ;;  %v334_v22 = vld [vmem:[#allocation7 + $0x788] sm:$0xff]  ;;  %v3647_v23 = vpack.c.bf16 %v206_v16, %v194_v15  ;;  %v333_v30 = vld [vmem:[#allocation7 + $0x780] sm:$0xff]  ;;  %v3649_v32 = vpack.c.bf16 %v205_v25, %v193_v24 }
  0x7a   :  { %v346_v26 = vld [vmem:[#allocation7 + $0x7e8] sm:$0xff]  ;;  %v345_v31 = vld [vmem:[#allocation7 + $0x7e0] sm:$0xff]  ;;  %3646 = vmatpush1.bf16.msra.mxu0 %v3645_v20 }
  0x7b   :  { %v218_v27 = vld [vmem:[#allocation7 + $0x3e8] sm:$0xff]  ;;  %v3479_v33 = vpack.c.bf16 %v346_v26, %v334_v22  ;;  %3648 = vmatprep.subr.bf16.mxu0 %v3647_v23  ;;  %v217_v36 = vld [vmem:[#allocation7 + $0x3e0] sm:$0xff]  ;;  %v3481_v41 = vpack.c.bf16 %v345_v31, %v333_v30 }
  0x7c   :  { %3470 = vmatpush1.bf16.msra.mxu1 %v3469_v3  ;;  %v230_v28 = vld [vmem:[#allocation7 + $0x448] sm:$0xff]  ;;  %v229_v37 = vld [vmem:[#allocation7 + $0x440] sm:$0xff] }
  0x7d   :  { %3472 = vmatprep.subr.bf16.mxu1 %v3471_v8  ;;  %v358_v34 = vld [vmem:[#allocation7 + $0x848] sm:$0xff]  ;;  %v3651_v35 = vpack.c.bf16 %v230_v28, %v218_v27  ;;  %v357_v42 = vld [vmem:[#allocation7 + $0x840] sm:$0xff]  ;;  %v3653_v44 = vpack.c.bf16 %v229_v37, %v217_v36 }
  0x7e   :  { %v370_v38 = vld [vmem:[#allocation7 + $0x8a8] sm:$0xff]  ;;  %v369_v43 = vld [vmem:[#allocation7 + $0x8a0] sm:$0xff]  ;;  %3650 = vmatpush1.bf16.msra.mxu0 %v3649_v32 }
  0x7f   :  { %v242_v39 = vld [vmem:[#allocation7 + $0x4a8] sm:$0xff]  ;;  %v3483_v45 = vpack.c.bf16 %v370_v38, %v358_v34  ;;  %3652 = vmatprep.subr.bf16.mxu0 %v3651_v35  ;;  %v241_v48 = vld [vmem:[#allocation7 + $0x4a0] sm:$0xff]  ;;  %v3485_v53 = vpack.c.bf16 %v369_v43, %v357_v42 }
  0x80   :  { %3474 = vmatpush1.bf16.msra.mxu1 %v3473_v17  ;;  %v254_v40 = vld [vmem:[#allocation7 + $0x508] sm:$0xff]  ;;  %v253_v49 = vld [vmem:[#allocation7 + $0x500] sm:$0xff] }
  0x81   :  { %3476 = vmatprep.subr.bf16.mxu1 %v3475_v21  ;;  %v382_v46 = vld [vmem:[#allocation7 + $0x908] sm:$0xff]  ;;  %v3655_v47 = vpack.c.bf16 %v254_v40, %v242_v39  ;;  %v381_v54 = vld [vmem:[#allocation7 + $0x900] sm:$0xff]  ;;  %v3657_v56 = vpack.c.bf16 %v253_v49, %v241_v48 }
  0x82   :  { %v394_v50 = vld [vmem:[#allocation7 + $0x968] sm:$0xff]  ;;  %v393_v55 = vld [vmem:[#allocation7 + $0x960] sm:$0xff]  ;;  %3654 = vmatpush1.bf16.msra.mxu0 %v3653_v44 }
  0x83   :  { %v266_v51 = vld [vmem:[#allocation7 + $0x568] sm:$0xff]  ;;  %v3487_v58 = vpack.c.bf16 %v394_v50, %v382_v46  ;;  %3656 = vmatprep.subr.bf16.mxu0 %v3655_v47  ;;  %v265_v61 = vld [vmem:[#allocation7 + $0x560] sm:$0xff]  ;;  %v3489_v2 = vpack.c.bf16 %v393_v55, %v381_v54  ;;  %v4938_v50 = vld [vmem:[#allocation4] sm:$0xff] }
  0x84   :  { %3478 = vmatpush1.bf16.msra.mxu1 %v3477_v29  ;;  %v278_v52 = vld [vmem:[#allocation7 + $0x5c8] sm:$0xff]  ;;  %v277_v62 = vld [vmem:[#allocation7 + $0x5c0] sm:$0xff] }
  0x85   :  { %3480 = vmatprep.subr.bf16.mxu1 %v3479_v33  ;;  %v406_v59 = vld [vmem:[#allocation7 + $0x9c8] sm:$0xff]  ;;  %v3659_v60 = vpack.c.bf16 %v278_v52, %v266_v51  ;;  %v405_v3 = vld [vmem:[#allocation7 + $0x9c0] sm:$0xff]  ;;  %v3661_v5 = vpack.c.bf16 %v277_v62, %v265_v61 }
  0x86   :  { %v418_v63 = vld [vmem:[#allocation7 + $0xa28] sm:$0xff]  ;;  %v417_v4 = vld [vmem:[#allocation7 + $0xa20] sm:$0xff]  ;;  %3658 = vmatpush1.bf16.msra.mxu0 %v3657_v56  ;;  %v4940_v56 = vld [vmem:[#allocation4 + $0x20] sm:$0xff] }
  0x87   :  { %v290_v0 = vld [vmem:[#allocation7 + $0x628] sm:$0xff]  ;;  %v3491_v6 = vpack.c.bf16 %v418_v63, %v406_v59  ;;  %3660 = vmatprep.subr.bf16.mxu0 %v3659_v60  ;;  %v289_v9 = vld [vmem:[#allocation7 + $0x620] sm:$0xff]  ;;  %v3493_v14 = vpack.c.bf16 %v417_v4, %v405_v3 }
  0x88   :  { %3482 = vmatpush1.bf16.msra.mxu1 %v3481_v41  ;;  %v302_v1 = vld [vmem:[#allocation7 + $0x688] sm:$0xff]  ;;  %v301_v10 = vld [vmem:[#allocation7 + $0x680] sm:$0xff] }
  0x89   :  { %3484 = vmatprep.subr.bf16.mxu1 %v3483_v45  ;;  %v430_v7 = vld [vmem:[#allocation7 + $0xa88] sm:$0xff]  ;;  %v3663_v8 = vpack.c.bf16 %v302_v1, %v290_v0  ;;  %v429_v15 = vld [vmem:[#allocation7 + $0xa80] sm:$0xff]  ;;  %v3665_v17 = vpack.c.bf16 %v301_v10, %v289_v9 }
  0x8a   :  { %v442_v11 = vld [vmem:[#allocation7 + $0xae8] sm:$0xff]  ;;  %v441_v16 = vld [vmem:[#allocation7 + $0xae0] sm:$0xff]  ;;  %3662 = vmatpush1.bf16.msra.mxu0 %v3661_v5 }
  0x8b   :  { %v314_v12 = vld [vmem:[#allocation7 + $0x6e8] sm:$0xff]  ;;  %v3495_v18 = vpack.c.bf16 %v442_v11, %v430_v7  ;;  %3664 = vmatprep.subr.bf16.mxu0 %v3663_v8  ;;  %v313_v21 = vld [vmem:[#allocation7 + $0x6e0] sm:$0xff]  ;;  %v3497_v26 = vpack.c.bf16 %v441_v16, %v429_v15  ;;  %v4831_v15 = vmov 0.0  }
  0x8c   :  { %3486 = vmatpush1.bf16.msra.mxu1 %v3485_v53  ;;  %v326_v13 = vld [vmem:[#allocation7 + $0x748] sm:$0xff]  ;;  %v325_v22 = vld [vmem:[#allocation7 + $0x740] sm:$0xff] }
  0x8d   :  { %3488 = vmatprep.subr.bf16.mxu1 %v3487_v58  ;;  %v454_v19 = vld [vmem:[#allocation7 + $0xb48] sm:$0xff]  ;;  %v3667_v20 = vpack.c.bf16 %v326_v13, %v314_v12  ;;  %v453_v27 = vld [vmem:[#allocation7 + $0xb40] sm:$0xff]  ;;  %v3669_v29 = vpack.c.bf16 %v325_v22, %v313_v21 }
  0x8e   :  { %v466_v23 = vld [vmem:[#allocation7 + $0xba8] sm:$0xff]  ;;  %v465_v28 = vld [vmem:[#allocation7 + $0xba0] sm:$0xff]  ;;  %3666 = vmatpush1.bf16.msra.mxu0 %v3665_v17 }
  0x8f   :  { %v338_v24 = vld [vmem:[#allocation7 + $0x7a8] sm:$0xff]  ;;  %v3499_v30 = vpack.c.bf16 %v466_v23, %v454_v19  ;;  %3668 = vmatprep.subr.bf16.mxu0 %v3667_v20  ;;  %v337_v33 = vld [vmem:[#allocation7 + $0x7a0] sm:$0xff]  ;;  %v3501_v38 = vpack.c.bf16 %v465_v28, %v453_v27 }
  0x90   :  { %3490 = vmatpush1.bf16.msra.mxu1 %v3489_v2  ;;  %v350_v25 = vld [vmem:[#allocation7 + $0x808] sm:$0xff]  ;;  %v349_v34 = vld [vmem:[#allocation7 + $0x800] sm:$0xff] }
  0x91   :  { %3492 = vmatprep.subr.bf16.mxu1 %v3491_v6  ;;  %v478_v31 = vld [vmem:[#allocation7 + $0xc08] sm:$0xff]  ;;  %v3671_v32 = vpack.c.bf16 %v350_v25, %v338_v24  ;;  %v3673_v39 = vpack.c.bf16 %v349_v34, %v337_v33  ;;  %v477_v41 = vld [vmem:[#allocation7 + $0xc00] sm:$0xff] }
  0x92   :  { %v490_v35 = vld [vmem:[#allocation7 + $0xc68] sm:$0xff]  ;;  %3670 = vmatpush1.bf16.msra.mxu0 %v3669_v29  ;;  %v489_v42 = vld [vmem:[#allocation7 + $0xc60] sm:$0xff] }
  0x93   :  { %v362_v36 = vld [vmem:[#allocation7 + $0x868] sm:$0xff]  ;;  %v3503_v40 = vpack.c.bf16 %v490_v35, %v478_v31  ;;  %3672 = vmatprep.subr.bf16.mxu0 %v3671_v32  ;;  %v361_v46 = vld [vmem:[#allocation7 + $0x860] sm:$0xff]  ;;  %v3505_v51 = vpack.c.bf16 %v489_v42, %v477_v41 }
  0x94   :  { %3494 = vmatpush1.bf16.msra.mxu1 %v3493_v14  ;;  %v374_v37 = vld [vmem:[#allocation7 + $0x8c8] sm:$0xff]  ;;  %v373_v47 = vld [vmem:[#allocation7 + $0x8c0] sm:$0xff] }
  0x95   :  { %3496 = vmatprep.subr.bf16.mxu1 %v3495_v18  ;;  %v502_v43 = vld [vmem:[#allocation7 + $0xcc8] sm:$0xff]  ;;  %v3675_v44 = vpack.c.bf16 %v374_v37, %v362_v36  ;;  %v501_v52 = vld [vmem:[#allocation7 + $0xcc0] sm:$0xff]  ;;  %v3677_v58 = vpack.c.bf16 %v373_v47, %v361_v46 }
  0x96   :  { %v514_v45 = vld [vmem:[#allocation7 + $0xd28] sm:$0xff]  ;;  %3674 = vmatpush1.bf16.msra.mxu0 %v3673_v39  ;;  %v513_v54 = vld [vmem:[#allocation7 + $0xd20] sm:$0xff] }
  0x97   :  { %v386_v48 = vld [vmem:[#allocation7 + $0x928] sm:$0xff]  ;;  %v3507_v53 = vpack.c.bf16 %v514_v45, %v502_v43  ;;  %3676 = vmatprep.subr.bf16.mxu0 %v3675_v44  ;;  %v385_v61 = vld [vmem:[#allocation7 + $0x920] sm:$0xff]  ;;  %v3509_v1 = vpack.c.bf16 %v513_v54, %v501_v52 }
  0x98   :  { %3498 = vmatpush1.bf16.msra.mxu1 %v3497_v26  ;;  %v398_v49 = vld [vmem:[#allocation7 + $0x988] sm:$0xff]  ;;  %v397_v62 = vld [vmem:[#allocation7 + $0x980] sm:$0xff] }
  0x99   :  { %3500 = vmatprep.subr.bf16.mxu1 %v3499_v30  ;;  %v526_v55 = vld [vmem:[#allocation7 + $0xd88] sm:$0xff]  ;;  %v3679_v60 = vpack.c.bf16 %v398_v49, %v386_v48  ;;  %v525_v4 = vld [vmem:[#allocation7 + $0xd80] sm:$0xff]  ;;  %v3681_v7 = vpack.c.bf16 %v397_v62, %v385_v61 }
  0x9a   :  { %v538_v59 = vld [vmem:[#allocation7 + $0xde8] sm:$0xff]  ;;  %v537_v5 = vld [vmem:[#allocation7 + $0xde0] sm:$0xff]  ;;  %3678 = vmatpush1.bf16.msra.mxu0 %v3677_v58 }
  0x9b   :  { %v410_v63 = vld [vmem:[#allocation7 + $0x9e8] sm:$0xff]  ;;  %v3511_v3 = vpack.c.bf16 %v538_v59, %v526_v55  ;;  %3680 = vmatprep.subr.bf16.mxu0 %v3679_v60  ;;  %v409_v10 = vld [vmem:[#allocation7 + $0x9e0] sm:$0xff]  ;;  %v3513_v14 = vpack.c.bf16 %v537_v5, %v525_v4 }
  0x9c   :  { %3502 = vmatpush1.bf16.msra.mxu1 %v3501_v38  ;;  %v422_v0 = vld [vmem:[#allocation7 + $0xa48] sm:$0xff]  ;;  %v421_v11 = vld [vmem:[#allocation7 + $0xa40] sm:$0xff] }
  0x9d   :  { %3504 = vmatprep.subr.bf16.mxu1 %v3503_v40  ;;  %v4944_v2 = vld [vmem:[#allocation4 + $0x18] sm:$0xff]  ;;  %v3683_v9 = vpack.c.bf16 %v422_v0, %v410_v63  ;;  %v549_v17 = vld [vmem:[#allocation7 + $0xe40] sm:$0xff]  ;;  %v3685_v20 = vpack.c.bf16 %v421_v11, %v409_v10 }
  0x9e   :  { %v550_v6 = vld [vmem:[#allocation7 + $0xe48] sm:$0xff]  ;;  %v561_v18 = vld [vmem:[#allocation7 + $0xea0] sm:$0xff]  ;;  %3682 = vmatpush1.bf16.msra.mxu0 %v3681_v7  ;;  %v96_v7 = vld [vmem:[#allocation7 + $0x18] sm:$0xff] }
  0x9f   :  { %798 = vmatmul.mubr.f32.vlgmr.msra.gmra.mrb[0].mxu1 %v4938_v50  ;;  %v562_v8 = vld [vmem:[#allocation7 + $0xea8] sm:$0xff]  ;;  %3684 = vmatprep.subr.bf16.mxu0 %v3683_v9  ;;  %v433_v23 = vld [vmem:[#allocation7 + $0xaa0] sm:$0xff]  ;;  %v3517_v27 = vpack.c.bf16 %v561_v18, %v549_v17  ;;  %v108_v9 = vld [vmem:[#allocation7 + $0x78] sm:$0xff] }
  0xa0   :  { %3506 = vmatpush1.bf16.msra.mxu1 %v3505_v51  ;;  %803 = vmatprep.mubr.f32.mxu1 %v4940_v56  ;;  %v434_v12 = vld [vmem:[#allocation7 + $0xaa8] sm:$0xff]  ;;  %v3515_v16 = vpack.c.bf16 %v562_v8, %v550_v6  ;;  %v445_v24 = vld [vmem:[#allocation7 + $0xb00] sm:$0xff]  ;;  %v3535_v17 = vpack.c.bf16 %v108_v9, %v96_v7  ;;  %v95_v18 = vld [vmem:[#allocation7 + $0x10] sm:$0xff] }
  0xa1   :  { %3508 = vmatprep.subr.bf16.mxu1 %v3507_v53  ;;  %v446_v13 = vld [vmem:[#allocation7 + $0xb08] sm:$0xff]  ;;  %v573_v29 = vld [vmem:[#allocation7 + $0xf00] sm:$0xff]  ;;  %v3689_v32 = vpack.c.bf16 %v445_v24, %v433_v23  ;;  %v203_v9 = vld [vmem:[#allocation7 + $0x370] sm:$0xff] }
  0xa2   :  { %v574_v19 = vld [vmem:[#allocation7 + $0xf08] sm:$0xff]  ;;  %v3687_v22 = vpack.c.bf16 %v446_v13, %v434_v12  ;;  %v585_v30 = vld [vmem:[#allocation7 + $0xf60] sm:$0xff]  ;;  %3686 = vmatpush1.bf16.msra.mxu0 %v3685_v20  ;;  %v120_v20 = vld [vmem:[#allocation7 + $0xd8] sm:$0xff] }
  0xa3   :  { %804 = vmatmul.mubr.f32.gmra.mrb[2].mxu1 %v4944_v2  ;;  %v586_v21 = vld [vmem:[#allocation7 + $0xf68] sm:$0xff]  ;;  %v457_v35 = vld [vmem:[#allocation7 + $0xb60] sm:$0xff]  ;;  %v3521_v39 = vpack.c.bf16 %v585_v30, %v573_v29 }
  0xa4   :  { %3510 = vmatpush1.bf16.msra.mxu1 %v3509_v1  ;;  %874 = vmatprep.mubr.f32.mxu1 %v4831_v15  ;;  %v458_v25 = vld [vmem:[#allocation7 + $0xb68] sm:$0xff]  ;;  %v3519_v28 = vpack.c.bf16 %v586_v21, %v574_v19  ;;  %v469_v36 = vld [vmem:[#allocation7 + $0xbc0] sm:$0xff]  ;;  %v107_v19 = vld [vmem:[#allocation7 + $0x70] sm:$0xff] }
  0xa5   :  { %3512 = vmatprep.subr.bf16.mxu1 %v3511_v3  ;;  %v470_v26 = vld [vmem:[#allocation7 + $0xbc8] sm:$0xff]  ;;  %3688 = vmatprep.subr.bf16.mxu0 %v3687_v22  ;;  %v597_v41 = vld [vmem:[#allocation7 + $0xfc0] sm:$0xff]  ;;  %v3693_v44 = vpack.c.bf16 %v469_v36, %v457_v35  ;;  %v132_v22 = vld [vmem:[#allocation7 + $0x138] sm:$0xff]  ;;  %v3537_v29 = vpack.c.bf16 %v107_v19, %v95_v18 }
  0xa6   :  { %v598_v31 = vld [vmem:[#allocation7 + $0xfc8] sm:$0xff]  ;;  %v3691_v34 = vpack.c.bf16 %v470_v26, %v458_v25  ;;  %v609_v42 = vld [vmem:[#allocation7 + $0x1020] sm:$0xff]  ;;  %3690 = vmatpush1.bf16.msra.mxu0 %v3689_v32  ;;  %v3539_v30 = vpack.c.bf16 %v132_v22, %v120_v20  ;;  %v131_v32 = vld [vmem:[#allocation7 + $0x130] sm:$0xff] }
  0xa7   :  { %v610_v33 = vld [vmem:[#allocation7 + $0x1028] sm:$0xff]  ;;  %v481_v47 = vld [vmem:[#allocation7 + $0xc20] sm:$0xff]  ;;  %v3525_v52 = vpack.c.bf16 %v609_v42, %v597_v41  ;;  %v156_v35 = vld [vmem:[#allocation7 + $0x1f8] sm:$0xff] }
  0xa8   :  { %3514 = vmatpush1.bf16.msra.mxu1 %v3513_v14  ;;  %v482_v37 = vld [vmem:[#allocation7 + $0xc28] sm:$0xff]  ;;  %v3523_v40 = vpack.c.bf16 %v610_v33, %v598_v31  ;;  %3692 = vmatprep.subr.bf16.mxu0 %v3691_v34  ;;  %v493_v48 = vld [vmem:[#allocation7 + $0xc80] sm:$0xff]  ;;  %v119_v31 = vld [vmem:[#allocation7 + $0xd0] sm:$0xff] }
  0xa9   :  { %3516 = vmatprep.subr.bf16.mxu1 %v3515_v16  ;;  %v494_v38 = vld [vmem:[#allocation7 + $0xc88] sm:$0xff]  ;;  %v621_v54 = vld [vmem:[#allocation7 + $0x1080] sm:$0xff]  ;;  %v3697_v59 = vpack.c.bf16 %v493_v48, %v481_v47  ;;  %v144_v33 = vld [vmem:[#allocation7 + $0x198] sm:$0xff]  ;;  %v3541_v42 = vpack.c.bf16 %v131_v32, %v119_v31 }
  0xaa   :  { %v622_v43 = vld [vmem:[#allocation7 + $0x1088] sm:$0xff]  ;;  %v3695_v46 = vpack.c.bf16 %v494_v38, %v482_v37  ;;  %v633_v55 = vld [vmem:[#allocation7 + $0x10e0] sm:$0xff]  ;;  %3694 = vmatpush1.bf16.msra.mxu0 %v3693_v44  ;;  %v4956_v41 = vld [vmem:[#allocation4 + $0x28] sm:$0xff] }
  0xab   :  { %v634_v45 = vld [vmem:[#allocation7 + $0x10e8] sm:$0xff]  ;;  %v505_v62 = vld [vmem:[#allocation7 + $0xce0] sm:$0xff]  ;;  %v3529_v3 = vpack.c.bf16 %v633_v55, %v621_v54  ;;  %v143_v44 = vld [vmem:[#allocation7 + $0x190] sm:$0xff] }
  0xac   :  { %3518 = vmatpush1.bf16.msra.mxu1 %v3517_v27  ;;  %v506_v49 = vld [vmem:[#allocation7 + $0xce8] sm:$0xff]  ;;  %v3527_v53 = vpack.c.bf16 %v634_v45, %v622_v43  ;;  %3696 = vmatprep.subr.bf16.mxu0 %v3695_v46  ;;  %v517_v63 = vld [vmem:[#allocation7 + $0xd40] sm:$0xff]  ;;  %v3543_v43 = vpack.c.bf16 %v156_v35, %v144_v33  ;;  %v155_v45 = vld [vmem:[#allocation7 + $0x1f0] sm:$0xff] }
  0xad   :  { %3520 = vmatprep.subr.bf16.mxu1 %v3519_v28  ;;  %v518_v51 = vld [vmem:[#allocation7 + $0xd48] sm:$0xff]  ;;  %1106 = vmatmul.mubr.f32.vlgmr.msra.gmra.mrb[0].mxu0 %v4938_v50  ;;  %v645_v5 = vld [vmem:[#allocation7 + $0x1140] sm:$0xff]  ;;  %v3701_v8 = vpack.c.bf16 %v517_v63, %v505_v62  ;;  %v168_v46 = vld [vmem:[#allocation7 + $0x258] sm:$0xff]  ;;  %v3545_v55 = vpack.c.bf16 %v155_v45, %v143_v44 }
  0xae   :  { %v646_v58 = vld [vmem:[#allocation7 + $0x1148] sm:$0xff]  ;;  %v3699_v61 = vpack.c.bf16 %v518_v51, %v506_v49  ;;  %v657_v6 = vld [vmem:[#allocation7 + $0x11a0] sm:$0xff]  ;;  %3698 = vmatpush1.bf16.msra.mxu0 %v3697_v59  ;;  %1111 = vmatprep.mubr.f32.mxu0 %v4940_v56  ;;  %v180_v48 = vld [vmem:[#allocation7 + $0x2b8] sm:$0xff] }
  0xaf   :  { %v658_v60 = vld [vmem:[#allocation7 + $0x11a8] sm:$0xff]  ;;  %v529_v11 = vld [vmem:[#allocation7 + $0xda0] sm:$0xff]  ;;  %v3533_v16 = vpack.c.bf16 %v657_v6, %v645_v5  ;;  %v167_v59 = vld [vmem:[#allocation7 + $0x250] sm:$0xff] }
  0xb0   :  { %3522 = vmatpush1.bf16.msra.mxu1 %v3521_v39  ;;  %v530_v0 = vld [vmem:[#allocation7 + $0xda8] sm:$0xff]  ;;  %v3531_v4 = vpack.c.bf16 %v658_v60, %v646_v58  ;;  %3700 = vmatprep.subr.bf16.mxu0 %v3699_v61  ;;  %v541_v12 = vld [vmem:[#allocation7 + $0xe00] sm:$0xff]  ;;  %v3547_v58 = vpack.c.bf16 %v180_v48, %v168_v46  ;;  %v179_v60 = vld [vmem:[#allocation7 + $0x2b0] sm:$0xff] }
  0xb1   :  { %3524 = vmatprep.subr.bf16.mxu1 %v3523_v40  ;;  %v542_v1 = vld [vmem:[#allocation7 + $0xe08] sm:$0xff]  ;;  %1112 = vmatmul.mubr.f32.gmra.mrb[2].mxu0 %v4944_v2  ;;  %v3705_v21 = vpack.c.bf16 %v541_v12, %v529_v11  ;;  %v553_v24 = vld [vmem:[#allocation7 + $0xe60] sm:$0xff]  ;;  %v192_v61 = vld [vmem:[#allocation7 + $0x318] sm:$0xff]  ;;  %v3549_v6 = vpack.c.bf16 %v179_v60, %v167_v59 }
  0xb2   :  { %v3703_v10 = vpack.c.bf16 %v542_v1, %v530_v0  ;;  %v554_v13 = vld [vmem:[#allocation7 + $0xe68] sm:$0xff]  ;;  %3702 = vmatpush1.bf16.msra.mxu0 %v3701_v8  ;;  %v565_v25 = vld [vmem:[#allocation7 + $0xec0] sm:$0xff]  ;;  %1182 = vmatprep.mubr.f32.mxu0 %v4831_v15  ;;  %v204_v63 = vld [vmem:[#allocation7 + $0x378] sm:$0xff] }
  0xb3   :  { %v566_v14 = vld [vmem:[#allocation7 + $0xec8] sm:$0xff]  ;;  %v4952_v28 = vld [vmem:[#allocation4 + $0x10] sm:$0xff]  ;;  %v3709_v34 = vpack.c.bf16 %v565_v25, %v553_v24  ;;  %v3551_v7 = vpack.c.bf16 %v204_v63, %v192_v61  ;;  %v191_v8 = vld [vmem:[#allocation7 + $0x310] sm:$0xff] }
  0xb4   :  { %3526 = vmatpush1.bf16.msra.mxu1 %v3525_v52  ;;  %3704 = vmatprep.subr.bf16.mxu0 %v3703_v10  ;;  %v3707_v23 = vpack.c.bf16 %v566_v14, %v554_v13  ;;  %v578_v26 = vld [vmem:[#allocation7 + $0xf28] sm:$0xff]  ;;  %v577_v37 = vld [vmem:[#allocation7 + $0xf20] sm:$0xff]  ;;  %v216_v10 = vld [vmem:[#allocation7 + $0x3d8] sm:$0xff]  ;;  %v3553_v19 = vpack.c.bf16 %v203_v9, %v191_v8 }
  0xb5   :  { %3528 = vmatprep.subr.bf16.mxu1 %v3527_v53  ;;  %v590_v27 = vld [vmem:[#allocation7 + $0xf88] sm:$0xff]  ;;  %v589_v38 = vld [vmem:[#allocation7 + $0xf80] sm:$0xff]  ;;  %v228_v12 = vld [vmem:[#allocation7 + $0x438] sm:$0xff] }
  0xb6   :  { %3706 = vmatpush1.bf16.msra.mxu0 %v3705_v21  ;;  %v3711_v36 = vpack.c.bf16 %v590_v27, %v578_v26  ;;  %v602_v39 = vld [vmem:[#allocation7 + $0xfe8] sm:$0xff]  ;;  %v3713_v47 = vpack.c.bf16 %v589_v38, %v577_v37  ;;  %v601_v51 = vld [vmem:[#allocation7 + $0xfe0] sm:$0xff]  ;;  %v3555_v20 = vpack.c.bf16 %v228_v12, %v216_v10  ;;  %v215_v21 = vld [vmem:[#allocation7 + $0x3d0] sm:$0xff] }
  0xb7   :  { %3708 = vmatprep.subr.bf16.mxu0 %v3707_v23  ;;  %v614_v40 = vld [vmem:[#allocation7 + $0x1048] sm:$0xff]  ;;  %v613_v52 = vld [vmem:[#allocation7 + $0x1040] sm:$0xff]  ;;  %v227_v22 = vld [vmem:[#allocation7 + $0x430] sm:$0xff] }
  0xb8   :  { %3530 = vmatpush1.bf16.msra.mxu1 %v3529_v3  ;;  %v3715_v49 = vpack.c.bf16 %v614_v40, %v602_v39  ;;  %v626_v53 = vld [vmem:[#allocation7 + $0x10a8] sm:$0xff]  ;;  %v3717_v62 = vpack.c.bf16 %v613_v52, %v601_v51  ;;  %v625_v1 = vld [vmem:[#allocation7 + $0x10a0] sm:$0xff]  ;;  %v240_v23 = vld [vmem:[#allocation7 + $0x498] sm:$0xff]  ;;  %v3557_v32 = vpack.c.bf16 %v227_v22, %v215_v21 }
  0xb9   :  { %3532 = vmatprep.subr.bf16.mxu1 %v3531_v4  ;;  %v638_v54 = vld [vmem:[#allocation7 + $0x1108] sm:$0xff]  ;;  %v637_v3 = vld [vmem:[#allocation7 + $0x1100] sm:$0xff]  ;;  %v252_v25 = vld [vmem:[#allocation7 + $0x4f8] sm:$0xff] }
  0xba   :  { %3710 = vmatpush1.bf16.msra.mxu0 %v3709_v34  ;;  %v3719_v0 = vpack.c.bf16 %v638_v54, %v626_v53  ;;  %v650_v4 = vld [vmem:[#allocation7 + $0x1168] sm:$0xff]  ;;  %v3721_v11 = vpack.c.bf16 %v637_v3, %v625_v1  ;;  %v649_v14 = vld [vmem:[#allocation7 + $0x1160] sm:$0xff]  ;;  %v3559_v33 = vpack.c.bf16 %v252_v25, %v240_v23  ;;  %v239_v34 = vld [vmem:[#allocation7 + $0x490] sm:$0xff] }
  0xbb   :  { %3712 = vmatprep.subr.bf16.mxu0 %v3711_v36  ;;  %v662_v5 = vld [vmem:[#allocation7 + $0x11c8] sm:$0xff]  ;;  %v101_v27 = vld [vmem:[#allocation7 + $0x40] sm:$0xff]  ;;  %v251_v35 = vld [vmem:[#allocation7 + $0x4f0] sm:$0xff] }
  0xbc   :  { %3534 = vmatpush1.bf16.msra.mxu1 %v3533_v16  ;;  %v3723_v13 = vpack.c.bf16 %v662_v5, %v650_v4  ;;  %v661_v16 = vld [vmem:[#allocation7 + $0x11c0] sm:$0xff]  ;;  %v114_v18 = vld [vmem:[#allocation7 + $0xa8] sm:$0xff]  ;;  %v264_v36 = vld [vmem:[#allocation7 + $0x558] sm:$0xff]  ;;  %v3561_v45 = vpack.c.bf16 %v251_v35, %v239_v34 }
  0xbd   :  { %3536 = vmatprep.subr.bf16.mxu1 %v3535_v17  ;;  %v102_v17 = vld [vmem:[#allocation7 + $0x48] sm:$0xff]  ;;  %v3725_v24 = vpack.c.bf16 %v661_v16, %v649_v14  ;;  %v276_v38 = vld [vmem:[#allocation7 + $0x5b8] sm:$0xff]  ;;  %v125_v40 = vld [vmem:[#allocation7 + $0x100] sm:$0xff] }
  0xbe   :  { %3714 = vmatpush1.bf16.msra.mxu0 %v3713_v47  ;;  %v3823_v26 = vpack.c.bf16 %v114_v18, %v102_v17  ;;  %v138_v31 = vld [vmem:[#allocation7 + $0x168] sm:$0xff]  ;;  %v3563_v46 = vpack.c.bf16 %v276_v38, %v264_v36  ;;  %v263_v47 = vld [vmem:[#allocation7 + $0x550] sm:$0xff]  ;;  %v300_v52 = vld [vmem:[#allocation7 + $0x678] sm:$0xff] }
  0xbf   :  { %875 = vmatmul.mubr.f32.vlgmr.msra.gmra.mrb[0].mxu1 %v4952_v28  ;;  %3716 = vmatprep.subr.bf16.mxu0 %v3715_v49  ;;  %v162_v44 = vld [vmem:[#allocation7 + $0x228] sm:$0xff]  ;;  %v275_v48 = vld [vmem:[#allocation7 + $0x5b0] sm:$0xff]  ;;  %v288_v49 = vld [vmem:[#allocation7 + $0x618] sm:$0xff] }
  0xc0   :  { %3538 = vmatpush1.bf16.msra.mxu1 %v3537_v29  ;;  %880 = vmatprep.mubr.f32.mxu1 %v4831_v15  ;;  %v113_v29 = vld [vmem:[#allocation7 + $0xa0] sm:$0xff]  ;;  %v186_v59 = vld [vmem:[#allocation7 + $0x2e8] sm:$0xff]  ;;  %v3565_v60 = vpack.c.bf16 %v275_v48, %v263_v47  ;;  %v3567_v61 = vpack.c.bf16 %v300_v52, %v288_v49  ;;  %v299_v63 = vld [vmem:[#allocation7 + $0x670] sm:$0xff] }
  0xc1   :  { %3540 = vmatprep.subr.bf16.mxu1 %v3539_v30  ;;  %v126_v30 = vld [vmem:[#allocation7 + $0x108] sm:$0xff]  ;;  %v3825_v37 = vpack.c.bf16 %v113_v29, %v101_v27  ;;  %v149_v54 = vld [vmem:[#allocation7 + $0x1c0] sm:$0xff]  ;;  %v324_v3 = vld [vmem:[#allocation7 + $0x738] sm:$0xff] }
  0xc2   :  { %3718 = vmatpush1.bf16.msra.mxu0 %v3717_v62  ;;  %v3827_v39 = vpack.c.bf16 %v138_v31, %v126_v30  ;;  %v287_v62 = vld [vmem:[#allocation7 + $0x610] sm:$0xff]  ;;  %v173_v5 = vld [vmem:[#allocation7 + $0x280] sm:$0xff]  ;;  %v210_v8 = vld [vmem:[#allocation7 + $0x3a8] sm:$0xff] }
  0xc3   :  { %881 = vmatmul.mubr.f32.gmra.mrb[2].mxu1 %v4956_v41  ;;  %3720 = vmatprep.subr.bf16.mxu0 %v3719_v0  ;;  %v312_v0 = vld [vmem:[#allocation7 + $0x6d8] sm:$0xff]  ;;  %v3569_v9 = vpack.c.bf16 %v299_v63, %v287_v62  ;;  %v323_v12 = vld [vmem:[#allocation7 + $0x730] sm:$0xff]  ;;  %v197_v18 = vld [vmem:[#allocation7 + $0x340] sm:$0xff] }
  0xc4   :  { %3542 = vmatpush1.bf16.msra.mxu1 %v3541_v42  ;;  %951 = vmatprep.mubr.f32.mxu1 %v4934_v57  ;;  %v137_v42 = vld [vmem:[#allocation7 + $0x160] sm:$0xff]  ;;  %v3571_v10 = vpack.c.bf16 %v324_v3, %v312_v0  ;;  %v348_v16 = vld [vmem:[#allocation7 + $0x7f8] sm:$0xff]  ;;  %v234_v21 = vld [vmem:[#allocation7 + $0x468] sm:$0xff] }
  0xc5   :  { %3544 = vmatprep.subr.bf16.mxu1 %v3543_v43  ;;  %v150_v43 = vld [vmem:[#allocation7 + $0x1c8] sm:$0xff]  ;;  %v3829_v51 = vpack.c.bf16 %v137_v42, %v125_v40  ;;  %v335_v23 = vld [vmem:[#allocation7 + $0x790] sm:$0xff]  ;;  %v360_v25 = vld [vmem:[#allocation7 + $0x858] sm:$0xff] }
  0xc6   :  { %3722 = vmatpush1.bf16.msra.mxu0 %v3721_v11  ;;  %v3831_v53 = vpack.c.bf16 %v162_v44, %v150_v43  ;;  %v311_v11 = vld [vmem:[#allocation7 + $0x6d0] sm:$0xff]  ;;  %v372_v27 = vld [vmem:[#allocation7 + $0x8b8] sm:$0xff]  ;;  %v221_v30 = vld [vmem:[#allocation7 + $0x400] sm:$0xff] }
  0xc7   :  { %3724 = vmatprep.subr.bf16.mxu0 %v3723_v13  ;;  %v336_v13 = vld [vmem:[#allocation7 + $0x798] sm:$0xff]  ;;  %v233_v31 = vld [vmem:[#allocation7 + $0x460] sm:$0xff]  ;;  %v3579_v35 = vpack.c.bf16 %v372_v27, %v360_v25  ;;  %v359_v36 = vld [vmem:[#allocation7 + $0x850] sm:$0xff] }
  0xc8   :  { %3546 = vmatpush1.bf16.msra.mxu1 %v3545_v55  ;;  %v161_v55 = vld [vmem:[#allocation7 + $0x220] sm:$0xff]  ;;  %v3575_v22 = vpack.c.bf16 %v348_v16, %v336_v13  ;;  %v384_v38 = vld [vmem:[#allocation7 + $0x918] sm:$0xff]  ;;  %v383_v49 = vld [vmem:[#allocation7 + $0x910] sm:$0xff] }
  0xc9   :  { %3548 = vmatprep.subr.bf16.mxu1 %v3547_v58  ;;  %v174_v58 = vld [vmem:[#allocation7 + $0x288] sm:$0xff]  ;;  %v3833_v1 = vpack.c.bf16 %v161_v55, %v149_v54  ;;  %v396_v40 = vld [vmem:[#allocation7 + $0x978] sm:$0xff]  ;;  %v245_v43 = vld [vmem:[#allocation7 + $0x4c0] sm:$0xff] }
  0xca   :  { %3726 = vmatpush1.bf16.msra.mxu0 %v3725_v24  ;;  %v3835_v4 = vpack.c.bf16 %v186_v59, %v174_v58  ;;  %v347_v24 = vld [vmem:[#allocation7 + $0x7f0] sm:$0xff]  ;;  %v257_v44 = vld [vmem:[#allocation7 + $0x520] sm:$0xff]  ;;  %v3583_v48 = vpack.c.bf16 %v396_v40, %v384_v38  ;;  %v408_v52 = vld [vmem:[#allocation7 + $0x9d8] sm:$0xff] }
  0xcb   :  { %3824 = vmatprep.subr.bf16.mxu0 %v3823_v26  ;;  %v3577_v34 = vpack.c.bf16 %v347_v24, %v335_v23  ;;  %v420_v54 = vld [vmem:[#allocation7 + $0xa38] sm:$0xff]  ;;  %v269_v58 = vld [vmem:[#allocation7 + $0x580] sm:$0xff]  ;;  %v407_v0 = vld [vmem:[#allocation7 + $0x9d0] sm:$0xff] }
  0xcc   :  { %3550 = vmatpush1.bf16.msra.mxu1 %v3549_v6  ;;  %v185_v6 = vld [vmem:[#allocation7 + $0x2e0] sm:$0xff]  ;;  %v3587_v63 = vpack.c.bf16 %v420_v54, %v408_v52  ;;  %v432_v3 = vld [vmem:[#allocation7 + $0xa98] sm:$0xff]  ;;  %v431_v13 = vld [vmem:[#allocation7 + $0xa90] sm:$0xff] }
  0xcd   :  { %3552 = vmatprep.subr.bf16.mxu1 %v3551_v7  ;;  %1183 = vmatmul.mubr.f32.vlgmr.msra.gmra.mrb[0].mxu0 %v4952_v28  ;;  %v198_v7 = vld [vmem:[#allocation7 + $0x348] sm:$0xff]  ;;  %v3837_v14 = vpack.c.bf16 %v185_v6, %v173_v5  ;;  %v281_v59 = vld [vmem:[#allocation7 + $0x5e0] sm:$0xff]  ;;  %v444_v5 = vld [vmem:[#allocation7 + $0xaf8] sm:$0xff] }
  0xce   :  { %3826 = vmatpush1.bf16.msra.mxu0 %v3825_v37  ;;  %1188 = vmatprep.mubr.f32.mxu0 %v4831_v15  ;;  %v3839_v17 = vpack.c.bf16 %v210_v8, %v198_v7  ;;  %v371_v37 = vld [vmem:[#allocation7 + $0x8b0] sm:$0xff]  ;;  %v293_v7 = vld [vmem:[#allocation7 + $0x640] sm:$0xff]  ;;  %v456_v16 = vld [vmem:[#allocation7 + $0xb58] sm:$0xff] }
  0xcf   :  { %3828 = vmatprep.subr.bf16.mxu0 %v3827_v39  ;;  %v3845_v39 = vpack.c.bf16 %v233_v31, %v221_v30  ;;  %v3581_v47 = vpack.c.bf16 %v371_v37, %v359_v36  ;;  %v305_v8 = vld [vmem:[#allocation7 + $0x6a0] sm:$0xff]  ;;  %v455_v25 = vld [vmem:[#allocation7 + $0xb50] sm:$0xff]  ;;  %v480_v27 = vld [vmem:[#allocation7 + $0xc18] sm:$0xff] }
  0xd0   :  { %3554 = vmatpush1.bf16.msra.mxu1 %v3553_v19  ;;  %v209_v19 = vld [vmem:[#allocation7 + $0x3a0] sm:$0xff]  ;;  %v492_v30 = vld [vmem:[#allocation7 + $0xc78] sm:$0xff]  ;;  %v479_v38 = vld [vmem:[#allocation7 + $0xc10] sm:$0xff] }
  0xd1   :  { %3556 = vmatprep.subr.bf16.mxu1 %v3555_v20  ;;  %1189 = vmatmul.mubr.f32.gmra.mrb[2].mxu0 %v4956_v41  ;;  %v222_v20 = vld [vmem:[#allocation7 + $0x408] sm:$0xff]  ;;  %v3841_v26 = vpack.c.bf16 %v209_v19, %v197_v18  ;;  %v468_v18 = vld [vmem:[#allocation7 + $0xbb8] sm:$0xff]  ;;  %v3599_v37 = vpack.c.bf16 %v492_v30, %v480_v27  ;;  %v503_v52 = vld [vmem:[#allocation7 + $0xcd0] sm:$0xff] }
  0xd2   :  { %3830 = vmatpush1.bf16.msra.mxu0 %v3829_v51  ;;  %1413 = vmatprep.mubr.f32.mxu0 %v4934_v57  ;;  %v3573_v57 = vpack.c.bf16 %v323_v12, %v311_v11  ;;  %v3843_v29 = vpack.c.bf16 %v234_v21, %v222_v20  ;;  %v395_v51 = vld [vmem:[#allocation7 + $0x970] sm:$0xff]  ;;  %v3591_v12 = vpack.c.bf16 %v444_v5, %v432_v3  ;;  %v317_v20 = vld [vmem:[#allocation7 + $0x700] sm:$0xff]  ;;  %v504_v40 = vld [vmem:[#allocation7 + $0xcd8] sm:$0xff] }
  0xd3   :  { %3832 = vmatprep.subr.bf16.mxu0 %v3831_v53  ;;  %v3849_v53 = vpack.c.bf16 %v257_v44, %v245_v43  ;;  %v3585_v62 = vpack.c.bf16 %v395_v51, %v383_v49  ;;  %v329_v21 = vld [vmem:[#allocation7 + $0x760] sm:$0xff]  ;;  %v3595_v24 = vpack.c.bf16 %v468_v18, %v456_v16  ;;  %v516_v43 = vld [vmem:[#allocation7 + $0xd38] sm:$0xff]  ;;  %v527_v3 = vld [vmem:[#allocation7 + $0xd90] sm:$0xff] }
  0xd4   :  { %3558 = vmatpush1.bf16.msra.mxu1 %v3557_v32  ;;  %v246_v32 = vld [vmem:[#allocation7 + $0x4c8] sm:$0xff]  ;;  %v3603_v51 = vpack.c.bf16 %v516_v43, %v504_v40  ;;  %v528_v54 = vld [vmem:[#allocation7 + $0xd98] sm:$0xff]  ;;  %v563_v16 = vld [vmem:[#allocation7 + $0xeb0] sm:$0xff] }
  0xd5   :  { %3560 = vmatprep.subr.bf16.mxu1 %v3559_v33  ;;  %v258_v33 = vld [vmem:[#allocation7 + $0x528] sm:$0xff]  ;;  %v552_v5 = vld [vmem:[#allocation7 + $0xe58] sm:$0xff]  ;;  %v587_v27 = vld [vmem:[#allocation7 + $0xf70] sm:$0xff] }
  0xd6   :  { %3834 = vmatpush1.bf16.msra.mxu0 %v3833_v1  ;;  %v3847_v42 = vpack.c.bf16 %v258_v33, %v246_v32  ;;  %v419_v1 = vld [vmem:[#allocation7 + $0xa30] sm:$0xff]  ;;  %v341_v32 = vld [vmem:[#allocation7 + $0x7c0] sm:$0xff] }
  0xd7   :  { %3836 = vmatprep.subr.bf16.mxu0 %v3835_v4  ;;  %v3853_v4 = vpack.c.bf16 %v281_v59, %v269_v58  ;;  %v3589_v11 = vpack.c.bf16 %v419_v1, %v407_v0  ;;  %v353_v33 = vld [vmem:[#allocation7 + $0x820] sm:$0xff]  ;;  %v540_v58 = vld [vmem:[#allocation7 + $0xdf8] sm:$0xff]  ;;  %v611_v40 = vld [vmem:[#allocation7 + $0x1030] sm:$0xff] }
  0xd8   :  { %3562 = vmatpush1.bf16.msra.mxu1 %v3561_v45  ;;  %v270_v45 = vld [vmem:[#allocation7 + $0x588] sm:$0xff]  ;;  %v3607_v1 = vpack.c.bf16 %v540_v58, %v528_v54  ;;  %v635_v54 = vld [vmem:[#allocation7 + $0x10f0] sm:$0xff] }
  0xd9   :  { %3564 = vmatprep.subr.bf16.mxu1 %v3563_v46  ;;  %v282_v46 = vld [vmem:[#allocation7 + $0x5e8] sm:$0xff] }
  0xda   :  { %3838 = vmatpush1.bf16.msra.mxu0 %v3837_v14  ;;  %v3851_v55 = vpack.c.bf16 %v282_v46, %v270_v45  ;;  %v443_v14 = vld [vmem:[#allocation7 + $0xaf0] sm:$0xff]  ;;  %v365_v45 = vld [vmem:[#allocation7 + $0x880] sm:$0xff] }
  0xdb   :  { %3840 = vmatprep.subr.bf16.mxu0 %v3839_v17  ;;  %v3857_v17 = vpack.c.bf16 %v305_v8, %v293_v7  ;;  %v3593_v23 = vpack.c.bf16 %v443_v14, %v431_v13  ;;  %v377_v46 = vld [vmem:[#allocation7 + $0x8e0] sm:$0xff]  ;;  %v564_v7 = vld [vmem:[#allocation7 + $0xeb8] sm:$0xff]  ;;  %v551_v14 = vld [vmem:[#allocation7 + $0xe50] sm:$0xff] }
  0xdc   :  { %3566 = vmatpush1.bf16.msra.mxu1 %v3565_v60  ;;  %v294_v60 = vld [vmem:[#allocation7 + $0x648] sm:$0xff] }
  0xdd   :  { %3568 = vmatprep.subr.bf16.mxu1 %v3567_v61  ;;  %v306_v61 = vld [vmem:[#allocation7 + $0x6a8] sm:$0xff] }
  0xde   :  { %3842 = vmatpush1.bf16.msra.mxu0 %v3841_v26  ;;  %v3855_v6 = vpack.c.bf16 %v306_v61, %v294_v60  ;;  %v467_v26 = vld [vmem:[#allocation7 + $0xbb0] sm:$0xff]  ;;  %v389_v60 = vld [vmem:[#allocation7 + $0x940] sm:$0xff] }
  0xdf   :  { %3844 = vmatprep.subr.bf16.mxu0 %v3843_v29  ;;  %v3861_v29 = vpack.c.bf16 %v329_v21, %v317_v20  ;;  %v3597_v36 = vpack.c.bf16 %v467_v26, %v455_v25  ;;  %v401_v61 = vld [vmem:[#allocation7 + $0x9a0] sm:$0xff]  ;;  %v575_v26 = vld [vmem:[#allocation7 + $0xf10] sm:$0xff] }
  0xe0   :  { %3570 = vmatpush1.bf16.msra.mxu1 %v3569_v9  ;;  %v318_v9 = vld [vmem:[#allocation7 + $0x708] sm:$0xff]  ;;  %v437_v21 = vld [vmem:[#allocation7 + $0xac0] sm:$0xff] }
  0xe1   :  { %3572 = vmatprep.subr.bf16.mxu1 %v3571_v10  ;;  %v330_v10 = vld [vmem:[#allocation7 + $0x768] sm:$0xff] }
  0xe2   :  { %3846 = vmatpush1.bf16.msra.mxu0 %v3845_v39  ;;  %v3859_v19 = vpack.c.bf16 %v330_v10, %v318_v9  ;;  %v491_v39 = vld [vmem:[#allocation7 + $0xc70] sm:$0xff]  ;;  %v413_v9 = vld [vmem:[#allocation7 + $0xa00] sm:$0xff] }
  0xe3   :  { %3848 = vmatprep.subr.bf16.mxu0 %v3847_v42  ;;  %v3865_v42 = vpack.c.bf16 %v353_v33, %v341_v32  ;;  %v3601_v49 = vpack.c.bf16 %v491_v39, %v479_v38  ;;  %v425_v10 = vld [vmem:[#allocation7 + $0xa60] sm:$0xff]  ;;  %v599_v39 = vld [vmem:[#allocation7 + $0xfd0] sm:$0xff] }
  0xe4   :  { %3574 = vmatpush1.bf16.msra.mxu1 %v3573_v57  ;;  %v342_v57 = vld [vmem:[#allocation7 + $0x7c8] sm:$0xff]  ;;  %v3877_v18 = vpack.c.bf16 %v425_v10, %v413_v9  ;;  %v461_v33 = vld [vmem:[#allocation7 + $0xb80] sm:$0xff] }
  0xe5   :  { %3576 = vmatprep.subr.bf16.mxu1 %v3575_v22  ;;  %v354_v22 = vld [vmem:[#allocation7 + $0x828] sm:$0xff]  ;;  %v533_v10 = vld [vmem:[#allocation7 + $0xdc0] sm:$0xff] }
  0xe6   :  { %3850 = vmatpush1.bf16.msra.mxu0 %v3849_v53  ;;  %v3863_v31 = vpack.c.bf16 %v354_v22, %v342_v57  ;;  %v515_v53 = vld [vmem:[#allocation7 + $0xd30] sm:$0xff]  ;;  %v449_v57 = vld [vmem:[#allocation7 + $0xb20] sm:$0xff]  ;;  %v462_v22 = vld [vmem:[#allocation7 + $0xb88] sm:$0xff] }
  0xe7   :  { %3852 = vmatprep.subr.bf16.mxu0 %v3851_v55  ;;  %v3869_v55 = vpack.c.bf16 %v377_v46, %v365_v45  ;;  %v3605_v0 = vpack.c.bf16 %v515_v53, %v503_v52  ;;  %v3881_v30 = vpack.c.bf16 %v449_v57, %v437_v21  ;;  %v485_v46 = vld [vmem:[#allocation7 + $0xc40] sm:$0xff]  ;;  %v623_v53 = vld [vmem:[#allocation7 + $0x1090] sm:$0xff] }
  0xe8   :  { %3578 = vmatpush1.bf16.msra.mxu1 %v3577_v34  ;;  %v366_v34 = vld [vmem:[#allocation7 + $0x888] sm:$0xff]  ;;  %v557_v57 = vld [vmem:[#allocation7 + $0xe80] sm:$0xff] }
  0xe9   :  { %3580 = vmatprep.subr.bf16.mxu1 %v3579_v35  ;;  %v378_v35 = vld [vmem:[#allocation7 + $0x8e8] sm:$0xff] }
  0xea   :  { %3854 = vmatpush1.bf16.msra.mxu0 %v3853_v4  ;;  %v3867_v44 = vpack.c.bf16 %v378_v35, %v366_v34  ;;  %v539_v4 = vld [vmem:[#allocation7 + $0xdf0] sm:$0xff]  ;;  %v473_v34 = vld [vmem:[#allocation7 + $0xbe0] sm:$0xff]  ;;  %v486_v35 = vld [vmem:[#allocation7 + $0xc48] sm:$0xff] }
  0xeb   :  { %3856 = vmatprep.subr.bf16.mxu0 %v3855_v6  ;;  %v3873_v6 = vpack.c.bf16 %v401_v61, %v389_v60  ;;  %v3609_v13 = vpack.c.bf16 %v539_v4, %v527_v3  ;;  %v3885_v43 = vpack.c.bf16 %v473_v34, %v461_v33  ;;  %v509_v61 = vld [vmem:[#allocation7 + $0xd00] sm:$0xff]  ;;  %v647_v4 = vld [vmem:[#allocation7 + $0x1150] sm:$0xff] }
  0xec   :  { %3582 = vmatpush1.bf16.msra.mxu1 %v3581_v47  ;;  %v390_v47 = vld [vmem:[#allocation7 + $0x948] sm:$0xff]  ;;  %v581_v33 = vld [vmem:[#allocation7 + $0xf40] sm:$0xff] }
  0xed   :  { %3584 = vmatprep.subr.bf16.mxu1 %v3583_v48  ;;  %v402_v48 = vld [vmem:[#allocation7 + $0x9a8] sm:$0xff]  ;;  %v593_v34 = vld [vmem:[#allocation7 + $0xfa0] sm:$0xff] }
  0xee   :  { %3858 = vmatpush1.bf16.msra.mxu0 %v3857_v17  ;;  %v3871_v59 = vpack.c.bf16 %v402_v48, %v390_v47  ;;  %v576_v17 = vld [vmem:[#allocation7 + $0xf18] sm:$0xff]  ;;  %v497_v47 = vld [vmem:[#allocation7 + $0xca0] sm:$0xff]  ;;  %v510_v48 = vld [vmem:[#allocation7 + $0xd08] sm:$0xff] }
  0xef   :  { %3860 = vmatprep.subr.bf16.mxu0 %v3859_v19  ;;  %v588_v19 = vld [vmem:[#allocation7 + $0xf78] sm:$0xff]  ;;  %v3889_v58 = vpack.c.bf16 %v497_v47, %v485_v46  ;;  %v605_v46 = vld [vmem:[#allocation7 + $0x1000] sm:$0xff] }
  0xf0   :  { %3586 = vmatpush1.bf16.msra.mxu1 %v3585_v62  ;;  %v414_v62 = vld [vmem:[#allocation7 + $0xa08] sm:$0xff]  ;;  %v3615_v25 = vpack.c.bf16 %v588_v19, %v576_v17  ;;  %v111_v17 = vld [vmem:[#allocation7 + $0x90] sm:$0xff]  ;;  %v617_v47 = vld [vmem:[#allocation7 + $0x1060] sm:$0xff] }
  0xf1   :  { %3588 = vmatprep.subr.bf16.mxu1 %v3587_v63  ;;  %v426_v63 = vld [vmem:[#allocation7 + $0xa68] sm:$0xff] }
  0xf2   :  { %3862 = vmatpush1.bf16.msra.mxu0 %v3861_v29  ;;  %v3875_v8 = vpack.c.bf16 %v426_v63, %v414_v62  ;;  %v600_v29 = vld [vmem:[#allocation7 + $0xfd8] sm:$0xff]  ;;  %v521_v62 = vld [vmem:[#allocation7 + $0xd60] sm:$0xff]  ;;  %v534_v63 = vld [vmem:[#allocation7 + $0xdc8] sm:$0xff] }
  0xf3   :  { %3864 = vmatprep.subr.bf16.mxu0 %v3863_v31  ;;  %v612_v31 = vld [vmem:[#allocation7 + $0x1038] sm:$0xff] }
  0xf4   :  { %3590 = vmatpush1.bf16.msra.mxu1 %v3589_v11  ;;  %v438_v11 = vld [vmem:[#allocation7 + $0xac8] sm:$0xff]  ;;  %v3619_v38 = vpack.c.bf16 %v612_v31, %v600_v29  ;;  %v148_v29 = vld [vmem:[#allocation7 + $0x1b8] sm:$0xff] }
  0xf5   :  { %3592 = vmatprep.subr.bf16.mxu1 %v3591_v12  ;;  %v450_v12 = vld [vmem:[#allocation7 + $0xb28] sm:$0xff]  ;;  %v160_v31 = vld [vmem:[#allocation7 + $0x218] sm:$0xff] }
  0xf6   :  { %3866 = vmatpush1.bf16.msra.mxu0 %v3865_v42  ;;  %v3879_v20 = vpack.c.bf16 %v450_v12, %v438_v11  ;;  %v624_v42 = vld [vmem:[#allocation7 + $0x1098] sm:$0xff]  ;;  %v545_v11 = vld [vmem:[#allocation7 + $0xe20] sm:$0xff]  ;;  %v4969_v12 = vld [vmem:[#allocation4 + $0x20] sm:$0xff] }
  0xf7   :  { %3868 = vmatprep.subr.bf16.mxu0 %v3867_v44  ;;  %v636_v44 = vld [vmem:[#allocation7 + $0x10f8] sm:$0xff]  ;;  %v3897_v19 = vpack.c.bf16 %v545_v11, %v533_v10  ;;  %v653_v11 = vld [vmem:[#allocation7 + $0x1180] sm:$0xff] }
  0xf8   :  { %3594 = vmatpush1.bf16.msra.mxu1 %v3593_v23  ;;  %v474_v23 = vld [vmem:[#allocation7 + $0xbe8] sm:$0xff]  ;;  %v3623_v52 = vpack.c.bf16 %v636_v44, %v624_v42  ;;  %v172_v42 = vld [vmem:[#allocation7 + $0x278] sm:$0xff] }
  0xf9   :  { %3596 = vmatprep.subr.bf16.mxu1 %v3595_v24  ;;  %v3613_v24 = vpack.c.bf16 %v563_v16, %v551_v14  ;;  %v3883_v32 = vpack.c.bf16 %v474_v23, %v462_v22  ;;  %v99_v16 = vld [vmem:[#allocation7 + $0x30] sm:$0xff]  ;;  %v569_v22 = vld [vmem:[#allocation7 + $0xee0] sm:$0xff]  ;;  %v582_v23 = vld [vmem:[#allocation7 + $0xf48] sm:$0xff] }
  0xfa   :  { %3870 = vmatpush1.bf16.msra.mxu0 %v3869_v55  ;;  %v648_v55 = vld [vmem:[#allocation7 + $0x1158] sm:$0xff] }
  0xfb   :  { %3872 = vmatprep.subr.bf16.mxu0 %v3871_v59  ;;  %v660_v59 = vld [vmem:[#allocation7 + $0x11b8] sm:$0xff] }
  0xfc   :  { %3598 = vmatpush1.bf16.msra.mxu1 %v3597_v36  ;;  %v498_v36 = vld [vmem:[#allocation7 + $0xca8] sm:$0xff]  ;;  %v3627_v3 = vpack.c.bf16 %v660_v59, %v648_v55  ;;  %v184_v44 = vld [vmem:[#allocation7 + $0x2d8] sm:$0xff]  ;;  %v183_v55 = vld [vmem:[#allocation7 + $0x2d0] sm:$0xff]  ;;  %v3909_v59 = vpack.c.bf16 %v617_v47, %v605_v46 }
  0xfd   :  { %3600 = vmatprep.subr.bf16.mxu1 %v3599_v37  ;;  %v3617_v37 = vpack.c.bf16 %v587_v27, %v575_v26  ;;  %v3887_v45 = vpack.c.bf16 %v498_v36, %v486_v35  ;;  %v123_v26 = vld [vmem:[#allocation7 + $0xf0] sm:$0xff]  ;;  %v606_v35 = vld [vmem:[#allocation7 + $0x1008] sm:$0xff] }
  0xfe   :  { %3874 = vmatpush1.bf16.msra.mxu0 %v3873_v6  ;;  %v100_v6 = vld [vmem:[#allocation7 + $0x38] sm:$0xff]  ;;  %v135_v27 = vld [vmem:[#allocation7 + $0x150] sm:$0xff]  ;;  %v618_v36 = vld [vmem:[#allocation7 + $0x1068] sm:$0xff] }
  0xff   :  { %952 = vmatmul.mubr.f32.vlgmr.msra.gmra.mrb[4].mxu1 %v4938_v50  ;;  %3876 = vmatprep.subr.bf16.mxu0 %v3875_v8  ;;  %v112_v8 = vld [vmem:[#allocation7 + $0x98] sm:$0xff]  ;;  %v1693_v47 = vld [vmem:[#allocation10 + $0x60] sm:$0xff] }
 0x100   :  { %3602 = vmatpush1.bf16.msra.mxu1 %v3601_v49  ;;  %957 = vmatprep.mubr.f32.mxu1 %v4940_v56  ;;  %v3611_v56 = vpack.c.bf16 %v564_v7, %v552_v5  ;;  %v522_v49 = vld [vmem:[#allocation7 + $0xd68] sm:$0xff]  ;;  %v659_v5 = vld [vmem:[#allocation7 + $0x11b0] sm:$0xff]  ;;  %v3893_v7 = vpack.c.bf16 %v521_v62, %v509_v61  ;;  %v3727_v14 = vpack.c.bf16 %v112_v8, %v100_v6  ;;  %v629_v62 = vld [vmem:[#allocation7 + $0x10c0] sm:$0xff] }
 0x101   :  { %3604 = vmatprep.subr.bf16.mxu1 %v3603_v51  ;;  %v3621_v51 = vpack.c.bf16 %v611_v40, %v599_v39  ;;  %v3891_v60 = vpack.c.bf16 %v522_v49, %v510_v48  ;;  %v147_v39 = vld [vmem:[#allocation7 + $0x1b0] sm:$0xff]  ;;  %v630_v48 = vld [vmem:[#allocation7 + $0x10c8] sm:$0xff] }
 0x102   :  { %3878 = vmatpush1.bf16.msra.mxu0 %v3877_v18  ;;  %v124_v18 = vld [vmem:[#allocation7 + $0xf8] sm:$0xff]  ;;  %v159_v40 = vld [vmem:[#allocation7 + $0x210] sm:$0xff]  ;;  %v642_v49 = vld [vmem:[#allocation7 + $0x1128] sm:$0xff] }
 0x103   :  { %958 = vmatmul.mubr.f32.gmra.mrb[6].mxu1 %v4944_v2  ;;  %3880 = vmatprep.subr.bf16.mxu0 %v3879_v20  ;;  %v136_v20 = vld [vmem:[#allocation7 + $0x158] sm:$0xff]  ;;  %v3911_v61 = vpack.c.bf16 %v642_v49, %v630_v48  ;;  %v207_v6 = vld [vmem:[#allocation7 + $0x390] sm:$0xff]  ;;  %v1696_v48 = vld [vmem:[#allocation10 + $0x78] sm:$0xff] }
 0x104   :  { %3606 = vmatpush1.bf16.msra.mxu1 %v3605_v0  ;;  %1028 = vmatprep.mubr.f32.mxu1 %v4831_v15  ;;  %v546_v0 = vld [vmem:[#allocation7 + $0xe28] sm:$0xff] }
 0x105   :  { %3608 = vmatprep.subr.bf16.mxu1 %v3607_v1  ;;  %v3625_v1 = vpack.c.bf16 %v635_v54, %v623_v53  ;;  %v3895_v9 = vpack.c.bf16 %v546_v0, %v534_v63  ;;  %v3739_v53 = vpack.c.bf16 %v184_v44, %v172_v42  ;;  %v171_v54 = vld [vmem:[#allocation7 + $0x270] sm:$0xff]  ;;  %v641_v63 = vld [vmem:[#allocation7 + $0x1120] sm:$0xff]  ;;  %v654_v0 = vld [vmem:[#allocation7 + $0x1188] sm:$0xff] }
 0x106   :  { %3882 = vmatpush1.bf16.msra.mxu0 %v3881_v30  ;;  %v3901_v30 = vpack.c.bf16 %v569_v22, %v557_v57  ;;  %v3913_v8 = vpack.c.bf16 %v641_v63, %v629_v62  ;;  %v1681_v22 = vld [vmem:[#allocation10] sm:$0xff]  ;;  %v1700_v49 = vld [vmem:[#allocation10 + $0x98] sm:$0xff]  ;;  %v1699_v62 = vld [vmem:[#allocation10 + $0x90] sm:$0xff] }
 0x107   :  { %3884 = vmatprep.subr.bf16.mxu0 %v3883_v32  ;;  %v279_v42 = vld [vmem:[#allocation7 + $0x5d0] sm:$0xff] }
 0x108   :  { %3610 = vmatpush1.bf16.msra.mxu1 %v3609_v13  ;;  %v558_v13 = vld [vmem:[#allocation7 + $0xe88] sm:$0xff]  ;;  %v1702_v63 = vld [vmem:[#allocation10 + $0xa8] sm:$0xff] }
 0x109   :  { %3612 = vmatprep.subr.bf16.mxu1 %v3611_v56  ;;  %v570_v56 = vld [vmem:[#allocation7 + $0xee8] sm:$0xff] }
 0x10a   :  { %3886 = vmatpush1.bf16.msra.mxu0 %v3885_v43  ;;  %v3899_v21 = vpack.c.bf16 %v570_v56, %v558_v13  ;;  %v3905_v43 = vpack.c.bf16 %v593_v34, %v581_v33  ;;  %v665_v13 = vld [vmem:[#allocation7 + $0x11e0] sm:$0xff]  ;;  %v1682_v56 = vld [vmem:[#allocation10 + $0x8] sm:$0xff] }
 0x10b   :  { %3888 = vmatprep.subr.bf16.mxu0 %v3887_v45  ;;  %v3907_v45 = vpack.c.bf16 %v618_v36, %v606_v35  ;;  %v1687_v34 = vld [vmem:[#allocation10 + $0x30] sm:$0xff]  ;;  %v1690_v35 = vld [vmem:[#allocation10 + $0x48] sm:$0xff] }
 0x10c   :  { %3614 = vmatpush1.bf16.msra.mxu1 %v3613_v24  ;;  %v594_v24 = vld [vmem:[#allocation7 + $0xfa8] sm:$0xff]  ;;  %v1694_v36 = vld [vmem:[#allocation10 + $0x68] sm:$0xff]  ;;  %v4021_v44 = vpack.c.bf16 %v1690_v35, %v1687_v34 }
 0x10d   :  { %3616 = vmatprep.subr.bf16.mxu1 %v3615_v25  ;;  %1414 = vmatmul.mubr.f32.vlgmr.msra.gmra.mrb[4].mxu0 %v4938_v50  ;;  %v3629_v50 = vpack.c.bf16 %v659_v5, %v647_v4  ;;  %v3729_v25 = vpack.c.bf16 %v111_v17, %v99_v16  ;;  %v3903_v32 = vpack.c.bf16 %v594_v24, %v582_v23  ;;  %v195_v5 = vld [vmem:[#allocation7 + $0x330] sm:$0xff]  ;;  %v1684_v23 = vld [vmem:[#allocation10 + $0x18] sm:$0xff] }
 0x10e   :  { %3890 = vmatpush1.bf16.msra.mxu0 %v3889_v58  ;;  %1419 = vmatprep.mubr.f32.mxu0 %v4969_v12  ;;  %v196_v58 = vld [vmem:[#allocation7 + $0x338] sm:$0xff]  ;;  %v219_v17 = vld [vmem:[#allocation7 + $0x3f0] sm:$0xff]  ;;  %v1688_v24 = vld [vmem:[#allocation10 + $0x38] sm:$0xff] }
 0x10f   :  { %3892 = vmatprep.subr.bf16.mxu0 %v3891_v60  ;;  %v208_v60 = vld [vmem:[#allocation7 + $0x398] sm:$0xff]  ;;  %v1720_v34 = vld [vmem:[#allocation10 + $0x138] sm:$0xff] }
 0x110   :  { %3618 = vmatpush1.bf16.msra.mxu1 %v3617_v37  ;;  %v3733_v37 = vpack.c.bf16 %v135_v27, %v123_v26  ;;  %v3743_v4 = vpack.c.bf16 %v208_v60, %v196_v58  ;;  %v243_v27 = vld [vmem:[#allocation7 + $0x4b0] sm:$0xff]  ;;  %v316_v58 = vld [vmem:[#allocation7 + $0x6f8] sm:$0xff]  ;;  %v1724_v35 = vld [vmem:[#allocation10 + $0x158] sm:$0xff] }
 0x111   :  { %3620 = vmatprep.subr.bf16.mxu1 %v3619_v38  ;;  %1420 = vmatmul.mubr.f32.gmra.mrb[6].mxu0 %v4944_v2  ;;  %v3731_v2 = vpack.c.bf16 %v136_v20, %v124_v18  ;;  %v3735_v38 = vpack.c.bf16 %v160_v31, %v148_v29  ;;  %v231_v18 = vld [vmem:[#allocation7 + $0x450] sm:$0xff]  ;;  %v3917_v20 = vpack.c.bf16 %v665_v13, %v653_v11  ;;  %v328_v60 = vld [vmem:[#allocation7 + $0x758] sm:$0xff]  ;;  %v1708_v11 = vld [vmem:[#allocation10 + $0xd8] sm:$0xff] }
 0x112   :  { %3894 = vmatpush1.bf16.msra.mxu0 %v3893_v7  ;;  %1490 = vmatprep.mubr.f32.mxu0 %v4831_v15  ;;  %v220_v7 = vld [vmem:[#allocation7 + $0x3f8] sm:$0xff]  ;;  %v255_v29 = vld [vmem:[#allocation7 + $0x510] sm:$0xff]  ;;  %v4017_v31 = vpack.c.bf16 %v1684_v23, %v1681_v22  ;;  %v1712_v13 = vld [vmem:[#allocation10 + $0xf8] sm:$0xff] }
 0x113   :  { %3896 = vmatprep.subr.bf16.mxu0 %v3895_v9  ;;  %v232_v9 = vld [vmem:[#allocation7 + $0x458] sm:$0xff] }
 0x114   :  { %3622 = vmatpush1.bf16.msra.mxu1 %v3621_v51  ;;  %v3737_v51 = vpack.c.bf16 %v159_v40, %v147_v39  ;;  %v3747_v16 = vpack.c.bf16 %v232_v9, %v220_v7  ;;  %v267_v40 = vld [vmem:[#allocation7 + $0x570] sm:$0xff]  ;;  %v4029_v7 = vpack.c.bf16 %v1702_v63, %v1699_v62  ;;  %v1732_v62 = vld [vmem:[#allocation10 + $0x198] sm:$0xff] }
 0x115   :  { %3624 = vmatprep.subr.bf16.mxu1 %v3623_v52  ;;  %v4977_v52 = vld [vmem:[#allocation4 + $0x8] sm:$0xff]  ;;  %v1736_v63 = vld [vmem:[#allocation10 + $0x1b8] sm:$0xff] }
 0x116   :  { %3898 = vmatpush1.bf16.msra.mxu0 %v3897_v19  ;;  %v244_v19 = vld [vmem:[#allocation7 + $0x4b8] sm:$0xff] }
 0x117   :  { %3900 = vmatprep.subr.bf16.mxu0 %v3899_v21  ;;  %v256_v21 = vld [vmem:[#allocation7 + $0x518] sm:$0xff] }
 0x118   :  { %3626 = vmatpush1.bf16.msra.mxu1 %v3625_v1  ;;  %v666_v1 = vld [vmem:[#allocation7 + $0x11e8] sm:$0xff]  ;;  %v3751_v26 = vpack.c.bf16 %v256_v21, %v244_v19  ;;  %v1714_v22 = vld [vmem:[#allocation10 + $0x108] sm:$0xff] }
 0x119   :  { %3628 = vmatprep.subr.bf16.mxu1 %v3627_v3  ;;  %v3741_v3 = vpack.c.bf16 %v183_v55, %v171_v54  ;;  %v3915_v10 = vpack.c.bf16 %v666_v1, %v654_v0  ;;  %v291_v54 = vld [vmem:[#allocation7 + $0x630] sm:$0xff] }
 0x11a   :  { %3902 = vmatpush1.bf16.msra.mxu0 %v3901_v30  ;;  %v268_v30 = vld [vmem:[#allocation7 + $0x578] sm:$0xff]  ;;  %v303_v55 = vld [vmem:[#allocation7 + $0x690] sm:$0xff] }
 0x11b   :  { %3904 = vmatprep.subr.bf16.mxu0 %v3903_v32  ;;  %v280_v32 = vld [vmem:[#allocation7 + $0x5d8] sm:$0xff]  ;;  %v1709_v1 = vld [vmem:[#allocation10 + $0xe0] sm:$0xff] }
 0x11c   :  { %3630 = vmatpush1.bf16.msra.mxu1 %v3629_v50  ;;  %v1685_v50 = vld [vmem:[#allocation10 + $0x20] sm:$0xff]  ;;  %v3755_v39 = vpack.c.bf16 %v280_v32, %v268_v30  ;;  %v1706_v0 = vld [vmem:[#allocation10 + $0xc8] sm:$0xff] }
 0x11d   :  { %3728 = vmatprep.subr.bf16.mxu1 %v3727_v14  ;;  %v3745_v14 = vpack.c.bf16 %v207_v6, %v195_v5  ;;  %v4015_v57 = vpack.c.bf16 %v1685_v50, %v1682_v56  ;;  %v315_v5 = vld [vmem:[#allocation7 + $0x6f0] sm:$0xff]  ;;  %v340_v6 = vld [vmem:[#allocation7 + $0x7b8] sm:$0xff]  ;;  %v4031_v9 = vpack.c.bf16 %v1709_v1, %v1706_v0 }
 0x11e   :  { %3906 = vmatpush1.bf16.msra.mxu0 %v3905_v43  ;;  %v292_v43 = vld [vmem:[#allocation7 + $0x638] sm:$0xff] }
 0x11f   :  { %1029 = vmatmul.mubr.f32.vlgmr.msra.gmra.mrb[4].mxu1 %v4952_v28  ;;  %3908 = vmatprep.subr.bf16.mxu0 %v3907_v45  ;;  %v304_v45 = vld [vmem:[#allocation7 + $0x698] sm:$0xff] }
 0x120   :  { %3730 = vmatpush1.bf16.msra.mxu1 %v3729_v25  ;;  %1034 = vmatprep.mubr.f32.mxu1 %v4831_v15  ;;  %v1691_v25 = vld [vmem:[#allocation10 + $0x50] sm:$0xff]  ;;  %v1718_v23 = vld [vmem:[#allocation10 + $0x128] sm:$0xff] }
 0x121   :  { %3732 = vmatprep.subr.bf16.mxu1 %v3731_v2  ;;  %v3749_v2 = vpack.c.bf16 %v231_v18, %v219_v17  ;;  %v4019_v33 = vpack.c.bf16 %v1691_v25, %v1688_v24  ;;  %v1715_v56 = vld [vmem:[#allocation10 + $0x110] sm:$0xff]  ;;  %v351_v17 = vld [vmem:[#allocation7 + $0x810] sm:$0xff] }
 0x122   :  { %3910 = vmatpush1.bf16.msra.mxu0 %v3909_v59  ;;  %v4025_v59 = vpack.c.bf16 %v1696_v48, %v1693_v47  ;;  %v364_v18 = vld [vmem:[#allocation7 + $0x878] sm:$0xff]  ;;  %v4035_v21 = vpack.c.bf16 %v1715_v56, %v1712_v13  ;;  %v1721_v24 = vld [vmem:[#allocation10 + $0x140] sm:$0xff] }
 0x123   :  { %1035 = vmatmul.mubr.f32.gmra.mrb[6].mxu1 %v4956_v41  ;;  %3912 = vmatprep.subr.bf16.mxu0 %v3911_v61  ;;  %v4039_v32 = vpack.c.bf16 %v1721_v24, %v1718_v23  ;;  %v1726_v47 = vld [vmem:[#allocation10 + $0x168] sm:$0xff]  ;;  %v1739_v0 = vld [vmem:[#allocation10 + $0x1d0] sm:$0xff]  ;;  %v1745_v13 = vld [vmem:[#allocation10 + $0x200] sm:$0xff] }
 0x124   :  { %3734 = vmatpush1.bf16.msra.mxu1 %v3733_v37  ;;  %1259 = vmatprep.mubr.f32.mxu1 %v4977_v52  ;;  %v1697_v37 = vld [vmem:[#allocation10 + $0x80] sm:$0xff]  ;;  %v1730_v48 = vld [vmem:[#allocation10 + $0x188] sm:$0xff]  ;;  %v1751_v23 = vld [vmem:[#allocation10 + $0x230] sm:$0xff] }
 0x125   :  { %3736 = vmatprep.subr.bf16.mxu1 %v3735_v38  ;;  %v3753_v38 = vpack.c.bf16 %v255_v29, %v243_v27  ;;  %v4023_v46 = vpack.c.bf16 %v1697_v37, %v1694_v36  ;;  %v375_v27 = vld [vmem:[#allocation7 + $0x8d0] sm:$0xff]  ;;  %v388_v29 = vld [vmem:[#allocation7 + $0x938] sm:$0xff] }
 0x126   :  { %3914 = vmatpush1.bf16.msra.mxu0 %v3913_v8  ;;  %v352_v8 = vld [vmem:[#allocation7 + $0x818] sm:$0xff] }
 0x127   :  { %3916 = vmatprep.subr.bf16.mxu0 %v3915_v10  ;;  %v1705_v10 = vld [vmem:[#allocation10 + $0xc0] sm:$0xff]  ;;  %v1727_v36 = vld [vmem:[#allocation10 + $0x170] sm:$0xff] }
 0x128   :  { %3738 = vmatpush1.bf16.msra.mxu1 %v3737_v51  ;;  %v1703_v51 = vld [vmem:[#allocation10 + $0xb0] sm:$0xff]  ;;  %v4033_v19 = vpack.c.bf16 %v1708_v11, %v1705_v10  ;;  %v1738_v10 = vld [vmem:[#allocation10 + $0x1c8] sm:$0xff] }
 0x129   :  { %3740 = vmatprep.subr.bf16.mxu1 %v3739_v53  ;;  %v3757_v53 = vpack.c.bf16 %v279_v42, %v267_v40  ;;  %v4027_v61 = vpack.c.bf16 %v1703_v51, %v1700_v49  ;;  %v399_v40 = vld [vmem:[#allocation7 + $0x990] sm:$0xff]  ;;  %v412_v42 = vld [vmem:[#allocation7 + $0x9f8] sm:$0xff] }
 0x12a   :  { %3918 = vmatpush1.bf16.msra.mxu0 %v3917_v20  ;;  %v376_v20 = vld [vmem:[#allocation7 + $0x8d8] sm:$0xff]  ;;  %v1733_v49 = vld [vmem:[#allocation10 + $0x1a0] sm:$0xff] }
 0x12b   :  { %4016 = vmatprep.subr.bf16.mxu0 %v4015_v57  ;;  %v1711_v57 = vld [vmem:[#allocation10 + $0xf0] sm:$0xff]  ;;  %v1742_v11 = vld [vmem:[#allocation10 + $0x1e8] sm:$0xff] }
 0x12c   :  { %3742 = vmatpush1.bf16.msra.mxu1 %v3741_v3  ;;  %v3761_v3 = vpack.c.bf16 %v303_v55, %v291_v54  ;;  %v4037_v30 = vpack.c.bf16 %v1714_v22, %v1711_v57  ;;  %v423_v54 = vld [vmem:[#allocation7 + $0xa50] sm:$0xff]  ;;  %v436_v55 = vld [vmem:[#allocation7 + $0xab8] sm:$0xff]  ;;  %v1744_v57 = vld [vmem:[#allocation10 + $0x1f8] sm:$0xff] }
 0x12d   :  { %3744 = vmatprep.subr.bf16.mxu1 %v3743_v4  ;;  %1491 = vmatmul.mubr.f32.vlgmr.msra.gmra.mrb[4].mxu0 %v4952_v28  ;;  %v3759_v28 = vpack.c.bf16 %v304_v45, %v292_v43  ;;  %v3763_v4 = vpack.c.bf16 %v328_v60, %v316_v58  ;;  %v4043_v45 = vpack.c.bf16 %v1727_v36, %v1724_v35  ;;  %v1748_v22 = vld [vmem:[#allocation10 + $0x218] sm:$0xff]  ;;  %v1757_v35 = vld [vmem:[#allocation10 + $0x260] sm:$0xff] }
 0x12e   :  { %4018 = vmatpush1.bf16.msra.mxu0 %v4017_v31  ;;  %1496 = vmatprep.mubr.f32.mxu0 %v4831_v15  ;;  %v400_v31 = vld [vmem:[#allocation7 + $0x998] sm:$0xff]  ;;  %v4047_v60 = vpack.c.bf16 %v1733_v49, %v1730_v48  ;;  %v1760_v48 = vld [vmem:[#allocation10 + $0x278] sm:$0xff] }
 0x12f   :  { %4020 = vmatprep.subr.bf16.mxu0 %v4019_v33  ;;  %v1717_v33 = vld [vmem:[#allocation10 + $0x120] sm:$0xff]  ;;  %v1763_v49 = vld [vmem:[#allocation10 + $0x290] sm:$0xff] }
 0x130   :  { %3746 = vmatpush1.bf16.msra.mxu1 %v3745_v14  ;;  %v3767_v14 = vpack.c.bf16 %v352_v8, %v340_v6  ;;  %v4041_v43 = vpack.c.bf16 %v1720_v34, %v1717_v33  ;;  %v4051_v8 = vpack.c.bf16 %v1739_v0, %v1736_v63  ;;  %v1750_v33 = vld [vmem:[#allocation10 + $0x228] sm:$0xff]  ;;  %v4987_v63 = vld [vmem:[#allocation4 + $0x18] sm:$0xff] }
 0x131   :  { %3748 = vmatprep.subr.bf16.mxu1 %v3747_v16  ;;  %1497 = vmatmul.mubr.f32.gmra.mrb[6].mxu0 %v4956_v41  ;;  %v327_v41 = vld [vmem:[#allocation7 + $0x750] sm:$0xff] }
 0x132   :  { %4022 = vmatpush1.bf16.msra.mxu0 %v4021_v44  ;;  %v3765_v50 = vpack.c.bf16 %v327_v41, %v315_v5  ;;  %v339_v16 = vld [vmem:[#allocation7 + $0x7b0] sm:$0xff]  ;;  %v424_v44 = vld [vmem:[#allocation7 + $0xa58] sm:$0xff] }
 0x133   :  { %4024 = vmatprep.subr.bf16.mxu0 %v4023_v46  ;;  %v3769_v25 = vpack.c.bf16 %v351_v17, %v339_v16  ;;  %v1723_v46 = vld [vmem:[#allocation10 + $0x150] sm:$0xff]  ;;  %v447_v5 = vld [vmem:[#allocation7 + $0xb10] sm:$0xff] }
 0x134   :  { %3750 = vmatpush1.bf16.msra.mxu1 %v3749_v2  ;;  %v3771_v2 = vpack.c.bf16 %v376_v20, %v364_v18  ;;  %v4045_v58 = vpack.c.bf16 %v1726_v47, %v1723_v46  ;;  %v460_v41 = vld [vmem:[#allocation7 + $0xb78] sm:$0xff]  ;;  %v471_v16 = vld [vmem:[#allocation7 + $0xbd0] sm:$0xff]  ;;  %v4055_v20 = vpack.c.bf16 %v1745_v13, %v1742_v11  ;;  %v1756_v46 = vld [vmem:[#allocation10 + $0x258] sm:$0xff] }
 0x135   :  { %3752 = vmatprep.subr.bf16.mxu1 %v3751_v26  ;;  %v363_v26 = vld [vmem:[#allocation7 + $0x870] sm:$0xff]  ;;  %v484_v17 = vld [vmem:[#allocation7 + $0xc38] sm:$0xff]  ;;  %v1772_v11 = vld [vmem:[#allocation10 + $0x2d8] sm:$0xff] }
 0x136   :  { %4026 = vmatpush1.bf16.msra.mxu0 %v4025_v59  ;;  %v3773_v37 = vpack.c.bf16 %v375_v27, %v363_v26  ;;  %v448_v59 = vld [vmem:[#allocation7 + $0xb18] sm:$0xff]  ;;  %v495_v26 = vld [vmem:[#allocation7 + $0xc90] sm:$0xff] }
 0x137   :  { %4028 = vmatprep.subr.bf16.mxu0 %v4027_v61  ;;  %v1729_v61 = vld [vmem:[#allocation10 + $0x180] sm:$0xff]  ;;  %v508_v27 = vld [vmem:[#allocation7 + $0xcf8] sm:$0xff] }
 0x138   :  { %3754 = vmatpush1.bf16.msra.mxu1 %v3753_v38  ;;  %v3775_v38 = vpack.c.bf16 %v400_v31, %v388_v29  ;;  %v4049_v6 = vpack.c.bf16 %v1732_v62, %v1729_v61  ;;  %v4059_v31 = vpack.c.bf16 %v1751_v23, %v1748_v22  ;;  %v1754_v34 = vld [vmem:[#allocation10 + $0x248] sm:$0xff]  ;;  %v1759_v61 = vld [vmem:[#allocation10 + $0x270] sm:$0xff]  ;;  %v1781_v23 = vld [vmem:[#allocation10 + $0x320] sm:$0xff] }
 0x139   :  { %3756 = vmatprep.subr.bf16.mxu1 %v3755_v39  ;;  %v387_v39 = vld [vmem:[#allocation7 + $0x930] sm:$0xff]  ;;  %v1775_v13 = vld [vmem:[#allocation10 + $0x2f0] sm:$0xff] }
 0x13a   :  { %4030 = vmatpush1.bf16.msra.mxu0 %v4029_v7  ;;  %v3777_v51 = vpack.c.bf16 %v399_v40, %v387_v39  ;;  %v472_v7 = vld [vmem:[#allocation7 + $0xbd8] sm:$0xff]  ;;  %v519_v39 = vld [vmem:[#allocation7 + $0xd50] sm:$0xff] }
 0x13b   :  { %4032 = vmatprep.subr.bf16.mxu0 %v4031_v9  ;;  %v1735_v9 = vld [vmem:[#allocation10 + $0x1b0] sm:$0xff]  ;;  %v4983_v47 = vld [vmem:[#allocation4] sm:$0xff] }
 0x13c   :  { %3758 = vmatpush1.bf16.msra.mxu1 %v3757_v53  ;;  %v3779_v53 = vpack.c.bf16 %v424_v44, %v412_v42  ;;  %v4053_v18 = vpack.c.bf16 %v1738_v10, %v1735_v9  ;;  %v532_v40 = vld [vmem:[#allocation7 + $0xdb8] sm:$0xff]  ;;  %v4063_v44 = vpack.c.bf16 %v1757_v35, %v1754_v34  ;;  %v1765_v9 = vld [vmem:[#allocation10 + $0x2a0] sm:$0xff]  ;;  %v1768_v10 = vld [vmem:[#allocation10 + $0x2b8] sm:$0xff] }
 0x13d   :  { %3760 = vmatprep.subr.bf16.mxu1 %v3759_v28  ;;  %v411_v28 = vld [vmem:[#allocation7 + $0x9f0] sm:$0xff] }
 0x13e   :  { %4034 = vmatpush1.bf16.msra.mxu0 %v4033_v19  ;;  %v3781_v1 = vpack.c.bf16 %v423_v54, %v411_v28  ;;  %v496_v19 = vld [vmem:[#allocation7 + $0xc98] sm:$0xff]  ;;  %v531_v28 = vld [vmem:[#allocation7 + $0xdb0] sm:$0xff] }
 0x13f   :  { %4036 = vmatprep.subr.bf16.mxu0 %v4035_v21  ;;  %v1741_v21 = vld [vmem:[#allocation10 + $0x1e0] sm:$0xff]  ;;  %v1762_v62 = vld [vmem:[#allocation10 + $0x288] sm:$0xff] }
 0x140   :  { %3762 = vmatpush1.bf16.msra.mxu1 %v3761_v3  ;;  %v3783_v3 = vpack.c.bf16 %v448_v59, %v436_v55  ;;  %v4057_v29 = vpack.c.bf16 %v1744_v57, %v1741_v21  ;;  %v543_v54 = vld [vmem:[#allocation7 + $0xe10] sm:$0xff]  ;;  %v556_v55 = vld [vmem:[#allocation7 + $0xe78] sm:$0xff] }
 0x141   :  { %3764 = vmatprep.subr.bf16.mxu1 %v3763_v4  ;;  %v435_v4 = vld [vmem:[#allocation7 + $0xab0] sm:$0xff]  ;;  %v568_v59 = vld [vmem:[#allocation7 + $0xed8] sm:$0xff] }
 0x142   :  { %4038 = vmatpush1.bf16.msra.mxu0 %v4037_v30  ;;  %v3785_v56 = vpack.c.bf16 %v447_v5, %v435_v4  ;;  %v520_v30 = vld [vmem:[#allocation7 + $0xd58] sm:$0xff]  ;;  %v555_v4 = vld [vmem:[#allocation7 + $0xe70] sm:$0xff] }
 0x143   :  { %4040 = vmatprep.subr.bf16.mxu0 %v4039_v32  ;;  %v1747_v32 = vld [vmem:[#allocation10 + $0x210] sm:$0xff]  ;;  %v1766_v0 = vld [vmem:[#allocation10 + $0x2a8] sm:$0xff] }
 0x144   :  { %3766 = vmatpush1.bf16.msra.mxu1 %v3765_v50  ;;  %v3787_v50 = vpack.c.bf16 %v472_v7, %v460_v41  ;;  %v4061_v42 = vpack.c.bf16 %v1750_v33, %v1747_v32  ;;  %v567_v5 = vld [vmem:[#allocation7 + $0xed0] sm:$0xff]  ;;  %v580_v41 = vld [vmem:[#allocation7 + $0xf38] sm:$0xff] }
 0x145   :  { %3768 = vmatprep.subr.bf16.mxu1 %v3767_v14  ;;  %v459_v14 = vld [vmem:[#allocation7 + $0xb70] sm:$0xff]  ;;  %v592_v7 = vld [vmem:[#allocation7 + $0xf98] sm:$0xff] }
 0x146   :  { %4042 = vmatpush1.bf16.msra.mxu0 %v4041_v43  ;;  %v3789_v24 = vpack.c.bf16 %v471_v16, %v459_v14  ;;  %v544_v43 = vld [vmem:[#allocation7 + $0xe18] sm:$0xff]  ;;  %v579_v14 = vld [vmem:[#allocation7 + $0xf30] sm:$0xff] }
 0x147   :  { %4044 = vmatprep.subr.bf16.mxu0 %v4043_v45  ;;  %v1753_v45 = vld [vmem:[#allocation10 + $0x240] sm:$0xff]  ;;  %v1771_v21 = vld [vmem:[#allocation10 + $0x2d0] sm:$0xff]  ;;  %v1774_v57 = vld [vmem:[#allocation10 + $0x2e8] sm:$0xff] }
 0x148   :  { %3770 = vmatpush1.bf16.msra.mxu1 %v3769_v25  ;;  %v3791_v25 = vpack.c.bf16 %v496_v19, %v484_v17  ;;  %v591_v16 = vld [vmem:[#allocation7 + $0xf90] sm:$0xff]  ;;  %v604_v17 = vld [vmem:[#allocation7 + $0xff8] sm:$0xff] }
 0x149   :  { %3772 = vmatprep.subr.bf16.mxu1 %v3771_v2  ;;  %v483_v2 = vld [vmem:[#allocation7 + $0xc30] sm:$0xff]  ;;  %v616_v19 = vld [vmem:[#allocation7 + $0x1058] sm:$0xff] }
 0x14a   :  { %4046 = vmatpush1.bf16.msra.mxu0 %v4045_v58  ;;  %v3793_v36 = vpack.c.bf16 %v495_v26, %v483_v2  ;;  %v4065_v58 = vpack.c.bf16 %v1756_v46, %v1753_v45  ;;  %v1778_v22 = vld [vmem:[#allocation10 + $0x308] sm:$0xff] }
 0x14b   :  { %4048 = vmatprep.subr.bf16.mxu0 %v4047_v60  ;;  %v4067_v60 = vpack.c.bf16 %v1763_v49, %v1760_v48  ;;  %v603_v2 = vld [vmem:[#allocation7 + $0xff0] sm:$0xff] }
 0x14c   :  { %3774 = vmatpush1.bf16.msra.mxu1 %v3773_v37  ;;  %v3795_v37 = vpack.c.bf16 %v520_v30, %v508_v27  ;;  %v615_v26 = vld [vmem:[#allocation7 + $0x1050] sm:$0xff]  ;;  %v4077_v27 = vpack.c.bf16 %v1774_v57, %v1771_v21  ;;  %v640_v30 = vld [vmem:[#allocation7 + $0x1118] sm:$0xff] }
 0x14d   :  { %3776 = vmatprep.subr.bf16.mxu1 %v3775_v38  ;;  %v507_v38 = vld [vmem:[#allocation7 + $0xcf0] sm:$0xff]  ;;  %v3813_v32 = vpack.c.bf16 %v615_v26, %v603_v2 }
 0x14e   :  { %4050 = vmatpush1.bf16.msra.mxu0 %v4049_v6  ;;  %v4069_v6 = vpack.c.bf16 %v1762_v62, %v1759_v61  ;;  %v627_v34 = vld [vmem:[#allocation7 + $0x10b0] sm:$0xff]  ;;  %v4991_v61 = vld [vmem:[#allocation4 + $0x10] sm:$0xff] }
 0x14f   :  { %4052 = vmatprep.subr.bf16.mxu0 %v4051_v8  ;;  %v639_v35 = vld [vmem:[#allocation7 + $0x1110] sm:$0xff] }
 0x150   :  { %3778 = vmatpush1.bf16.msra.mxu1 %v3777_v51  ;;  %v3797_v51 = vpack.c.bf16 %v519_v39, %v507_v38  ;;  %v3817_v38 = vpack.c.bf16 %v639_v35, %v627_v34  ;;  %v103_v48 = vld [vmem:[#allocation7 + $0x50] sm:$0xff]  ;;  %v284_v34 = vld [vmem:[#allocation7 + $0x5f8] sm:$0xff] }
 0x151   :  { %3780 = vmatprep.subr.bf16.mxu1 %v3779_v53  ;;  %v3799_v53 = vpack.c.bf16 %v544_v43, %v532_v40  ;;  %v651_v40 = vld [vmem:[#allocation7 + $0x1170] sm:$0xff]  ;;  %v104_v43 = vld [vmem:[#allocation7 + $0x58] sm:$0xff] }
 0x152   :  { %4054 = vmatpush1.bf16.msra.mxu0 %v4053_v18  ;;  %v4073_v18 = vpack.c.bf16 %v1768_v10, %v1765_v9  ;;  %v115_v49 = vld [vmem:[#allocation7 + $0xb0] sm:$0xff]  ;;  %v200_v10 = vld [vmem:[#allocation7 + $0x358] sm:$0xff] }
 0x153   :  { %4056 = vmatprep.subr.bf16.mxu0 %v4055_v20  ;;  %v4075_v20 = vpack.c.bf16 %v1775_v13, %v1772_v11  ;;  %v187_v9 = vld [vmem:[#allocation7 + $0x2f0] sm:$0xff]  ;;  %v212_v11 = vld [vmem:[#allocation7 + $0x3b8] sm:$0xff] }
 0x154   :  { %3782 = vmatpush1.bf16.msra.mxu1 %v3781_v1  ;;  %v1769_v1 = vld [vmem:[#allocation10 + $0x2c0] sm:$0xff] }
 0x155   :  { %3784 = vmatprep.subr.bf16.mxu1 %v3783_v3  ;;  %v3803_v3 = vpack.c.bf16 %v568_v59, %v556_v55  ;;  %v4071_v8 = vpack.c.bf16 %v1769_v1, %v1766_v0  ;;  %v127_v55 = vld [vmem:[#allocation7 + $0x110] sm:$0xff]  ;;  %v152_v59 = vld [vmem:[#allocation7 + $0x1d8] sm:$0xff] }
 0x156   :  { %4058 = vmatpush1.bf16.msra.mxu0 %v4057_v29  ;;  %v628_v29 = vld [vmem:[#allocation7 + $0x10b8] sm:$0xff]  ;;  %v151_v1 = vld [vmem:[#allocation7 + $0x1d0] sm:$0xff] }
 0x157   :  { %4060 = vmatprep.subr.bf16.mxu0 %v4059_v31  ;;  %v4079_v31 = vpack.c.bf16 %v1781_v23, %v1778_v22  ;;  %v3815_v33 = vpack.c.bf16 %v640_v30, %v628_v29  ;;  %v223_v22 = vld [vmem:[#allocation7 + $0x410] sm:$0xff] }
 0x158   :  { %3786 = vmatpush1.bf16.msra.mxu1 %v3785_v56  ;;  %v3805_v56 = vpack.c.bf16 %v567_v5, %v555_v4  ;;  %v188_v4 = vld [vmem:[#allocation7 + $0x2f8] sm:$0xff]  ;;  %v235_v23 = vld [vmem:[#allocation7 + $0x470] sm:$0xff] }
 0x159   :  { %3788 = vmatprep.subr.bf16.mxu1 %v3787_v50  ;;  %v3807_v50 = vpack.c.bf16 %v592_v7, %v580_v41  ;;  %v4995_v5 = vld [vmem:[#allocation4 + $0x28] sm:$0xff]  ;;  %v673_v41 = vlaneseq  ;;  %v247_v30 = vld [vmem:[#allocation7 + $0x4d0] sm:$0xff] }
 0x15a   :  { %4062 = vmatpush1.bf16.msra.mxu0 %v4061_v42  ;;  %v663_v42 = vld [vmem:[#allocation7 + $0x11d0] sm:$0xff] }
 0x15b   :  { %4064 = vmatprep.subr.bf16.mxu0 %v4063_v44  ;;  %v116_v44 = vld [vmem:[#allocation7 + $0xb8] sm:$0xff]  ;;  %v3821_v45 = vpack.c.bf16 %v663_v42, %v651_v40  ;;  %v4999_v13 = vshrl.u32 %v673_v41, 7  ;;  %v1784_v42 = vld [vmem:[#allocation10 + $0x338] sm:$0xff]  ;;  %v295_v41 = vld [vmem:[#allocation7 + $0x650] sm:$0xff] }
 0x15c   :  { %3790 = vmatpush1.bf16.msra.mxu1 %v3789_v24  ;;  %v3809_v24 = vpack.c.bf16 %v591_v16, %v579_v14  ;;  %v3919_v46 = vpack.c.bf16 %v116_v44, %v104_v43  ;;  %v199_v14 = vld [vmem:[#allocation7 + $0x350] sm:$0xff]  ;;  %v1787_v43 = vld [vmem:[#allocation10 + $0x350] sm:$0xff] }
 0x15d   :  { %3792 = vmatprep.subr.bf16.mxu1 %v3791_v25  ;;  %v3811_v25 = vpack.c.bf16 %v616_v19, %v604_v17  ;;  %v211_v16 = vld [vmem:[#allocation7 + $0x3b0] sm:$0xff]  ;;  %v224_v17 = vld [vmem:[#allocation7 + $0x418] sm:$0xff]  ;;  %v5002_v19 = vsub.s32 0, %v4999_v13  ;;  %v5007_v21 = vsub.s32 1, %v4999_v13 }
 0x15e   :  { %4066 = vmatpush1.bf16.msra.mxu0 %v4065_v58  ;;  %v139_v58 = vld [vmem:[#allocation7 + $0x170] sm:$0xff] }
 0x15f   :  { %1260 = vmatmul.mubr.f32.vlgmr.msra.gmra.mrb[8].mxu1 %v4983_v47  ;;  %4068 = vmatprep.subr.bf16.mxu0 %v4067_v60  ;;  %v164_v60 = vld [vmem:[#allocation7 + $0x238] sm:$0xff]  ;;  %v3925_v62 = vpack.c.bf16 %v139_v58, %v127_v55 }
 0x160   :  { %3794 = vmatpush1.bf16.msra.mxu1 %v3793_v36  ;;  %1265 = vmatprep.mubr.f32.mxu1 %v4969_v12  ;;  %v3801_v12 = vpack.c.bf16 %v543_v54, %v531_v28  ;;  %v652_v36 = vld [vmem:[#allocation7 + $0x1178] sm:$0xff]  ;;  %v3921_v28 = vpack.c.bf16 %v115_v49, %v103_v48  ;;  %v3927_v0 = vpack.c.bf16 %v164_v60, %v152_v59 }
 0x161   :  { %3796 = vmatprep.subr.bf16.mxu1 %v3795_v37  ;;  %v664_v37 = vld [vmem:[#allocation7 + $0x11d8] sm:$0xff]  ;;  %v4083_v59 = vpack.c.bf16 %v1787_v43, %v1784_v42  ;;  %v1801_v42 = vld [vmem:[#allocation10 + $0x3c0] sm:$0xff]  ;;  %v1804_v43 = vld [vmem:[#allocation10 + $0x3d8] sm:$0xff] }
 0x162   :  { %4070 = vmatpush1.bf16.msra.mxu0 %v4069_v6  ;;  %v3819_v39 = vpack.c.bf16 %v664_v37, %v652_v36  ;;  %v1777_v37 = vld [vmem:[#allocation10 + $0x300] sm:$0xff]  ;;  %v1783_v60 = vld [vmem:[#allocation10 + $0x330] sm:$0xff] }
 0x163   :  { %1266 = vmatmul.mubr.f32.gmra.mrb[10].mxu1 %v4987_v63  ;;  %4072 = vmatprep.subr.bf16.mxu0 %v4071_v8  ;;  %v175_v8 = vld [vmem:[#allocation7 + $0x290] sm:$0xff] }
 0x164   :  { %3798 = vmatpush1.bf16.msra.mxu1 %v3797_v51  ;;  %1336 = vmatprep.mubr.f32.mxu1 %v4831_v15  ;;  %v128_v51 = vld [vmem:[#allocation7 + $0x118] sm:$0xff] }
 0x165   :  { %3800 = vmatprep.subr.bf16.mxu1 %v3799_v53  ;;  %v140_v53 = vld [vmem:[#allocation7 + $0x178] sm:$0xff] }
 0x166   :  { %4074 = vmatpush1.bf16.msra.mxu0 %v4073_v18  ;;  %v3923_v54 = vpack.c.bf16 %v140_v53, %v128_v51  ;;  %v236_v18 = vld [vmem:[#allocation7 + $0x478] sm:$0xff] }
 0x167   :  { %4076 = vmatprep.subr.bf16.mxu0 %v4075_v20  ;;  %v5004_v20 = vld [vmem:[#allocation9] sm:$0xff]  ;;  %v3939_v57 = vpack.c.bf16 %v236_v18, %v224_v17  ;;  %v296_v51 = vld [vmem:[#allocation7 + $0x658] sm:$0xff] }
 0x168   :  { %3802 = vmatpush1.bf16.msra.mxu1 %v3801_v12  ;;  %v163_v12 = vld [vmem:[#allocation7 + $0x230] sm:$0xff]  ;;  %v676_v2 = vrot.slane %v5004_v20, %v5002_v19  ;;  %v680_v26 = vrot.slane %v5004_v20, %v5007_v21  ;;  %v308_v53 = vld [vmem:[#allocation7 + $0x6b8] sm:$0xff]  ;;  %v1796_v17 = vld [vmem:[#allocation10 + $0x398] sm:$0xff] }
 0x169   :  { %3804 = vmatprep.subr.bf16.mxu1 %v3803_v3  ;;  %v176_v3 = vld [vmem:[#allocation7 + $0x298] sm:$0xff]  ;;  %v3929_v6 = vpack.c.bf16 %v163_v12, %v151_v1 }
 0x16a   :  { %4078 = vmatpush1.bf16.msra.mxu0 %v4077_v27  ;;  %v3931_v7 = vpack.c.bf16 %v188_v4, %v176_v3  ;;  %v3941_v27 = vpack.c.bf16 %v235_v23, %v223_v22  ;;  %v1790_v12 = vld [vmem:[#allocation10 + $0x368] sm:$0xff]  ;;  %v1793_v3 = vld [vmem:[#allocation10 + $0x380] sm:$0xff]  ;;  %v3951_v4 = vpack.c.bf16 %v308_v53, %v296_v51  ;;  %v1799_v18 = vld [vmem:[#allocation10 + $0x3b0] sm:$0xff] }
 0x16b   :  { %4080 = vmatprep.subr.bf16.mxu0 %v4079_v31  ;;  %v259_v31 = vld [vmem:[#allocation7 + $0x530] sm:$0xff]  ;;  %v344_v23 = vld [vmem:[#allocation7 + $0x7d8] sm:$0xff] }
 0x16c   :  { %3806 = vmatpush1.bf16.msra.mxu1 %v3805_v56  ;;  %v3933_v56 = vpack.c.bf16 %v187_v9, %v175_v8  ;;  %v3945_v40 = vpack.c.bf16 %v259_v31, %v247_v30  ;;  %v320_v8 = vld [vmem:[#allocation7 + $0x718] sm:$0xff]  ;;  %v331_v22 = vld [vmem:[#allocation7 + $0x770] sm:$0xff] }
 0x16d   :  { %3808 = vmatprep.subr.bf16.mxu1 %v3807_v50  ;;  %v3935_v50 = vpack.c.bf16 %v212_v11, %v200_v10  ;;  %v332_v9 = vld [vmem:[#allocation7 + $0x778] sm:$0xff]  ;;  %v1805_v31 = vld [vmem:[#allocation10 + $0x3e0] sm:$0xff] }
 0x16e   :  { %v1802_v30 = vld [vmem:[#allocation10 + $0x3c8] sm:$0xff] }
 0x16f   :  { %v367_v51 = vld [vmem:[#allocation7 + $0x890] sm:$0xff] }
 0x170   :  { %3810 = vmatpush1.bf16.msra.mxu1 %v3809_v24  ;;  %v248_v24 = vld [vmem:[#allocation7 + $0x4d8] sm:$0xff]  ;;  %v379_v53 = vld [vmem:[#allocation7 + $0x8f0] sm:$0xff] }
 0x171   :  { %3812 = vmatprep.subr.bf16.mxu1 %v3811_v25  ;;  %v260_v25 = vld [vmem:[#allocation7 + $0x538] sm:$0xff] }
 0x172   :  { %v3943_v29 = vpack.c.bf16 %v260_v25, %v248_v24  ;;  %v356_v24 = vld [vmem:[#allocation7 + $0x838] sm:$0xff] }
 0x174   :  { %3814 = vmatpush1.bf16.msra.mxu1 %v3813_v32 }
 0x175   :  { %3816 = vmatprep.subr.bf16.mxu1 %v3815_v33  ;;  %v272_v33 = vld [vmem:[#allocation7 + $0x598] sm:$0xff] }
 0x176   :  { %v3947_v44 = vpack.c.bf16 %v284_v34, %v272_v33  ;;  %v343_v33 = vld [vmem:[#allocation7 + $0x7d0] sm:$0xff] }
 0x177   :  { %v355_v34 = vld [vmem:[#allocation7 + $0x830] sm:$0xff] }
 0x178   :  { %3818 = vmatpush1.bf16.msra.mxu1 %v3817_v38  ;;  %v1780_v38 = vld [vmem:[#allocation10 + $0x318] sm:$0xff] }
 0x179   :  { %3820 = vmatprep.subr.bf16.mxu1 %v3819_v39 }
 0x17c   :  { %3822 = vmatpush1.bf16.msra.mxu1 %v3821_v45  ;;  %v271_v45 = vld [vmem:[#allocation7 + $0x590] sm:$0xff] }
 0x17d   :  { %3920 = vmatprep.subr.bf16.mxu1 %v3919_v46  ;;  %v283_v46 = vld [vmem:[#allocation7 + $0x5f0] sm:$0xff] }
 0x17e   :  { %v3949_v1 = vpack.c.bf16 %v283_v46, %v271_v45  ;;  %v1808_v45 = vld [vmem:[#allocation10 + $0x3f8] sm:$0xff]  ;;  %v1811_v46 = vld [vmem:[#allocation10 + $0x410] sm:$0xff] }
 0x17f   :  { %1337 = vmatmul.mubr.f32.vlgmr.msra.gmra.mrb[8].mxu1 %v4991_v61 }
 0x180   :  { %3922 = vmatpush1.bf16.msra.mxu1 %v3921_v28  ;;  %1342 = vmatprep.mubr.f32.mxu1 %v4831_v15  ;;  %v4081_v28 = vpack.c.bf16 %v1780_v38, %v1777_v37  ;;  %v380_v37 = vld [vmem:[#allocation7 + $0x8f8] sm:$0xff] }
 0x181   :  { %3924 = vmatprep.subr.bf16.mxu1 %v3923_v54 }
 0x183   :  { %1343 = vmatmul.mubr.f32.gmra.mrb[10].mxu1 %v4995_v5 }
 0x184   :  { %3926 = vmatpush1.bf16.msra.mxu1 %v3925_v62  ;;  %1567 = vmatprep.mubr.f32.mxu1 %v4977_v52  ;;  %v3937_v52 = vpack.c.bf16 %v211_v16, %v199_v14  ;;  %v1786_v62 = vld [vmem:[#allocation10 + $0x348] sm:$0xff]  ;;  %v1792_v14 = vld [vmem:[#allocation10 + $0x378] sm:$0xff] }
 0x185   :  { %3928 = vmatprep.subr.bf16.mxu1 %v3927_v0  ;;  %v4085_v10 = vpack.c.bf16 %v1786_v62, %v1783_v60  ;;  %v4099_v62 = vpack.c.bf16 %v1811_v46, %v1808_v45 }
 0x188   :  { %3930 = vmatpush1.bf16.msra.mxu1 %v3929_v6  ;;  %v307_v6 = vld [vmem:[#allocation7 + $0x6b0] sm:$0xff] }
 0x189   :  { %3932 = vmatprep.subr.bf16.mxu1 %v3931_v7  ;;  %v3953_v16 = vpack.c.bf16 %v307_v6, %v295_v41  ;;  %v1814_v41 = vld [vmem:[#allocation10 + $0x428] sm:$0xff]  ;;  %v1817_v6 = vld [vmem:[#allocation10 + $0x440] sm:$0xff] }
 0x18c   :  { %3934 = vmatpush1.bf16.msra.mxu1 %v3933_v56  ;;  %v4087_v56 = vpack.c.bf16 %v1793_v3, %v1790_v12  ;;  %v1810_v12 = vld [vmem:[#allocation10 + $0x408] sm:$0xff]  ;;  %v3965_v3 = vpack.c.bf16 %v379_v53, %v367_v51  ;;  %v1828_v51 = vld [vmem:[#allocation10 + $0x498] sm:$0xff] }
 0x18d   :  { %3936 = vmatprep.subr.bf16.mxu1 %v3935_v50  ;;  %v1789_v50 = vld [vmem:[#allocation10 + $0x360] sm:$0xff] }
 0x18e   :  { %v4089_v25 = vpack.c.bf16 %v1792_v14, %v1789_v50  ;;  %v428_v50 = vld [vmem:[#allocation7 + $0xa78] sm:$0xff] }
 0x190   :  { %3938 = vmatpush1.bf16.msra.mxu1 %v3937_v52  ;;  %v3955_v52 = vpack.c.bf16 %v332_v9, %v320_v8  ;;  %v391_v9 = vld [vmem:[#allocation7 + $0x950] sm:$0xff] }
 0x191   :  { %3940 = vmatprep.subr.bf16.mxu1 %v3939_v57  ;;  %v319_v57 = vld [vmem:[#allocation7 + $0x710] sm:$0xff] }
 0x192   :  { %v876_v32 = vpop.f32.mrb[0].mxu1 }
 0x193   :  { %v5013_v35 = vadd.f32 %v876_v32, %v676_v2  ;;  %v878_v36 = vpop.f32.mrb[1].mxu1  ;;  %v3959_v32 = vpack.c.bf16 %v356_v24, %v344_v23  ;;  %v1823_v23 = vld [vmem:[#allocation10 + $0x470] sm:$0xff] }
 0x194   :  { %v5015_v39 = vadd.f32 %v878_v36, %v680_v26  ;;  %3942 = vmatpush1.bf16.msra.mxu1 %v3941_v27  ;;  %v1798_v27 = vld [vmem:[#allocation10 + $0x3a8] sm:$0xff] }
 0x195   :  { %3944 = vmatprep.subr.bf16.mxu1 %v3943_v29  ;;  %v1657_v54 = vmax.f32 %v5013_v35, 0.0  ;;  %v3957_v29 = vpack.c.bf16 %v331_v22, %v319_v57  ;;  %v368_v36 = vld [vmem:[#allocation7 + $0x898] sm:$0xff]  ;;  %v1820_v22 = vld [vmem:[#allocation10 + $0x458] sm:$0xff] }
 0x196   :  { %v1658_v48 = vmax.f32 %v5015_v39, 0.0  ;;  %v882_v49 = vpop.f32.mrb[2].mxu1  ;;  %v1848_v35 = vld [vmem:[#allocation10 + $0x538] sm:$0xff] }
 0x197   :  { %v5019_v55 = vadd.f32 %v882_v49, %v676_v2  ;;  %v884_v58 = vpop.f32.mrb[3].mxu1  ;;  %v4091_v2 = vpack.c.bf16 %v1799_v18, %v1796_v17  ;;  %v3963_v49 = vpack.c.bf16 %v380_v37, %v368_v36  ;;  %v1813_v17 = vld [vmem:[#allocation10 + $0x420] sm:$0xff]  ;;  %v1816_v18 = vld [vmem:[#allocation10 + $0x438] sm:$0xff]  ;;  %v1826_v36 = vld [vmem:[#allocation10 + $0x488] sm:$0xff] }
 0x198   :  { %v5021_v0 = vadd.f32 %v884_v58, %v680_v26  ;;  %3946 = vmatpush1.bf16.msra.mxu1 %v3945_v40  ;;  %2338 = vmatprep.mubr.f32.mxu0 %v1658_v48  ;;  %v1795_v26 = vld [vmem:[#allocation10 + $0x390] sm:$0xff]  ;;  %v4095_v40 = vpack.c.bf16 %v1805_v31, %v1802_v30  ;;  %v4105_v30 = vpack.c.bf16 %v1816_v18, %v1813_v17  ;;  %v1829_v37 = vld [vmem:[#allocation10 + $0x4a0] sm:$0xff] }
 0x199   :  { %2339 = vmatmul.mubr.f32.vlgmr.msra.gmra.mrb[8].mxu0 %v1657_v54  ;;  %3948 = vmatprep.subr.bf16.mxu1 %v3947_v44  ;;  %v1669_v11 = vmax.f32 %v5019_v55, 0.0  ;;  %v4093_v38 = vpack.c.bf16 %v1798_v27, %v1795_v26  ;;  %v3961_v44 = vpack.c.bf16 %v355_v34, %v343_v33  ;;  %v404_v58 = vld [vmem:[#allocation7 + $0x9b8] sm:$0xff]  ;;  %v427_v26 = vld [vmem:[#allocation7 + $0xa70] sm:$0xff]  ;;  %v4107_v31 = vpack.c.bf16 %v1823_v23, %v1820_v22 }
 0x19a   :  { %v1670_v7 = vmax.f32 %v5021_v0, 0.0  ;;  %4082 = vmatpush1.bf16.msra.mxu0 %v4081_v28  ;;  %v392_v28 = vld [vmem:[#allocation7 + $0x958] sm:$0xff]  ;;  %v4111_v46 = vpack.c.bf16 %v1829_v37, %v1826_v36  ;;  %v499_v17 = vld [vmem:[#allocation7 + $0xcb0] sm:$0xff]  ;;  %v1900_v0 = vld [vmem:[#allocation10 + $0x6d8] sm:$0xff] }
 0x19b   :  { %4084 = vmatprep.subr.bf16.mxu0 %v4083_v59  ;;  %v4097_v59 = vpack.c.bf16 %v1804_v43, %v1801_v42  ;;  %v3967_v8 = vpack.c.bf16 %v404_v58, %v392_v28  ;;  %v440_v27 = vld [vmem:[#allocation7 + $0xad8] sm:$0xff]  ;;  %v451_v42 = vld [vmem:[#allocation7 + $0xb30] sm:$0xff]  ;;  %v1832_v28 = vld [vmem:[#allocation10 + $0x4b8] sm:$0xff] }
 0x19c   :  { %3950 = vmatpush1.bf16.msra.mxu1 %v3949_v1  ;;  %2344 = vmatprep.mubr.f32.mxu0 %v1670_v7  ;;  %v1807_v1 = vld [vmem:[#allocation10 + $0x3f0] sm:$0xff]  ;;  %v1822_v33 = vld [vmem:[#allocation10 + $0x468] sm:$0xff] }
 0x19d   :  { %2345 = vmatmul.mubr.f32.gmra.mrb[10].mxu0 %v1669_v11  ;;  %3952 = vmatprep.subr.bf16.mxu1 %v3951_v4  ;;  %v4101_v14 = vpack.c.bf16 %v1810_v12, %v1807_v1  ;;  %v464_v43 = vld [vmem:[#allocation7 + $0xb98] sm:$0xff]  ;;  %v475_v1 = vld [vmem:[#allocation7 + $0xbf0] sm:$0xff] }
 0x19e   :  { %4086 = vmatpush1.bf16.msra.mxu0 %v4085_v10  ;;  %v403_v10 = vld [vmem:[#allocation7 + $0x9b0] sm:$0xff]  ;;  %v1835_v58 = vld [vmem:[#allocation10 + $0x4d0] sm:$0xff] }
 0x19f   :  { %4088 = vmatprep.subr.bf16.mxu0 %v4087_v56  ;;  %v416_v56 = vld [vmem:[#allocation7 + $0xa18] sm:$0xff]  ;;  %v3969_v57 = vpack.c.bf16 %v403_v10, %v391_v9 }
 0x1a0   :  { %3954 = vmatpush1.bf16.msra.mxu1 %v3953_v16  ;;  %v5033_v60 = vpop.f32.mrb[0].mxu0  ;;  %v4103_v16 = vpack.c.bf16 %v1817_v6, %v1814_v41  ;;  %v488_v12 = vld [vmem:[#allocation7 + $0xc58] sm:$0xff]  ;;  %v4115_v6 = vpack.c.bf16 %v1835_v58, %v1832_v28 }
 0x1a1   :  { %3956 = vmatprep.subr.bf16.mxu1 %v3955_v52  ;;  %v5035_v4 = vpop.f32.mrb[1].mxu0  ;;  %v1834_v9 = vld [vmem:[#allocation10 + $0x4c8] sm:$0xff] }
 0x1a2   :  { %4090 = vmatpush1.bf16.msra.mxu0 %v4089_v25  ;;  %v3971_v25 = vpack.c.bf16 %v428_v50, %v416_v56  ;;  %v1838_v56 = vld [vmem:[#allocation10 + $0x4e8] sm:$0xff]  ;;  %v1841_v50 = vld [vmem:[#allocation10 + $0x500] sm:$0xff] }
 0x1a3   :  { %4092 = vmatprep.subr.bf16.mxu0 %v4091_v2  ;;  %v415_v2 = vld [vmem:[#allocation7 + $0xa10] sm:$0xff]  ;;  %v512_v18 = vld [vmem:[#allocation7 + $0xd18] sm:$0xff]  ;;  %v4119_v23 = vpack.c.bf16 %v1841_v50, %v1838_v56 }
 0x1a4   :  { %3958 = vmatpush1.bf16.msra.mxu1 %v3957_v29  ;;  %v5037_v52 = vpop.f32.mrb[2].mxu0  ;;  %v452_v29 = vld [vmem:[#allocation7 + $0xb38] sm:$0xff]  ;;  %v3973_v34 = vpack.c.bf16 %v427_v26, %v415_v2  ;;  %v1840_v2 = vld [vmem:[#allocation10 + $0x4f8] sm:$0xff] }
 0x1a5   :  { %3960 = vmatprep.subr.bf16.mxu1 %v3959_v32  ;;  %v5039_v24 = vpop.f32.mrb[3].mxu0  ;;  %v1819_v32 = vld [vmem:[#allocation10 + $0x450] sm:$0xff]  ;;  %v1854_v55 = vld [vmem:[#allocation10 + $0x568] sm:$0xff] }
 0x1a6   :  { %4094 = vmatpush1.bf16.msra.mxu0 %v4093_v38  ;;  %v3975_v38 = vpack.c.bf16 %v452_v29, %v440_v27  ;;  %v4109_v45 = vpack.c.bf16 %v1822_v33, %v1819_v32  ;;  %v1844_v27 = vld [vmem:[#allocation10 + $0x518] sm:$0xff]  ;;  %v1847_v29 = vld [vmem:[#allocation10 + $0x530] sm:$0xff]  ;;  %v523_v32 = vld [vmem:[#allocation7 + $0xd70] sm:$0xff] }
 0x1a7   :  { %4096 = vmatprep.subr.bf16.mxu0 %v4095_v40  ;;  %v439_v40 = vld [vmem:[#allocation7 + $0xad0] sm:$0xff]  ;;  %v536_v33 = vld [vmem:[#allocation7 + $0xdd8] sm:$0xff]  ;;  %v4123_v37 = vpack.c.bf16 %v1847_v29, %v1844_v27 }
 0x1a8   :  { %3962 = vmatpush1.bf16.msra.mxu1 %v3961_v44  ;;  %v476_v44 = vld [vmem:[#allocation7 + $0xbf8] sm:$0xff]  ;;  %v3977_v53 = vpack.c.bf16 %v451_v42, %v439_v40  ;;  %v1861_v29 = vld [vmem:[#allocation10 + $0x5a0] sm:$0xff] }
 0x1a9   :  { %3964 = vmatprep.subr.bf16.mxu1 %v3963_v49  ;;  %v1825_v49 = vld [vmem:[#allocation10 + $0x480] sm:$0xff]  ;;  %v1846_v40 = vld [vmem:[#allocation10 + $0x528] sm:$0xff]  ;;  %v1855_v50 = vld [vmem:[#allocation10 + $0x570] sm:$0xff] }
 0x1aa   :  { %4098 = vmatpush1.bf16.msra.mxu0 %v4097_v59  ;;  %v3979_v59 = vpack.c.bf16 %v476_v44, %v464_v43  ;;  %v4113_v41 = vpack.c.bf16 %v1828_v51, %v1825_v49  ;;  %v4680_v43 = vld [vmem:[#allocation4 + $0x20] sm:$0xff]  ;;  %v572_v28 = vld [vmem:[#allocation7 + $0xef8] sm:$0xff] }
 0x1ab   :  { %4100 = vmatprep.subr.bf16.mxu0 %v4099_v62  ;;  %v463_v62 = vld [vmem:[#allocation7 + $0xb90] sm:$0xff] }
 0x1ac   :  { %3966 = vmatpush1.bf16.msra.mxu1 %v3965_v3  ;;  %v500_v3 = vld [vmem:[#allocation7 + $0xcb8] sm:$0xff]  ;;  %v3981_v10 = vpack.c.bf16 %v475_v1, %v463_v62  ;;  %v535_v49 = vld [vmem:[#allocation7 + $0xdd0] sm:$0xff]  ;;  %v1852_v62 = vld [vmem:[#allocation10 + $0x558] sm:$0xff] }
 0x1ad   :  { %3968 = vmatprep.subr.bf16.mxu1 %v3967_v8  ;;  %v1831_v8 = vld [vmem:[#allocation10 + $0x4b0] sm:$0xff]  ;;  %v1850_v44 = vld [vmem:[#allocation10 + $0x548] sm:$0xff] }
 0x1ae   :  { %4102 = vmatpush1.bf16.msra.mxu0 %v4101_v14  ;;  %v3983_v14 = vpack.c.bf16 %v500_v3, %v488_v12  ;;  %v4117_v22 = vpack.c.bf16 %v1834_v9, %v1831_v8  ;;  %v547_v51 = vld [vmem:[#allocation7 + $0xe30] sm:$0xff]  ;;  %v1856_v12 = vld [vmem:[#allocation10 + $0x578] sm:$0xff]  ;;  %v1859_v3 = vld [vmem:[#allocation10 + $0x590] sm:$0xff] }
 0x1af   :  { %4104 = vmatprep.subr.bf16.mxu0 %v4103_v16  ;;  %v487_v16 = vld [vmem:[#allocation7 + $0xc50] sm:$0xff]  ;;  %v3993_v1 = vpack.c.bf16 %v547_v51, %v535_v49  ;;  %v584_v9 = vld [vmem:[#allocation7 + $0xf58] sm:$0xff] }
 0x1b0   :  { %3970 = vmatpush1.bf16.msra.mxu1 %v3969_v57  ;;  %v524_v57 = vld [vmem:[#allocation7 + $0xd78] sm:$0xff]  ;;  %v3985_v26 = vpack.c.bf16 %v499_v17, %v487_v16  ;;  %v571_v8 = vld [vmem:[#allocation7 + $0xef0] sm:$0xff] }
 0x1b1   :  { %3972 = vmatprep.subr.bf16.mxu1 %v3971_v25  ;;  %v1837_v25 = vld [vmem:[#allocation10 + $0x4e0] sm:$0xff]  ;;  %v1862_v17 = vld [vmem:[#allocation10 + $0x5a8] sm:$0xff] }
 0x1b2   :  { %4106 = vmatpush1.bf16.msra.mxu0 %v4105_v30  ;;  %v3987_v30 = vpack.c.bf16 %v524_v57, %v512_v18  ;;  %v4121_v36 = vpack.c.bf16 %v1840_v2, %v1837_v25  ;;  %v1865_v18 = vld [vmem:[#allocation10 + $0x5c0] sm:$0xff]  ;;  %v608_v25 = vld [vmem:[#allocation7 + $0x1018] sm:$0xff] }
 0x1b3   :  { %4108 = vmatprep.subr.bf16.mxu0 %v4107_v31  ;;  %v511_v31 = vld [vmem:[#allocation7 + $0xd10] sm:$0xff]  ;;  %v620_v2 = vld [vmem:[#allocation7 + $0x1078] sm:$0xff]  ;;  %v4135_v27 = vpack.c.bf16 %v1865_v18, %v1862_v17 }
 0x1b4   :  { %3974 = vmatpush1.bf16.msra.mxu1 %v3973_v34  ;;  %v548_v34 = vld [vmem:[#allocation7 + $0xe38] sm:$0xff]  ;;  %v3989_v42 = vpack.c.bf16 %v523_v32, %v511_v31  ;;  %v1868_v32 = vld [vmem:[#allocation10 + $0x5d8] sm:$0xff]  ;;  %v1877_v51 = vld [vmem:[#allocation10 + $0x620] sm:$0xff] }
 0x1b5   :  { %3976 = vmatprep.subr.bf16.mxu1 %v3975_v38  ;;  %v1843_v38 = vld [vmem:[#allocation10 + $0x510] sm:$0xff]  ;;  %v1874_v49 = vld [vmem:[#allocation10 + $0x608] sm:$0xff] }
 0x1b6   :  { %4110 = vmatpush1.bf16.msra.mxu0 %v4109_v45  ;;  %v1853_v45 = vld [vmem:[#allocation10 + $0x560] sm:$0xff]  ;;  %v4125_v58 = vpack.c.bf16 %v1846_v40, %v1843_v38  ;;  %v632_v38 = vld [vmem:[#allocation7 + $0x10d8] sm:$0xff] }
 0x1b7   :  { %4112 = vmatprep.subr.bf16.mxu0 %v4111_v46  ;;  %v3991_v46 = vpack.c.bf16 %v548_v34, %v536_v33  ;;  %v1871_v33 = vld [vmem:[#allocation10 + $0x5f0] sm:$0xff]  ;;  %v4003_v34 = vpack.c.bf16 %v620_v2, %v608_v25  ;;  %v1746_v25 = vld [vmem:[#allocation10 + $0x208] sm:$0xff] }
 0x1b8   :  { %3978 = vmatpush1.bf16.msra.mxu1 %v3977_v53  ;;  %v560_v53 = vld [vmem:[#allocation7 + $0xe98] sm:$0xff] }
 0x1b9   :  { %3980 = vmatprep.subr.bf16.mxu1 %v3979_v59  ;;  %v1849_v59 = vld [vmem:[#allocation10 + $0x540] sm:$0xff]  ;;  %v644_v40 = vld [vmem:[#allocation7 + $0x1138] sm:$0xff] }
 0x1ba   :  { %4114 = vmatpush1.bf16.msra.mxu0 %v4113_v41  ;;  %v3995_v41 = vpack.c.bf16 %v572_v28, %v560_v53  ;;  %v4129_v56 = vpack.c.bf16 %v1852_v62, %v1849_v59  ;;  %v4007_v53 = vpack.c.bf16 %v644_v40, %v632_v38  ;;  %v631_v28 = vld [vmem:[#allocation7 + $0x10d0] sm:$0xff]  ;;  %v668_v59 = vld [vmem:[#allocation7 + $0x11f8] sm:$0xff] }
 0x1bb   :  { %4116 = vmatprep.subr.bf16.mxu0 %v4115_v6  ;;  %v559_v6 = vld [vmem:[#allocation7 + $0xe90] sm:$0xff]  ;;  %v1707_v40 = vld [vmem:[#allocation10 + $0xd0] sm:$0xff] }
 0x1bc   :  { %3982 = vmatpush1.bf16.msra.mxu1 %v3981_v10  ;;  %v596_v10 = vld [vmem:[#allocation7 + $0xfb8] sm:$0xff]  ;;  %v3997_v16 = vpack.c.bf16 %v571_v8, %v559_v6  ;;  %v667_v6 = vld [vmem:[#allocation7 + $0x11f0] sm:$0xff] }
 0x1bd   :  { %3984 = vmatprep.subr.bf16.mxu1 %v3983_v14  ;;  %v1858_v14 = vld [vmem:[#allocation10 + $0x588] sm:$0xff]  ;;  %v3999_v57 = vpack.c.bf16 %v596_v10, %v584_v9  ;;  %v1731_v8 = vld [vmem:[#allocation10 + $0x190] sm:$0xff] }
 0x1be   :  { %4118 = vmatpush1.bf16.msra.mxu0 %v4117_v22  ;;  %v583_v22 = vld [vmem:[#allocation7 + $0xf50] sm:$0xff] }
 0x1bf   :  { %1568 = vmatmul.mubr.f32.vlgmr.msra.gmra.mrb[12].mxu1 %v4983_v47  ;;  %4120 = vmatprep.subr.bf16.mxu0 %v4119_v23  ;;  %v4127_v47 = vpack.c.bf16 %v1853_v45, %v1850_v44  ;;  %v595_v23 = vld [vmem:[#allocation7 + $0xfb0] sm:$0xff]  ;;  %v1867_v44 = vld [vmem:[#allocation10 + $0x5d0] sm:$0xff] }
 0x1c0   :  { %3986 = vmatpush1.bf16.msra.mxu1 %v3985_v26  ;;  %1573 = vmatprep.mubr.f32.mxu1 %v4680_v43  ;;  %v4133_v26 = vpack.c.bf16 %v1858_v14, %v1855_v50  ;;  %v4001_v31 = vpack.c.bf16 %v595_v23, %v583_v22  ;;  %v4139_v43 = vpack.c.bf16 %v1871_v33, %v1868_v32  ;;  %v1870_v45 = vld [vmem:[#allocation10 + $0x5e8] sm:$0xff]  ;;  %v1737_v14 = vld [vmem:[#allocation10 + $0x1c0] sm:$0xff]  ;;  %v1692_v22 = vld [vmem:[#allocation10 + $0x58] sm:$0xff] }
 0x1c1   :  { %3988 = vmatprep.subr.bf16.mxu1 %v3987_v30  ;;  %v1864_v30 = vld [vmem:[#allocation10 + $0x5b8] sm:$0xff]  ;;  %v4141_v62 = vpack.c.bf16 %v1870_v45, %v1867_v44  ;;  %v1734_v9 = vld [vmem:[#allocation10 + $0x1a8] sm:$0xff]  ;;  %v1743_v23 = vld [vmem:[#allocation10 + $0x1f0] sm:$0xff] }
 0x1c2   :  { %4122 = vmatpush1.bf16.msra.mxu0 %v4121_v36  ;;  %v607_v36 = vld [vmem:[#allocation7 + $0x1010] sm:$0xff]  ;;  %v1764_v44 = vld [vmem:[#allocation10 + $0x298] sm:$0xff] }
 0x1c3   :  { %1574 = vmatmul.mubr.f32.gmra.mrb[14].mxu1 %v4987_v63  ;;  %4124 = vmatprep.subr.bf16.mxu0 %v4123_v37  ;;  %v4131_v63 = vpack.c.bf16 %v1859_v3, %v1856_v12  ;;  %v619_v37 = vld [vmem:[#allocation7 + $0x1070] sm:$0xff] }
 0x1c4   :  { %3990 = vmatpush1.bf16.msra.mxu1 %v3989_v42  ;;  %1644 = vmatprep.mubr.f32.mxu1 %v4831_v15  ;;  %v4137_v42 = vpack.c.bf16 %v1864_v30, %v1861_v29  ;;  %v1686_v50 = vld [vmem:[#allocation10 + $0x28] sm:$0xff]  ;;  %v1749_v30 = vld [vmem:[#allocation10 + $0x220] sm:$0xff] }
 0x1c5   :  { %3992 = vmatprep.subr.bf16.mxu1 %v3991_v46  ;;  %v4005_v46 = vpack.c.bf16 %v619_v37, %v607_v36  ;;  %v1698_v29 = vld [vmem:[#allocation10 + $0x88] sm:$0xff]  ;;  %v1755_v36 = vld [vmem:[#allocation10 + $0x250] sm:$0xff] }
 0x1c6   :  { %4126 = vmatpush1.bf16.msra.mxu0 %v4125_v58  ;;  %v643_v58 = vld [vmem:[#allocation7 + $0x1130] sm:$0xff] }
 0x1c7   :  { %4128 = vmatprep.subr.bf16.mxu0 %v4127_v47  ;;  %v656_v47 = vld [vmem:[#allocation7 + $0x1198] sm:$0xff]  ;;  %v4009_v12 = vpack.c.bf16 %v643_v58, %v631_v28  ;;  %v695_v58 = vsub.s32 5, %v4999_v13 }
 0x1c8   :  { %3994 = vmatpush1.bf16.msra.mxu1 %v3993_v1  ;;  %v4143_v1 = vpack.c.bf16 %v1877_v51, %v1874_v49  ;;  %v4011_v3 = vpack.c.bf16 %v668_v59, %v656_v47  ;;  %v1716_v49 = vld [vmem:[#allocation10 + $0x118] sm:$0xff]  ;;  %v1767_v51 = vld [vmem:[#allocation10 + $0x2b0] sm:$0xff] }
 0x1c9   :  { %3996 = vmatprep.subr.bf16.mxu1 %v3995_v41  ;;  %v655_v41 = vld [vmem:[#allocation7 + $0x1190] sm:$0xff] }
 0x1ca   :  { %4130 = vmatpush1.bf16.msra.mxu0 %v4129_v56  ;;  %v4013_v10 = vpack.c.bf16 %v667_v6, %v655_v41  ;;  %v4399_v56 = vpack.c.bf16 %v1734_v9, %v1731_v8  ;;  %v1773_v41 = vld [vmem:[#allocation10 + $0x2e0] sm:$0xff]  ;;  %v1776_v6 = vld [vmem:[#allocation10 + $0x2f8] sm:$0xff] }
 0x1cb   :  { %4132 = vmatprep.subr.bf16.mxu0 %v4131_v63  ;;  %v1683_v63 = vld [vmem:[#allocation10 + $0x10] sm:$0xff] }
 0x1cc   :  { %3998 = vmatpush1.bf16.msra.mxu1 %v3997_v16  ;;  %v1740_v16 = vld [vmem:[#allocation10 + $0x1d8] sm:$0xff]  ;;  %v4401_v17 = vpack.c.bf16 %v1686_v50, %v1683_v63  ;;  %v5062_v63 = vrot.slane %v5004_v20, %v695_v58 }
 0x1cd   :  { %4000 = vmatprep.subr.bf16.mxu1 %v3999_v57  ;;  %v4403_v18 = vpack.c.bf16 %v1740_v16, %v1737_v14  ;;  %v1689_v57 = vld [vmem:[#allocation10 + $0x40] sm:$0xff]  ;;  %v1880_v16 = vld [vmem:[#allocation10 + $0x638] sm:$0xff] }
 0x1ce   :  { %4134 = vmatpush1.bf16.msra.mxu0 %v4133_v26  ;;  %v4405_v2 = vpack.c.bf16 %v1692_v22, %v1689_v57  ;;  %v4407_v26 = vpack.c.bf16 %v1746_v25, %v1743_v23  ;;  %v1725_v57 = vld [vmem:[#allocation10 + $0x160] sm:$0xff]  ;;  %v1728_v22 = vld [vmem:[#allocation10 + $0x178] sm:$0xff] }
 0x1cf   :  { %4136 = vmatprep.subr.bf16.mxu0 %v4135_v27  ;;  %v1695_v27 = vld [vmem:[#allocation10 + $0x70] sm:$0xff]  ;;  %v1892_v58 = vld [vmem:[#allocation10 + $0x698] sm:$0xff] }
 0x1d0   :  { %4002 = vmatpush1.bf16.msra.mxu1 %v4001_v31  ;;  %v1752_v31 = vld [vmem:[#allocation10 + $0x238] sm:$0xff]  ;;  %v4409_v32 = vpack.c.bf16 %v1698_v29, %v1695_v27  ;;  %v1830_v27 = vld [vmem:[#allocation10 + $0x4a8] sm:$0xff] }
 0x1d1   :  { %4004 = vmatprep.subr.bf16.mxu1 %v4003_v34  ;;  %v4411_v33 = vpack.c.bf16 %v1752_v31, %v1749_v30  ;;  %v1704_v34 = vld [vmem:[#allocation10 + $0xb8] sm:$0xff] }
 0x1d2   :  { %4138 = vmatpush1.bf16.msra.mxu0 %v4137_v42  ;;  %v1710_v42 = vld [vmem:[#allocation10 + $0xe8] sm:$0xff] }
 0x1d3   :  { %4140 = vmatprep.subr.bf16.mxu0 %v4139_v43  ;;  %v1761_v43 = vld [vmem:[#allocation10 + $0x280] sm:$0xff]  ;;  %v4417_v39 = vpack.c.bf16 %v1710_v42, %v1707_v40  ;;  %v1779_v40 = vld [vmem:[#allocation10 + $0x310] sm:$0xff]  ;;  %v1782_v42 = vld [vmem:[#allocation10 + $0x328] sm:$0xff] }
 0x1d4   :  { %4006 = vmatpush1.bf16.msra.mxu1 %v4005_v46  ;;  %v4419_v45 = vpack.c.bf16 %v1764_v44, %v1761_v43  ;;  %v1713_v46 = vld [vmem:[#allocation10 + $0x100] sm:$0xff] }
 0x1d5   :  { %4008 = vmatprep.subr.bf16.mxu1 %v4007_v53  ;;  %v1770_v53 = vld [vmem:[#allocation10 + $0x2c8] sm:$0xff]  ;;  %v4421_v59 = vpack.c.bf16 %v1716_v49, %v1713_v46  ;;  %v1833_v44 = vld [vmem:[#allocation10 + $0x4c0] sm:$0xff] }
 0x1d6   :  { %4142 = vmatpush1.bf16.msra.mxu0 %v4141_v62  ;;  %v4423_v62 = vpack.c.bf16 %v1770_v53, %v1767_v51  ;;  %v1885_v49 = vld [vmem:[#allocation10 + $0x660] sm:$0xff]  ;;  %v1888_v51 = vld [vmem:[#allocation10 + $0x678] sm:$0xff] }
 0x1d7   :  { %4144 = vmatprep.subr.bf16.mxu0 %v4143_v1  ;;  %v1719_v1 = vld [vmem:[#allocation10 + $0x130] sm:$0xff] }
 0x1d8   :  { %4010 = vmatpush1.bf16.msra.mxu1 %v4009_v12  ;;  %v1722_v12 = vld [vmem:[#allocation10 + $0x148] sm:$0xff] }
 0x1d9   :  { %4012 = vmatprep.subr.bf16.mxu1 %v4011_v3  ;;  %v4425_v14 = vpack.c.bf16 %v1722_v12, %v1719_v1  ;;  %v1788_v1 = vld [vmem:[#allocation10 + $0x358] sm:$0xff]  ;;  %v4153_v12 = vpack.c.bf16 %v1888_v51, %v1885_v49  ;;  %v1857_v49 = vld [vmem:[#allocation10 + $0x580] sm:$0xff] }
 0x1da   :  { %v1860_v51 = vld [vmem:[#allocation10 + $0x598] sm:$0xff] }
 0x1dc   :  { %4014 = vmatpush1.bf16.msra.mxu1 %v4013_v10  ;;  %v1873_v10 = vld [vmem:[#allocation10 + $0x600] sm:$0xff] }
 0x1dd   :  { %4400 = vmatprep.subr.bf16.mxu1 %v4399_v56  ;;  %v1876_v56 = vld [vmem:[#allocation10 + $0x618] sm:$0xff] }
 0x1df   :  { %1645 = vmatmul.mubr.f32.vlgmr.msra.gmra.mrb[12].mxu1 %v4991_v61  ;;  %v1701_v61 = vld [vmem:[#allocation10 + $0xa0] sm:$0xff] }
 0x1e0   :  { %4402 = vmatpush3.bf16.msra.mxu1 %v4401_v17  ;;  %1650 = vmatprep.mubr.f32.mxu1 %v4831_v15  ;;  %v1758_v15 = vld [vmem:[#allocation10 + $0x268] sm:$0xff]  ;;  %v4413_v37 = vpack.c.bf16 %v1704_v34, %v1701_v61  ;;  %v1883_v17 = vld [vmem:[#allocation10 + $0x650] sm:$0xff]  ;;  %v5072_v61 = vadd.f32 %v5035_v4, %v5062_v63 }
 0x1e1   :  { %4404 = vmatprep.subr.bf16.mxu1 %v4403_v18  ;;  %v4415_v38 = vpack.c.bf16 %v1758_v15, %v1755_v36  ;;  %v4427_v18 = vpack.c.bf16 %v1776_v6, %v1773_v41  ;;  %v4147_v31 = vpack.c.bf16 %v1883_v17, %v1880_v16  ;;  %v4429_v36 = vpack.c.bf16 %v1728_v22, %v1725_v57  ;;  %v1886_v15 = vld [vmem:[#allocation10 + $0x668] sm:$0xff]  ;;  %v1901_v16 = vld [vmem:[#allocation10 + $0x6e0] sm:$0xff] }
 0x1e2   :  { %v1662_v53 = vmax.f32 %v5072_v61, 0.0  ;;  %v1842_v41 = vld [vmem:[#allocation10 + $0x508] sm:$0xff]  ;;  %v1961_v61 = vld [vmem:[#allocation10 + $0x8c0] sm:$0xff] }
 0x1e3   :  { %1651 = vmatmul.mubr.f32.gmra.mrb[14].mxu1 %v4995_v5  ;;  %v5050_v5 = vsub.s32 2, %v4999_v13  ;;  %v1794_v57 = vld [vmem:[#allocation10 + $0x388] sm:$0xff] }
 0x1e4   :  { %4406 = vmatpush3.bf16.msra.mxu1 %v4405_v2  ;;  %2800 = vmatprep.mubr.f32.mxu1 %v1658_v48  ;;  %v687_v48 = vsub.s32 3, %v4999_v13  ;;  %v4145_v2 = vpack.c.bf16 %v1876_v56, %v1873_v10  ;;  %v1894_v10 = vld [vmem:[#allocation10 + $0x6a8] sm:$0xff] }
 0x1e5   :  { %4408 = vmatprep.subr.bf16.mxu1 %v4407_v26  ;;  %v684_v28 = vrot.slane %v5004_v20, %v5050_v5  ;;  %v1827_v26 = vld [vmem:[#allocation10 + $0x490] sm:$0xff] }
 0x1e6   :  { %v688_v47 = vrot.slane %v5004_v20, %v687_v48 }
 0x1e8   :  { %4410 = vmatpush3.bf16.msra.mxu1 %v4409_v32  ;;  %v1879_v32 = vld [vmem:[#allocation10 + $0x630] sm:$0xff] }
 0x1e9   :  { %4412 = vmatprep.subr.bf16.mxu1 %v4411_v33  ;;  %v1882_v33 = vld [vmem:[#allocation10 + $0x648] sm:$0xff] }
 0x1ea   :  { %v4149_v4 = vpack.c.bf16 %v1882_v33, %v1879_v32  ;;  %v1800_v32 = vld [vmem:[#allocation10 + $0x3b8] sm:$0xff] }
 0x1ec   :  { %4414 = vmatpush3.bf16.msra.mxu1 %v4413_v37  ;;  %v1889_v37 = vld [vmem:[#allocation10 + $0x680] sm:$0xff] }
 0x1ed   :  { %4416 = vmatprep.subr.bf16.mxu1 %v4415_v38  ;;  %v4431_v38 = vpack.c.bf16 %v1830_v27, %v1827_v26  ;;  %v4151_v46 = vpack.c.bf16 %v1889_v37, %v1886_v15  ;;  %v1904_v26 = vld [vmem:[#allocation10 + $0x6f8] sm:$0xff]  ;;  %v1907_v27 = vld [vmem:[#allocation10 + $0x710] sm:$0xff]  ;;  %v1906_v37 = vld [vmem:[#allocation10 + $0x708] sm:$0xff] }
 0x1ee   :  { %v1903_v15 = vld [vmem:[#allocation10 + $0x6f0] sm:$0xff] }
 0x1f0   :  { %4418 = vmatpush3.bf16.msra.mxu1 %v4417_v39  ;;  %v1836_v39 = vld [vmem:[#allocation10 + $0x4d8] sm:$0xff] }
 0x1f1   :  { %4420 = vmatprep.subr.bf16.mxu1 %v4419_v45 }
 0x1f2   :  { %v1030_v3 = vpop.f32.mrb[4].mxu1 }
 0x1f3   :  { %v5059_v8 = vadd.f32 %v1030_v3, %v684_v28  ;;  %v1032_v9 = vpop.f32.mrb[5].mxu1  ;;  %v1839_v3 = vld [vmem:[#allocation10 + $0x4f0] sm:$0xff] }
 0x1f4   :  { %v5064_v50 = vadd.f32 %v1032_v9, %v688_v47  ;;  %4422 = vmatpush3.bf16.msra.mxu1 %v4421_v59  ;;  %v4435_v59 = vpack.c.bf16 %v1836_v39, %v1833_v44  ;;  %v1891_v9 = vld [vmem:[#allocation10 + $0x690] sm:$0xff]  ;;  %v4439_v17 = vpack.c.bf16 %v1842_v41, %v1839_v3  ;;  %v1806_v39 = vld [vmem:[#allocation10 + $0x3e8] sm:$0xff]  ;;  %v4451_v41 = vpack.c.bf16 %v1860_v51, %v1857_v49  ;;  %v1937_v49 = vld [vmem:[#allocation10 + $0x800] sm:$0xff] }
 0x1f5   :  { %4424 = vmatprep.subr.bf16.mxu1 %v4423_v62  ;;  %v1659_v29 = vmax.f32 %v5059_v8, 0.0  ;;  %v1785_v62 = vld [vmem:[#allocation10 + $0x340] sm:$0xff]  ;;  %v4157_v22 = vpack.c.bf16 %v1894_v10, %v1891_v9  ;;  %v1803_v44 = vld [vmem:[#allocation10 + $0x3d0] sm:$0xff]  ;;  %v1812_v9 = vld [vmem:[#allocation10 + $0x418] sm:$0xff] }
 0x1f6   :  { %v1660_v23 = vmax.f32 %v5064_v50, 0.0  ;;  %v1036_v25 = vpop.f32.mrb[6].mxu1  ;;  %v4437_v56 = vpack.c.bf16 %v1788_v1, %v1785_v62  ;;  %v4449_v62 = vpack.c.bf16 %v1806_v39, %v1803_v44  ;;  %v1916_v1 = vld [vmem:[#allocation10 + $0x758] sm:$0xff]  ;;  %v1930_v44 = vld [vmem:[#allocation10 + $0x7c8] sm:$0xff] }
 0x1f7   :  { %v5068_v20 = vadd.f32 %v1036_v25, %v684_v28  ;;  %v1038_v30 = vpop.f32.mrb[7].mxu1  ;;  %v4433_v28 = vpack.c.bf16 %v1782_v42, %v1779_v40  ;;  %v1845_v25 = vld [vmem:[#allocation10 + $0x520] sm:$0xff]  ;;  %v1944_v8 = vld [vmem:[#allocation10 + $0x838] sm:$0xff] }
 0x1f8   :  { %v5074_v34 = vadd.f32 %v1038_v30, %v688_v47  ;;  %2415 = vmatprep.mubr.f32.mxu0 %v1660_v23  ;;  %4426 = vmatpush3.bf16.msra.mxu1 %v4425_v14  ;;  %v1895_v47 = vld [vmem:[#allocation10 + $0x6b0] sm:$0xff]  ;;  %v1898_v14 = vld [vmem:[#allocation10 + $0x6c8] sm:$0xff]  ;;  %v4443_v30 = vpack.c.bf16 %v1848_v35, %v1845_v25  ;;  %v1913_v40 = vld [vmem:[#allocation10 + $0x740] sm:$0xff] }
 0x1f9   :  { %2416 = vmatmul.mubr.f32.vlgmr.msra.gmra.mrb[8].mxu0 %v1659_v29  ;;  %4428 = vmatprep.subr.bf16.mxu1 %v4427_v18  ;;  %v1671_v45 = vmax.f32 %v5068_v20, 0.0  ;;  %v4155_v6 = vpack.c.bf16 %v1895_v47, %v1892_v58  ;;  %v1791_v18 = vld [vmem:[#allocation10 + $0x370] sm:$0xff]  ;;  %v1909_v58 = vld [vmem:[#allocation10 + $0x720] sm:$0xff]  ;;  %v1912_v47 = vld [vmem:[#allocation10 + $0x738] sm:$0xff] }
 0x1fa   :  { %v1672_v43 = vmax.f32 %v5074_v34, 0.0  ;;  %4146 = vmatpush1.bf16.msra.mxu0 %v4145_v2  ;;  %v1897_v2 = vld [vmem:[#allocation10 + $0x6c0] sm:$0xff]  ;;  %v4169_v10 = vpack.c.bf16 %v1912_v47, %v1909_v58  ;;  %v1878_v58 = vld [vmem:[#allocation10 + $0x628] sm:$0xff]  ;;  %v1948_v34 = vld [vmem:[#allocation10 + $0x858] sm:$0xff] }
 0x1fb   :  { %4148 = vmatprep.subr.bf16.mxu0 %v4147_v31  ;;  %v1797_v31 = vld [vmem:[#allocation10 + $0x3a0] sm:$0xff]  ;;  %v4161_v33 = vpack.c.bf16 %v1900_v0, %v1897_v2  ;;  %v1818_v2 = vld [vmem:[#allocation10 + $0x448] sm:$0xff] }
 0x1fc   :  { %2421 = vmatprep.mubr.f32.mxu0 %v1672_v43  ;;  %4430 = vmatpush3.bf16.msra.mxu1 %v4429_v36  ;;  %v1851_v36 = vld [vmem:[#allocation10 + $0x550] sm:$0xff]  ;;  %v4445_v50 = vpack.c.bf16 %v1800_v32, %v1797_v31  ;;  %v1925_v25 = vld [vmem:[#allocation10 + $0x7a0] sm:$0xff]  ;;  %v1924_v31 = vld [vmem:[#allocation10 + $0x798] sm:$0xff] }
 0x1fd   :  { %2422 = vmatmul.mubr.f32.gmra.mrb[10].mxu0 %v1671_v45  ;;  %4432 = vmatprep.subr.bf16.mxu1 %v4431_v38  ;;  %v1950_v20 = vld [vmem:[#allocation10 + $0x868] sm:$0xff] }
 0x1fe   :  { %4150 = vmatpush1.bf16.msra.mxu0 %v4149_v4  ;;  %2492 = vmatprep.mubr.f32.mxu0 %v1662_v53  ;;  %v4447_v4 = vpack.c.bf16 %v1854_v55, %v1851_v36  ;;  %v1931_v36 = vld [vmem:[#allocation10 + $0x7d0] sm:$0xff] }
 0x1ff   :  { %2801 = vmatmul.mubr.f32.vlgmr.msra.gmra.mrb[16].mxu1 %v1657_v54  ;;  %4152 = vmatprep.subr.bf16.mxu0 %v4151_v46  ;;  %v4159_v54 = vpack.c.bf16 %v1901_v16, %v1898_v14  ;;  %v4165_v46 = vpack.c.bf16 %v1906_v37, %v1903_v15  ;;  %v1866_v14 = vld [vmem:[#allocation10 + $0x5c8] sm:$0xff]  ;;  %v1824_v15 = vld [vmem:[#allocation10 + $0x478] sm:$0xff] }
 0x200   :  { %2805 = vmatprep.mubr.f32.mxu1 %v1670_v7  ;;  %4434 = vmatpush3.bf16.msra.mxu1 %v4433_v28  ;;  %v4441_v7 = vpack.c.bf16 %v1794_v57, %v1791_v18  ;;  %v5097_v38 = vpop.f32.mrb[4].mxu0  ;;  %v1918_v18 = vld [vmem:[#allocation10 + $0x768] sm:$0xff] }
 0x201   :  { %4436 = vmatprep.subr.bf16.mxu1 %v4435_v59  ;;  %v5099_v42 = vpop.f32.mrb[5].mxu0 }
 0x202   :  { %4154 = vmatpush1.bf16.msra.mxu0 %v4153_v12  ;;  %v1919_v12 = vld [vmem:[#allocation10 + $0x770] sm:$0xff] }
 0x203   :  { %2806 = vmatmul.mubr.f32.gmra.mrb[18].mxu1 %v1669_v11  ;;  %4156 = vmatprep.subr.bf16.mxu0 %v4155_v6  ;;  %v4163_v11 = vpack.c.bf16 %v1907_v27, %v1904_v26  ;;  %v1809_v6 = vld [vmem:[#allocation10 + $0x400] sm:$0xff]  ;;  %v4171_v16 = vpack.c.bf16 %v1919_v12, %v1916_v1  ;;  %v1872_v26 = vld [vmem:[#allocation10 + $0x5f8] sm:$0xff] }
 0x204   :  { %4438 = vmatpush3.bf16.msra.mxu1 %v4437_v56  ;;  %2875 = vmatprep.mubr.f32.mxu1 %v1660_v23  ;;  %v1910_v23 = vld [vmem:[#allocation10 + $0x728] sm:$0xff]  ;;  %v5101_v59 = vpop.f32.mrb[6].mxu0  ;;  %v1863_v56 = vld [vmem:[#allocation10 + $0x5b0] sm:$0xff]  ;;  %v4453_v57 = vpack.c.bf16 %v1812_v9, %v1809_v6  ;;  %v1932_v1 = vld [vmem:[#allocation10 + $0x7d8] sm:$0xff] }
 0x205   :  { %4440 = vmatprep.subr.bf16.mxu1 %v4439_v17  ;;  %v4167_v28 = vpack.c.bf16 %v1913_v40, %v1910_v23  ;;  %v5103_v3 = vpop.f32.mrb[7].mxu0  ;;  %v1915_v17 = vld [vmem:[#allocation10 + $0x750] sm:$0xff]  ;;  %v4455_v35 = vpack.c.bf16 %v1866_v14, %v1863_v56  ;;  %v1926_v23 = vld [vmem:[#allocation10 + $0x7a8] sm:$0xff]  ;;  %v1936_v6 = vld [vmem:[#allocation10 + $0x7f8] sm:$0xff] }
 0x206   :  { %4158 = vmatpush1.bf16.msra.mxu0 %v4157_v22  ;;  %v1922_v22 = vld [vmem:[#allocation10 + $0x788] sm:$0xff]  ;;  %v4173_v0 = vpack.c.bf16 %v1918_v18, %v1915_v17  ;;  %v1943_v56 = vld [vmem:[#allocation10 + $0x830] sm:$0xff]  ;;  %v1884_v17 = vld [vmem:[#allocation10 + $0x658] sm:$0xff] }
 0x207   :  { %4160 = vmatprep.subr.bf16.mxu0 %v4159_v54  ;;  %v1815_v54 = vld [vmem:[#allocation10 + $0x430] sm:$0xff]  ;;  %v4175_v27 = vpack.c.bf16 %v1925_v25, %v1922_v22  ;;  %v1938_v22 = vld [vmem:[#allocation10 + $0x808] sm:$0xff] }
 0x208   :  { %4442 = vmatpush3.bf16.msra.mxu1 %v4441_v7  ;;  %v1869_v7 = vld [vmem:[#allocation10 + $0x5e0] sm:$0xff]  ;;  %v4457_v32 = vpack.c.bf16 %v1818_v2, %v1815_v54  ;;  %v1942_v54 = vld [vmem:[#allocation10 + $0x828] sm:$0xff] }
 0x209   :  { %4444 = vmatprep.subr.bf16.mxu1 %v4443_v30  ;;  %v1921_v30 = vld [vmem:[#allocation10 + $0x780] sm:$0xff]  ;;  %v4459_v55 = vpack.c.bf16 %v1872_v26, %v1869_v7 }
 0x20a   :  { %4162 = vmatpush1.bf16.msra.mxu0 %v4161_v33  ;;  %v1928_v33 = vld [vmem:[#allocation10 + $0x7b8] sm:$0xff]  ;;  %v4177_v37 = vpack.c.bf16 %v1924_v31, %v1921_v30  ;;  %v1949_v7 = vld [vmem:[#allocation10 + $0x860] sm:$0xff]  ;;  %v1890_v30 = vld [vmem:[#allocation10 + $0x688] sm:$0xff] }
 0x20b   :  { %4164 = vmatprep.subr.bf16.mxu0 %v4163_v11  ;;  %v1821_v11 = vld [vmem:[#allocation10 + $0x460] sm:$0xff]  ;;  %v4179_v40 = vpack.c.bf16 %v1931_v36, %v1928_v33  ;;  %v1952_v36 = vld [vmem:[#allocation10 + $0x878] sm:$0xff] }
 0x20c   :  { %4446 = vmatpush3.bf16.msra.mxu1 %v4445_v50  ;;  %v1923_v50 = vld [vmem:[#allocation10 + $0x790] sm:$0xff]  ;;  %v4461_v39 = vpack.c.bf16 %v1824_v15, %v1821_v11  ;;  %v1945_v33 = vld [vmem:[#allocation10 + $0x840] sm:$0xff] }
 0x20d   :  { %4448 = vmatprep.subr.bf16.mxu1 %v4447_v4  ;;  %v1927_v4 = vld [vmem:[#allocation10 + $0x7b0] sm:$0xff]  ;;  %v4463_v51 = vpack.c.bf16 %v1926_v23, %v1923_v50  ;;  %v1893_v15 = vld [vmem:[#allocation10 + $0x6a0] sm:$0xff]  ;;  %v4193_v50 = vpack.c.bf16 %v1948_v34, %v1945_v33 }
 0x20e   :  { %4166 = vmatpush1.bf16.msra.mxu0 %v4165_v46  ;;  %v1934_v46 = vld [vmem:[#allocation10 + $0x7e8] sm:$0xff]  ;;  %v4181_v47 = vpack.c.bf16 %v1930_v44, %v1927_v4  ;;  %v1947_v23 = vld [vmem:[#allocation10 + $0x850] sm:$0xff]  ;;  %v1969_v34 = vld [vmem:[#allocation10 + $0x900] sm:$0xff] }
 0x20f   :  { %4168 = vmatprep.subr.bf16.mxu0 %v4167_v28  ;;  %v1875_v28 = vld [vmem:[#allocation10 + $0x610] sm:$0xff]  ;;  %v4183_v12 = vpack.c.bf16 %v1937_v49, %v1934_v46  ;;  %v1954_v4 = vld [vmem:[#allocation10 + $0x888] sm:$0xff] }
 0x210   :  { %4450 = vmatpush3.bf16.msra.mxu1 %v4449_v62  ;;  %v1929_v62 = vld [vmem:[#allocation10 + $0x7c0] sm:$0xff]  ;;  %v4465_v9 = vpack.c.bf16 %v1878_v58, %v1875_v28  ;;  %v1899_v46 = vld [vmem:[#allocation10 + $0x6d0] sm:$0xff]  ;;  %v1902_v49 = vld [vmem:[#allocation10 + $0x6e8] sm:$0xff] }
 0x211   :  { %4452 = vmatprep.subr.bf16.mxu1 %v4451_v41  ;;  %v1933_v41 = vld [vmem:[#allocation10 + $0x7e0] sm:$0xff]  ;;  %v4467_v14 = vpack.c.bf16 %v1932_v1, %v1929_v62  ;;  %v1956_v58 = vld [vmem:[#allocation10 + $0x898] sm:$0xff] }
 0x212   :  { %4170 = vmatpush1.bf16.msra.mxu0 %v4169_v10  ;;  %v1940_v10 = vld [vmem:[#allocation10 + $0x818] sm:$0xff]  ;;  %v4185_v18 = vpack.c.bf16 %v1936_v6, %v1933_v41  ;;  %v1953_v28 = vld [vmem:[#allocation10 + $0x880] sm:$0xff]  ;;  %v4481_v41 = vpack.c.bf16 %v1902_v49, %v1899_v46 }
 0x213   :  { %4172 = vmatprep.subr.bf16.mxu0 %v4171_v16  ;;  %v1881_v16 = vld [vmem:[#allocation10 + $0x640] sm:$0xff]  ;;  %v4187_v25 = vpack.c.bf16 %v1943_v56, %v1940_v10  ;;  %v1964_v6 = vld [vmem:[#allocation10 + $0x8d8] sm:$0xff]  ;;  %v4483_v10 = vpack.c.bf16 %v1956_v58, %v1953_v28  ;;  %v1974_v28 = vld [vmem:[#allocation10 + $0x928] sm:$0xff] }
 0x214   :  { %4454 = vmatpush3.bf16.msra.mxu1 %v4453_v57  ;;  %v1935_v57 = vld [vmem:[#allocation10 + $0x7f0] sm:$0xff]  ;;  %v4469_v2 = vpack.c.bf16 %v1884_v17, %v1881_v16  ;;  %v1957_v1 = vld [vmem:[#allocation10 + $0x8a0] sm:$0xff] }
 0x215   :  { %4456 = vmatprep.subr.bf16.mxu1 %v4455_v35  ;;  %v1939_v35 = vld [vmem:[#allocation10 + $0x810] sm:$0xff]  ;;  %v4471_v26 = vpack.c.bf16 %v1938_v22, %v1935_v57  ;;  %v1905_v56 = vld [vmem:[#allocation10 + $0x700] sm:$0xff] }
 0x216   :  { %4174 = vmatpush1.bf16.msra.mxu0 %v4173_v0  ;;  %v1946_v0 = vld [vmem:[#allocation10 + $0x848] sm:$0xff]  ;;  %v4189_v31 = vpack.c.bf16 %v1942_v54, %v1939_v35  ;;  %v1959_v17 = vld [vmem:[#allocation10 + $0x8b0] sm:$0xff]  ;;  %v1985_v46 = vld [vmem:[#allocation10 + $0x980] sm:$0xff] }
 0x217   :  { %4176 = vmatprep.subr.bf16.mxu0 %v4175_v27  ;;  %v1887_v27 = vld [vmem:[#allocation10 + $0x670] sm:$0xff]  ;;  %v1966_v54 = vld [vmem:[#allocation10 + $0x8e8] sm:$0xff] }
 0x218   :  { %4458 = vmatpush3.bf16.msra.mxu1 %v4457_v32  ;;  %v1941_v32 = vld [vmem:[#allocation10 + $0x820] sm:$0xff]  ;;  %v5114_v57 = vld [vmem:[#allocation9] sm:$0xff] }
 0x219   :  { %4460 = vmatprep.subr.bf16.mxu1 %v4459_v55  ;;  %v1955_v55 = vld [vmem:[#allocation10 + $0x890] sm:$0xff]  ;;  %v4475_v11 = vpack.c.bf16 %v1944_v8, %v1941_v32  ;;  %v1965_v32 = vld [vmem:[#allocation10 + $0x8e0] sm:$0xff]  ;;  %v1968_v8 = vld [vmem:[#allocation10 + $0x8f8] sm:$0xff] }
 0x21a   :  { %4178 = vmatpush1.bf16.msra.mxu0 %v4177_v37  ;;  %v1896_v37 = vld [vmem:[#allocation10 + $0x6b8] sm:$0xff]  ;;  %v1963_v35 = vld [vmem:[#allocation10 + $0x8d0] sm:$0xff] }
 0x21b   :  { %4180 = vmatprep.subr.bf16.mxu0 %v4179_v40  ;;  %v1951_v40 = vld [vmem:[#allocation10 + $0x870] sm:$0xff]  ;;  %v4477_v44 = vpack.c.bf16 %v1896_v37, %v1893_v15  ;;  %v4491_v37 = vpack.c.bf16 %v1968_v8, %v1965_v32  ;;  %v2037_v32 = vld [vmem:[#allocation10 + $0xb20] sm:$0xff]  ;;  %v2040_v8 = vld [vmem:[#allocation10 + $0xb38] sm:$0xff] }
 0x21c   :  { %4462 = vmatpush3.bf16.msra.mxu1 %v4461_v39  ;;  %v1958_v39 = vld [vmem:[#allocation10 + $0x8a8] sm:$0xff]  ;;  %v1979_v15 = vld [vmem:[#allocation10 + $0x950] sm:$0xff] }
 0x21d   :  { %4464 = vmatprep.subr.bf16.mxu1 %v4463_v51  ;;  %v4197_v51 = vpack.c.bf16 %v1954_v4, %v1951_v40  ;;  %v4199_v62 = vpack.c.bf16 %v1961_v61, %v1958_v39  ;;  %v2022_v40 = vld [vmem:[#allocation10 + $0xaa8] sm:$0xff]  ;;  %v1975_v39 = vld [vmem:[#allocation10 + $0x930] sm:$0xff] }
 0x21e   :  { %4182 = vmatpush1.bf16.msra.mxu0 %v4181_v47  ;;  %v691_v47 = vsub.s32 4, %v4999_v13  ;;  %v1978_v61 = vld [vmem:[#allocation10 + $0x948] sm:$0xff] }
 0x21f   :  { %2876 = vmatmul.mubr.f32.vlgmr.msra.gmra.mrb[20].mxu1 %v1659_v29  ;;  %4184 = vmatprep.subr.bf16.mxu0 %v4183_v12  ;;  %v4191_v29 = vpack.c.bf16 %v1949_v7, %v1946_v0  ;;  %v1960_v12 = vld [vmem:[#allocation10 + $0x8b8] sm:$0xff]  ;;  %v1970_v0 = vld [vmem:[#allocation10 + $0x908] sm:$0xff]  ;;  %v1973_v7 = vld [vmem:[#allocation10 + $0x920] sm:$0xff]  ;;  %v4213_v58 = vpack.c.bf16 %v1978_v61, %v1975_v39 }
 0x220   :  { %2880 = vmatprep.mubr.f32.mxu1 %v1672_v43  ;;  %4466 = vmatpush3.bf16.msra.mxu1 %v4465_v9  ;;  %v4473_v43 = vpack.c.bf16 %v1890_v30, %v1887_v27  ;;  %v1967_v9 = vld [vmem:[#allocation10 + $0x8f0] sm:$0xff]  ;;  %v4201_v16 = vpack.c.bf16 %v1960_v12, %v1957_v1  ;;  %v692_v22 = vrot.slane %v5114_v57, %v691_v47  ;;  %v1914_v30 = vld [vmem:[#allocation10 + $0x748] sm:$0xff]  ;;  %v2025_v47 = vld [vmem:[#allocation10 + $0xac0] sm:$0xff] }
 0x221   :  { %4468 = vmatprep.subr.bf16.mxu1 %v4467_v14  ;;  %v1908_v14 = vld [vmem:[#allocation10 + $0x718] sm:$0xff]  ;;  %v1911_v27 = vld [vmem:[#allocation10 + $0x730] sm:$0xff]  ;;  %v4207_v33 = vpack.c.bf16 %v1973_v7, %v1970_v0  ;;  %v1981_v12 = vld [vmem:[#allocation10 + $0x960] sm:$0xff] }
 0x222   :  { %4186 = vmatpush1.bf16.msra.mxu0 %v4185_v18  ;;  %v1962_v18 = vld [vmem:[#allocation10 + $0x8c8] sm:$0xff]  ;;  %v4601_v4 = vadd.f32 %v5037_v52, %v692_v22  ;;  %v1997_v7 = vld [vmem:[#allocation10 + $0x9e0] sm:$0xff] }
 0x223   :  { %2881 = vmatmul.mubr.f32.gmra.mrb[22].mxu1 %v1671_v45  ;;  %4188 = vmatprep.subr.bf16.mxu0 %v4187_v25  ;;  %v4195_v45 = vpack.c.bf16 %v1955_v55, %v1952_v36  ;;  %v4203_v25 = vpack.c.bf16 %v1967_v9, %v1964_v6  ;;  %v4602_v36 = vadd.f32 %v5039_v24, %v5062_v63  ;;  %v1988_v9 = vld [vmem:[#allocation10 + $0x998] sm:$0xff]  ;;  %v1994_v0 = vld [vmem:[#allocation10 + $0x9c8] sm:$0xff]  ;;  %v2009_v39 = vld [vmem:[#allocation10 + $0xa40] sm:$0xff] }
 0x224   :  { %4470 = vmatpush3.bf16.msra.mxu1 %v4469_v2  ;;  %2950 = vmatprep.mubr.f32.mxu1 %v1662_v53  ;;  %v4479_v53 = vpack.c.bf16 %v1950_v20, %v1947_v23  ;;  %v4485_v2 = vpack.c.bf16 %v1908_v14, %v1905_v56  ;;  %v4489_v55 = vpack.c.bf16 %v1914_v30, %v1911_v27  ;;  %v1920_v23 = vld [vmem:[#allocation10 + $0x778] sm:$0xff]  ;;  %v1673_v52 = vmax.f32 %v4601_v4, 0.0  ;;  %v1977_v14 = vld [vmem:[#allocation10 + $0x940] sm:$0xff]  ;;  %v1983_v27 = vld [vmem:[#allocation10 + $0x970] sm:$0xff] }
 0x225   :  { %4472 = vmatprep.subr.bf16.mxu1 %v4471_v26  ;;  %v4487_v26 = vpack.c.bf16 %v1962_v18, %v1959_v17  ;;  %v1674_v24 = vmax.f32 %v4602_v36, 0.0  ;;  %v2031_v18 = vld [vmem:[#allocation10 + $0xaf0] sm:$0xff]  ;;  %v1986_v30 = vld [vmem:[#allocation10 + $0x988] sm:$0xff]  ;;  %v2000_v36 = vld [vmem:[#allocation10 + $0x9f8] sm:$0xff] }
 0x226   :  { %4190 = vmatpush1.bf16.msra.mxu0 %v4189_v31  ;;  %v4205_v31 = vpack.c.bf16 %v1966_v54, %v1963_v35  ;;  %v1987_v35 = vld [vmem:[#allocation10 + $0x990] sm:$0xff]  ;;  %v1990_v54 = vld [vmem:[#allocation10 + $0x9a8] sm:$0xff] }
 0x227   :  { %4192 = vmatprep.subr.bf16.mxu0 %v4191_v29  ;;  %v4599_v29 = vadd.f32 %v5033_v60, %v692_v22  ;;  %v2034_v22 = vld [vmem:[#allocation10 + $0xb08] sm:$0xff] }
 0x228   :  { %4474 = vmatpush3.bf16.msra.mxu1 %v4473_v43  ;;  %v1972_v43 = vld [vmem:[#allocation10 + $0x918] sm:$0xff] }
 0x229   :  { %4476 = vmatprep.subr.bf16.mxu1 %v4475_v11  ;;  %v1976_v11 = vld [vmem:[#allocation10 + $0x938] sm:$0xff]  ;;  %v4209_v20 = vpack.c.bf16 %v1972_v43, %v1969_v34  ;;  %v1661_v60 = vmax.f32 %v4599_v29, 0.0  ;;  %v4223_v29 = vpack.c.bf16 %v1997_v7, %v1994_v0  ;;  %v4505_v43 = vpack.c.bf16 %v1986_v30, %v1983_v27  ;;  %v2007_v0 = vld [vmem:[#allocation10 + $0xa30] sm:$0xff]  ;;  %v2010_v7 = vld [vmem:[#allocation10 + $0xa48] sm:$0xff] }
 0x22a   :  { %4194 = vmatpush1.bf16.msra.mxu0 %v4193_v50  ;;  %v1917_v50 = vld [vmem:[#allocation10 + $0x760] sm:$0xff]  ;;  %v1996_v34 = vld [vmem:[#allocation10 + $0x9d8] sm:$0xff] }
 0x22b   :  { %4196 = vmatprep.subr.bf16.mxu0 %v4195_v45  ;;  %v2019_v45 = vld [vmem:[#allocation10 + $0xa90] sm:$0xff]  ;;  %v4493_v63 = vpack.c.bf16 %v1920_v23, %v1917_v50  ;;  %v2061_v30 = vld [vmem:[#allocation10 + $0xbe0] sm:$0xff] }
 0x22c   :  { %4478 = vmatpush3.bf16.msra.mxu1 %v4477_v44  ;;  %v4211_v44 = vpack.c.bf16 %v1979_v15, %v1976_v11  ;;  %v4495_v49 = vpack.c.bf16 %v2022_v40, %v2019_v45  ;;  %v4507_v11 = vpack.c.bf16 %v2040_v8, %v2037_v32  ;;  %v1989_v15 = vld [vmem:[#allocation10 + $0x9a0] sm:$0xff]  ;;  %v2043_v23 = vld [vmem:[#allocation10 + $0xb50] sm:$0xff] }
 0x22d   :  { %4480 = vmatprep.subr.bf16.mxu1 %v4479_v53  ;;  %v1982_v53 = vld [vmem:[#allocation10 + $0x968] sm:$0xff]  ;;  %v1999_v40 = vld [vmem:[#allocation10 + $0x9f0] sm:$0xff] }
 0x22e   :  { %4198 = vmatpush1.bf16.msra.mxu0 %v4197_v51  ;;  %v1971_v51 = vld [vmem:[#allocation10 + $0x910] sm:$0xff]  ;;  %v4215_v1 = vpack.c.bf16 %v1985_v46, %v1982_v53  ;;  %v2049_v46 = vld [vmem:[#allocation10 + $0xb80] sm:$0xff] }
 0x22f   :  { %4200 = vmatprep.subr.bf16.mxu0 %v4199_v62  ;;  %v2028_v62 = vld [vmem:[#allocation10 + $0xad8] sm:$0xff]  ;;  %v4497_v6 = vpack.c.bf16 %v1974_v28, %v1971_v51  ;;  %v2005_v28 = vld [vmem:[#allocation10 + $0xa20] sm:$0xff] }
 0x230   :  { %4482 = vmatpush3.bf16.msra.mxu1 %v4481_v41  ;;  %v1984_v41 = vld [vmem:[#allocation10 + $0x978] sm:$0xff]  ;;  %v4499_v56 = vpack.c.bf16 %v2028_v62, %v2025_v47  ;;  %v703_v62 = vsub.s32 7, %v4999_v13 }
 0x231   :  { %4484 = vmatprep.subr.bf16.mxu1 %v4483_v10  ;;  %v1991_v10 = vld [vmem:[#allocation10 + $0x9b0] sm:$0xff]  ;;  %v4217_v17 = vpack.c.bf16 %v1984_v41, %v1981_v12  ;;  %v2001_v41 = vld [vmem:[#allocation10 + $0xa00] sm:$0xff] }
 0x232   :  { %4202 = vmatpush1.bf16.msra.mxu0 %v4201_v16  ;;  %v1980_v16 = vld [vmem:[#allocation10 + $0x958] sm:$0xff] }
 0x233   :  { %4204 = vmatprep.subr.bf16.mxu0 %v4203_v25  ;;  %v4219_v25 = vpack.c.bf16 %v1991_v10, %v1988_v9  ;;  %v2055_v10 = vld [vmem:[#allocation10 + $0xbb0] sm:$0xff] }
 0x234   :  { %4486 = vmatpush3.bf16.msra.mxu1 %v4485_v2  ;;  %v4501_v2 = vpack.c.bf16 %v1980_v16, %v1977_v14  ;;  %v2011_v16 = vld [vmem:[#allocation10 + $0xa50] sm:$0xff] }
 0x235   :  { %4488 = vmatprep.subr.bf16.mxu1 %v4487_v26  ;;  %v4503_v26 = vpack.c.bf16 %v2034_v22, %v2031_v18  ;;  %v704_v18 = vrot.slane %v5114_v57, %v703_v62 }
 0x236   :  { %4206 = vmatpush1.bf16.msra.mxu0 %v4205_v31  ;;  %v4221_v31 = vpack.c.bf16 %v1990_v54, %v1987_v35  ;;  %v2021_v35 = vld [vmem:[#allocation10 + $0xaa0] sm:$0xff]  ;;  %v699_v54 = vsub.s32 6, %v4999_v13 }
 0x237   :  { %4208 = vmatprep.subr.bf16.mxu0 %v4207_v33  ;;  %v1993_v33 = vld [vmem:[#allocation10 + $0x9c0] sm:$0xff] }
 0x238   :  { %4490 = vmatpush3.bf16.msra.mxu1 %v4489_v55  ;;  %v2003_v55 = vld [vmem:[#allocation10 + $0xa10] sm:$0xff]  ;;  %v4225_v50 = vpack.c.bf16 %v1996_v34, %v1993_v33  ;;  %v2020_v33 = vld [vmem:[#allocation10 + $0xa98] sm:$0xff] }
 0x239   :  { %2493 = vmatmul.mubr.f32.vlgmr.msra.gmra.mrb[8].mxu0 %v1661_v60  ;;  %4492 = vmatprep.subr.bf16.mxu1 %v4491_v37  ;;  %v1992_v37 = vld [vmem:[#allocation10 + $0x9b8] sm:$0xff]  ;;  %v4227_v45 = vpack.c.bf16 %v2003_v55, %v2000_v36  ;;  %v2027_v55 = vld [vmem:[#allocation10 + $0xad0] sm:$0xff] }
 0x23a   :  { %2498 = vmatprep.mubr.f32.mxu0 %v1674_v24  ;;  %4210 = vmatpush1.bf16.msra.mxu0 %v4209_v20  ;;  %v2046_v20 = vld [vmem:[#allocation10 + $0xb68] sm:$0xff]  ;;  %v4509_v4 = vpack.c.bf16 %v1992_v37, %v1989_v15  ;;  %v2024_v36 = vld [vmem:[#allocation10 + $0xab8] sm:$0xff]  ;;  %v2013_v37 = vld [vmem:[#allocation10 + $0xa60] sm:$0xff] }
 0x23b   :  { %4212 = vmatprep.subr.bf16.mxu0 %v4211_v44  ;;  %v2006_v44 = vld [vmem:[#allocation10 + $0xa28] sm:$0xff]  ;;  %v4511_v61 = vpack.c.bf16 %v2046_v20, %v2043_v23 }
 0x23c   :  { %4494 = vmatpush3.bf16.msra.mxu1 %v4493_v63  ;;  %v1998_v63 = vld [vmem:[#allocation10 + $0x9e8] sm:$0xff]  ;;  %v4231_v51 = vpack.c.bf16 %v2009_v39, %v2006_v44  ;;  %v4243_v44 = vpack.c.bf16 %v2027_v55, %v2024_v36  ;;  %v2133_v36 = vld [vmem:[#allocation10 + $0xe20] sm:$0xff]  ;;  %v2136_v55 = vld [vmem:[#allocation10 + $0xe38] sm:$0xff] }
 0x23d   :  { %2499 = vmatmul.mubr.f32.gmra.mrb[10].mxu0 %v1673_v52  ;;  %4496 = vmatprep.subr.bf16.mxu1 %v4495_v49  ;;  %v2052_v49 = vld [vmem:[#allocation10 + $0xb98] sm:$0xff] }
 0x23e   :  { %4214 = vmatpush1.bf16.msra.mxu0 %v4213_v58  ;;  %v2008_v58 = vld [vmem:[#allocation10 + $0xa38] sm:$0xff]  ;;  %v4515_v12 = vpack.c.bf16 %v2052_v49, %v2049_v46  ;;  %v2033_v46 = vld [vmem:[#allocation10 + $0xb00] sm:$0xff] }
 0x23f   :  { %2951 = vmatmul.mubr.f32.vlgmr.msra.gmra.mrb[24].mxu1 %v1661_v60  ;;  %4216 = vmatprep.subr.bf16.mxu0 %v4215_v1  ;;  %v2002_v60 = vld [vmem:[#allocation10 + $0xa08] sm:$0xff]  ;;  %v2015_v1 = vld [vmem:[#allocation10 + $0xa70] sm:$0xff]  ;;  %v4233_v9 = vpack.c.bf16 %v2008_v58, %v2005_v28 }
 0x240   :  { %2955 = vmatprep.mubr.f32.mxu1 %v1674_v24  ;;  %4498 = vmatpush3.bf16.msra.mxu1 %v4497_v6  ;;  %v1995_v24 = vld [vmem:[#allocation10 + $0x9d0] sm:$0xff]  ;;  %v4229_v53 = vpack.c.bf16 %v2002_v60, %v1999_v40  ;;  %v2004_v6 = vld [vmem:[#allocation10 + $0xa18] sm:$0xff]  ;;  %v2118_v60 = vld [vmem:[#allocation10 + $0xda8] sm:$0xff] }
 0x241   :  { %4500 = vmatprep.subr.bf16.mxu1 %v4499_v56  ;;  %v4513_v47 = vpack.c.bf16 %v1998_v63, %v1995_v24  ;;  %v2058_v56 = vld [vmem:[#allocation10 + $0xbc8] sm:$0xff]  ;;  %v4517_v22 = vpack.c.bf16 %v2004_v6, %v2001_v41  ;;  %v2115_v40 = vld [vmem:[#allocation10 + $0xd90] sm:$0xff]  ;;  %v2029_v6 = vld [vmem:[#allocation10 + $0xae0] sm:$0xff] }
 0x242   :  { %4218 = vmatpush1.bf16.msra.mxu0 %v4217_v17  ;;  %v2014_v17 = vld [vmem:[#allocation10 + $0xa68] sm:$0xff]  ;;  %v2067_v28 = vld [vmem:[#allocation10 + $0xc10] sm:$0xff] }
 0x243   :  { %2956 = vmatmul.mubr.f32.gmra.mrb[26].mxu1 %v1673_v52  ;;  %4220 = vmatprep.subr.bf16.mxu0 %v4219_v25  ;;  %v2012_v52 = vld [vmem:[#allocation10 + $0xa58] sm:$0xff]  ;;  %v2018_v25 = vld [vmem:[#allocation10 + $0xa88] sm:$0xff]  ;;  %v4237_v27 = vpack.c.bf16 %v2014_v17, %v2011_v16  ;;  %v2039_v16 = vld [vmem:[#allocation10 + $0xb30] sm:$0xff] }
 0x244   :  { %4502 = vmatpush3.bf16.msra.mxu1 %v4501_v2  ;;  %v4235_v14 = vpack.c.bf16 %v2015_v1, %v2012_v52  ;;  %v4519_v2 = vpack.c.bf16 %v2058_v56, %v2055_v10  ;;  %v4239_v8 = vpack.c.bf16 %v2021_v35, %v2018_v25  ;;  %v2026_v24 = vld [vmem:[#allocation10 + $0xac8] sm:$0xff]  ;;  %v2121_v52 = vld [vmem:[#allocation10 + $0xdc0] sm:$0xff]  ;;  %v2124_v1 = vld [vmem:[#allocation10 + $0xdd8] sm:$0xff] }
 0x245   :  { %4504 = vmatprep.subr.bf16.mxu1 %v4503_v26  ;;  %v2070_v58 = vld [vmem:[#allocation10 + $0xc28] sm:$0xff]  ;;  %v2076_v25 = vld [vmem:[#allocation10 + $0xc58] sm:$0xff] }
 0x246   :  { %4222 = vmatpush1.bf16.msra.mxu0 %v4221_v31  ;;  %v2064_v31 = vld [vmem:[#allocation10 + $0xbf8] sm:$0xff]  ;;  %v4529_v56 = vpack.c.bf16 %v2070_v58, %v2067_v28  ;;  %v2057_v28 = vld [vmem:[#allocation10 + $0xbc0] sm:$0xff] }
 0x247   :  { %4224 = vmatprep.subr.bf16.mxu0 %v4223_v29  ;;  %v2017_v29 = vld [vmem:[#allocation10 + $0xa80] sm:$0xff]  ;;  %v4523_v15 = vpack.c.bf16 %v2064_v31, %v2061_v30  ;;  %v2038_v30 = vld [vmem:[#allocation10 + $0xb28] sm:$0xff] }
 0x248   :  { %4506 = vmatpush3.bf16.msra.mxu1 %v4505_v43  ;;  %v4521_v43 = vpack.c.bf16 %v2010_v7, %v2007_v0  ;;  %v4241_v20 = vpack.c.bf16 %v2020_v33, %v2017_v29  ;;  %v2130_v0 = vld [vmem:[#allocation10 + $0xe08] sm:$0xff]  ;;  %v2079_v29 = vld [vmem:[#allocation10 + $0xc70] sm:$0xff] }
 0x249   :  { %4508 = vmatprep.subr.bf16.mxu1 %v4507_v11  ;;  %v700_v11 = vrot.slane %v5114_v57, %v699_v54  ;;  %v2082_v33 = vld [vmem:[#allocation10 + $0xc88] sm:$0xff] }
 0x24a   :  { %4226 = vmatpush1.bf16.msra.mxu0 %v4225_v50  ;;  %v2016_v50 = vld [vmem:[#allocation10 + $0xa78] sm:$0xff] }
 0x24b   :  { %4228 = vmatprep.subr.bf16.mxu0 %v4227_v45  ;;  %v4525_v57 = vpack.c.bf16 %v2016_v50, %v2013_v37  ;;  %v2044_v37 = vld [vmem:[#allocation10 + $0xb58] sm:$0xff]  ;;  %v4537_v50 = vpack.c.bf16 %v2082_v33, %v2079_v29  ;;  %v2069_v29 = vld [vmem:[#allocation10 + $0xc20] sm:$0xff] }
 0x24c   :  { %4510 = vmatpush3.bf16.msra.mxu1 %v4509_v4  ;;  %v5125_v4 = vld [vmem:[#allocation9 + $0x8] sm:$0xf] }
 0x24d   :  { %4512 = vmatprep.subr.bf16.mxu1 %v4511_v61  ;;  %v2023_v61 = vld [vmem:[#allocation10 + $0xab0] sm:$0xff] }
 0x24e   :  { %4230 = vmatpush1.bf16.msra.mxu0 %v4229_v53  ;;  %v2030_v53 = vld [vmem:[#allocation10 + $0xae8] sm:$0xff]  ;;  %v4245_v62 = vpack.c.bf16 %v2026_v24, %v2023_v61 }
 0x24f   :  { %4232 = vmatprep.subr.bf16.mxu0 %v4231_v51  ;;  %v4527_v51 = vpack.c.bf16 %v2118_v60, %v2115_v40  ;;  %v4247_v41 = vpack.c.bf16 %v2033_v46, %v2030_v53  ;;  %v2085_v40 = vld [vmem:[#allocation10 + $0xca0] sm:$0xff]  ;;  %v2088_v60 = vld [vmem:[#allocation10 + $0xcb8] sm:$0xff]  ;;  %v2142_v61 = vld [vmem:[#allocation10 + $0xe68] sm:$0xff] }
 0x250   :  { %4514 = vmatpush3.bf16.msra.mxu1 %v4513_v47  ;;  %v5133_v47 = vrot.slane %v5125_v4, %v5007_v21  ;;  %v2050_v53 = vld [vmem:[#allocation10 + $0xb88] sm:$0xff]  ;;  %v4541_v46 = vpack.c.bf16 %v2088_v60, %v2085_v40  ;;  %v2075_v40 = vld [vmem:[#allocation10 + $0xc50] sm:$0xff]  ;;  %v708_v60 = vrot.slane %v5125_v4, %v5002_v19 }
 0x251   :  { %4516 = vmatprep.subr.bf16.mxu1 %v4515_v12 }
 0x252   :  { %4234 = vmatpush1.bf16.msra.mxu0 %v4233_v9  ;;  %v1338_v26 = vpop.f32.mrb[8].mxu1  ;;  %v2032_v9 = vld [vmem:[#allocation10 + $0xaf8] sm:$0xff]  ;;  %v5141_v35 = vadd.f32 %v5099_v42, %v5133_v47  ;;  %v2042_v42 = vld [vmem:[#allocation10 + $0xb48] sm:$0xff] }
 0x253   :  { %v1340_v32 = vpop.f32.mrb[9].mxu1  ;;  %4236 = vmatprep.subr.bf16.mxu0 %v4235_v14  ;;  %v5129_v49 = vadd.f32 %v1338_v26, %v700_v11  ;;  %v2036_v14 = vld [vmem:[#allocation10 + $0xb18] sm:$0xff]  ;;  %v4249_v54 = vpack.c.bf16 %v2032_v9, %v2029_v6 }
 0x254   :  { %v4604_v34 = vadd.f32 %v1340_v32, %v704_v18  ;;  %4518 = vmatpush3.bf16.msra.mxu1 %v4517_v22  ;;  %v2073_v22 = vld [vmem:[#allocation10 + $0xc40] sm:$0xff]  ;;  %v4251_v26 = vpack.c.bf16 %v2039_v16, %v2036_v14  ;;  %v2148_v6 = vld [vmem:[#allocation10 + $0xe98] sm:$0xff] }
 0x255   :  { %4520 = vmatprep.subr.bf16.mxu1 %v4519_v2  ;;  %v1663_v17 = vmax.f32 %v5129_v49, 0.0  ;;  %v2127_v2 = vld [vmem:[#allocation10 + $0xdf0] sm:$0xff]  ;;  %v4533_v31 = vpack.c.bf16 %v2076_v25, %v2073_v22  ;;  %v2045_v32 = vld [vmem:[#allocation10 + $0xb60] sm:$0xff]  ;;  %v2056_v14 = vld [vmem:[#allocation10 + $0xbb8] sm:$0xff] }
 0x256   :  { %v1664_v23 = vmax.f32 %v4604_v34, 0.0  ;;  %4238 = vmatpush1.bf16.msra.mxu0 %v4237_v27  ;;  %v1344_v45 = vpop.f32.mrb[10].mxu1  ;;  %v2035_v27 = vld [vmem:[#allocation10 + $0xb10] sm:$0xff]  ;;  %v1666_v34 = vmax.f32 %v5141_v35, 0.0  ;;  %v2080_v49 = vld [vmem:[#allocation10 + $0xc78] sm:$0xff] }
 0x257   :  { %4240 = vmatprep.subr.bf16.mxu0 %v4239_v8  ;;  %v1346_v39 = vpop.f32.mrb[11].mxu1  ;;  %v5135_v12 = vadd.f32 %v1344_v45, %v700_v11  ;;  %v4535_v8 = vpack.c.bf16 %v2130_v0, %v2127_v2  ;;  %v4255_v11 = vpack.c.bf16 %v2045_v32, %v2042_v42  ;;  %v4539_v45 = vpack.c.bf16 %v2136_v55, %v2133_v36  ;;  %v2063_v22 = vld [vmem:[#allocation10 + $0xbf0] sm:$0xff]  ;;  %v2100_v2 = vld [vmem:[#allocation10 + $0xd18] sm:$0xff]  ;;  %v2062_v42 = vld [vmem:[#allocation10 + $0xbe8] sm:$0xff] }
 0x258   :  { %2569 = vmatprep.mubr.f32.mxu0 %v1664_v23  ;;  %4522 = vmatpush3.bf16.msra.mxu1 %v4521_v43  ;;  %v5127_v63 = vadd.f32 %v1346_v39, %v704_v18  ;;  %v4531_v18 = vpack.c.bf16 %v2124_v1, %v2121_v52  ;;  %v4253_v43 = vpack.c.bf16 %v2038_v30, %v2035_v27  ;;  %v2139_v39 = vld [vmem:[#allocation10 + $0xe50] sm:$0xff]  ;;  %v2094_v52 = vld [vmem:[#allocation10 + $0xce8] sm:$0xff] }
 0x259   :  { %3025 = vmatprep.mubr.f32.mxu1 %v1664_v23  ;;  %4524 = vmatprep.subr.bf16.mxu1 %v4523_v15  ;;  %v1675_v7 = vmax.f32 %v5135_v12, 0.0  ;;  %v2041_v15 = vld [vmem:[#allocation10 + $0xb40] sm:$0xff]  ;;  %v2048_v23 = vld [vmem:[#allocation10 + $0xb78] sm:$0xff]  ;;  %v4543_v58 = vpack.c.bf16 %v2142_v61, %v2139_v39  ;;  %v2154_v27 = vld [vmem:[#allocation10 + $0xec8] sm:$0xff] }
 0x25a   :  { %4242 = vmatpush1.bf16.msra.mxu0 %v4241_v20  ;;  %v1676_v10 = vmax.f32 %v5127_v63, 0.0  ;;  %v2051_v20 = vld [vmem:[#allocation10 + $0xb90] sm:$0xff]  ;;  %v2106_v36 = vld [vmem:[#allocation10 + $0xd48] sm:$0xff]  ;;  %v2109_v39 = vld [vmem:[#allocation10 + $0xd60] sm:$0xff] }
 0x25b   :  { %4244 = vmatprep.subr.bf16.mxu0 %v4243_v44  ;;  %v4257_v44 = vpack.c.bf16 %v2044_v37, %v2041_v15  ;;  %v4259_v24 = vpack.c.bf16 %v2051_v20, %v2048_v23  ;;  %v2160_v15 = vld [vmem:[#allocation10 + $0xef8] sm:$0xff]  ;;  %v2083_v12 = vld [vmem:[#allocation10 + $0xc90] sm:$0xff] }
 0x25c   :  { %4526 = vmatpush3.bf16.msra.mxu1 %v4525_v57  ;;  %v2047_v57 = vld [vmem:[#allocation10 + $0xb70] sm:$0xff]  ;;  %v2068_v23 = vld [vmem:[#allocation10 + $0xc18] sm:$0xff] }
 0x25d   :  { %4528 = vmatprep.subr.bf16.mxu1 %v4527_v51  ;;  %v2054_v51 = vld [vmem:[#allocation10 + $0xba8] sm:$0xff]  ;;  %v4261_v1 = vpack.c.bf16 %v2050_v53, %v2047_v57  ;;  %v2112_v61 = vld [vmem:[#allocation10 + $0xd78] sm:$0xff]  ;;  %v2211_v57 = vld [vmem:[#allocation10 + $0x1090] sm:$0xff] }
 0x25e   :  { %4246 = vmatpush1.bf16.msra.mxu0 %v4245_v62  ;;  %v2091_v62 = vld [vmem:[#allocation10 + $0xcd0] sm:$0xff]  ;;  %v4263_v9 = vpack.c.bf16 %v2057_v28, %v2054_v51  ;;  %v2214_v53 = vld [vmem:[#allocation10 + $0x10a8] sm:$0xff] }
 0x25f   :  { %3026 = vmatmul.mubr.f32.vlgmr.msra.gmra.mrb[28].mxu1 %v1663_v17  ;;  %4248 = vmatprep.subr.bf16.mxu0 %v4247_v41  ;;  %v2145_v41 = vld [vmem:[#allocation10 + $0xe80] sm:$0xff]  ;;  %v4545_v16 = vpack.c.bf16 %v2094_v52, %v2091_v62  ;;  %v2071_v51 = vld [vmem:[#allocation10 + $0xc30] sm:$0xff]  ;;  %v2074_v28 = vld [vmem:[#allocation10 + $0xc48] sm:$0xff] }
 0x260   :  { %4530 = vmatpush3.bf16.msra.mxu1 %v4529_v56  ;;  %3030 = vmatprep.mubr.f32.mxu1 %v1676_v10  ;;  %v2053_v56 = vld [vmem:[#allocation10 + $0xba0] sm:$0xff]  ;;  %v4547_v25 = vpack.c.bf16 %v2148_v6, %v2145_v41  ;;  %v2078_v62 = vld [vmem:[#allocation10 + $0xc68] sm:$0xff]  ;;  %v4559_v41 = vpack.c.bf16 %v2214_v53, %v2211_v57  ;;  %v2163_v6 = vld [vmem:[#allocation10 + $0xf10] sm:$0xff] }
 0x261   :  { %4532 = vmatprep.subr.bf16.mxu1 %v4531_v18  ;;  %v2060_v18 = vld [vmem:[#allocation10 + $0xbd8] sm:$0xff]  ;;  %v4265_v0 = vpack.c.bf16 %v2056_v14, %v2053_v56  ;;  %v2081_v52 = vld [vmem:[#allocation10 + $0xc80] sm:$0xff]  ;;  %v5162_v56 = vadd.f32 %v5103_v3, %v5133_v47  ;;  %v4277_v14 = vpack.c.bf16 %v2074_v28, %v2071_v51  ;;  %v5168_v3 = vadd.f32 %v5101_v59, %v708_v60  ;;  %v2098_v57 = vld [vmem:[#allocation10 + $0xd08] sm:$0xff] }
 0x262   :  { %4250 = vmatpush1.bf16.msra.mxu0 %v4249_v54  ;;  %v2097_v54 = vld [vmem:[#allocation10 + $0xd00] sm:$0xff]  ;;  %v4267_v30 = vpack.c.bf16 %v2063_v22, %v2060_v18  ;;  %v2220_v18 = vld [vmem:[#allocation10 + $0x10d8] sm:$0xff]  ;;  %v2102_v53 = vld [vmem:[#allocation10 + $0xd28] sm:$0xff] }
 0x263   :  { %3031 = vmatmul.mubr.f32.gmra.mrb[30].mxu1 %v1675_v7  ;;  %4252 = vmatprep.subr.bf16.mxu0 %v4251_v26  ;;  %v2151_v26 = vld [vmem:[#allocation10 + $0xeb0] sm:$0xff]  ;;  %v4549_v32 = vpack.c.bf16 %v2100_v2, %v2097_v54  ;;  %v2077_v22 = vld [vmem:[#allocation10 + $0xc60] sm:$0xff]  ;;  %v1677_v35 = vmax.f32 %v5168_v3, 0.0  ;;  %v2192_v3 = vld [vmem:[#allocation10 + $0xff8] sm:$0xff] }
 0x264   :  { %4534 = vmatpush3.bf16.msra.mxu1 %v4533_v31  ;;  %3100 = vmatprep.mubr.f32.mxu1 %v1666_v34  ;;  %v2059_v31 = vld [vmem:[#allocation10 + $0xbd0] sm:$0xff]  ;;  %v4551_v33 = vpack.c.bf16 %v2154_v27, %v2151_v26  ;;  %v2169_v47 = vld [vmem:[#allocation10 + $0xf40] sm:$0xff]  ;;  %v4281_v26 = vpack.c.bf16 %v2080_v49, %v2077_v22 }
 0x265   :  { %4536 = vmatprep.subr.bf16.mxu1 %v4535_v8  ;;  %v2066_v8 = vld [vmem:[#allocation10 + $0xc08] sm:$0xff]  ;;  %v4269_v55 = vpack.c.bf16 %v2062_v42, %v2059_v31  ;;  %v2223_v27 = vld [vmem:[#allocation10 + $0x10f0] sm:$0xff]  ;;  %v2093_v42 = vld [vmem:[#allocation10 + $0xce0] sm:$0xff] }
 0x266   :  { %4254 = vmatpush1.bf16.msra.mxu0 %v4253_v43  ;;  %v2103_v43 = vld [vmem:[#allocation10 + $0xd30] sm:$0xff]  ;;  %v4271_v37 = vpack.c.bf16 %v2069_v29, %v2066_v8  ;;  %v2090_v31 = vld [vmem:[#allocation10 + $0xcc8] sm:$0xff] }
 0x267   :  { %4256 = vmatprep.subr.bf16.mxu0 %v4255_v11  ;;  %v2157_v11 = vld [vmem:[#allocation10 + $0xee0] sm:$0xff]  ;;  %v4553_v20 = vpack.c.bf16 %v2106_v36, %v2103_v43  ;;  %v2175_v8 = vld [vmem:[#allocation10 + $0xf70] sm:$0xff]  ;;  %v2178_v29 = vld [vmem:[#allocation10 + $0xf88] sm:$0xff] }
 0x268   :  { %4538 = vmatpush3.bf16.msra.mxu1 %v4537_v50  ;;  %v2065_v50 = vld [vmem:[#allocation10 + $0xc00] sm:$0xff]  ;;  %v2232_v36 = vld [vmem:[#allocation10 + $0x1138] sm:$0xff] }
 0x269   :  { %4540 = vmatprep.subr.bf16.mxu1 %v4539_v45  ;;  %v2072_v45 = vld [vmem:[#allocation10 + $0xc38] sm:$0xff]  ;;  %v2229_v43 = vld [vmem:[#allocation10 + $0x1120] sm:$0xff] }
 0x26a   :  { %4258 = vmatpush1.bf16.msra.mxu0 %v4257_v44  ;;  %v4555_v44 = vpack.c.bf16 %v2160_v15, %v2157_v11  ;;  %v2089_v11 = vld [vmem:[#allocation10 + $0xcc0] sm:$0xff]  ;;  %v2092_v15 = vld [vmem:[#allocation10 + $0xcd8] sm:$0xff] }
 0x26b   :  { %4260 = vmatprep.subr.bf16.mxu0 %v4259_v24  ;;  %v4273_v24 = vpack.c.bf16 %v2068_v23, %v2065_v50  ;;  %v2099_v50 = vld [vmem:[#allocation10 + $0xd10] sm:$0xff]  ;;  %v4569_v23 = vpack.c.bf16 %v2178_v29, %v2175_v8  ;;  %v2256_v8 = vld [vmem:[#allocation10 + $0x11f8] sm:$0xff] }
 0x26c   :  { %4542 = vmatpush3.bf16.msra.mxu1 %v4541_v46  ;;  %v4275_v46 = vpack.c.bf16 %v2075_v40, %v2072_v45  ;;  %v2181_v45 = vld [vmem:[#allocation10 + $0xfa0] sm:$0xff]  ;;  %v2184_v40 = vld [vmem:[#allocation10 + $0xfb8] sm:$0xff] }
 0x26d   :  { %4544 = vmatprep.subr.bf16.mxu1 %v4543_v58  ;;  %v4557_v58 = vpack.c.bf16 %v2112_v61, %v2109_v39  ;;  %v2238_v39 = vld [vmem:[#allocation10 + $0x1168] sm:$0xff]  ;;  %v4573_v51 = vpack.c.bf16 %v2184_v40, %v2181_v45  ;;  %v2119_v45 = vld [vmem:[#allocation10 + $0xdb0] sm:$0xff] }
 0x26e   :  { %4262 = vmatpush1.bf16.msra.mxu0 %v4261_v1  ;;  %v5156_v1 = vadd.f32 %v5097_v38, %v708_v60  ;;  %v4279_v38 = vpack.c.bf16 %v2081_v52, %v2078_v62  ;;  %v4289_v60 = vpack.c.bf16 %v2092_v15, %v2089_v11  ;;  %v2190_v62 = vld [vmem:[#allocation10 + $0xfe8] sm:$0xff] }
 0x26f   :  { %4264 = vmatprep.subr.bf16.mxu0 %v4263_v9  ;;  %v2166_v9 = vld [vmem:[#allocation10 + $0xf28] sm:$0xff] }
 0x270   :  { %4546 = vmatpush3.bf16.msra.mxu1 %v4545_v16  ;;  %v2217_v16 = vld [vmem:[#allocation10 + $0x10c0] sm:$0xff]  ;;  %v4561_v54 = vpack.c.bf16 %v2166_v9, %v2163_v6  ;;  %v1665_v2 = vmax.f32 %v5156_v1, 0.0  ;;  %v2244_v6 = vld [vmem:[#allocation10 + $0x1198] sm:$0xff]  ;;  %v2122_v40 = vld [vmem:[#allocation10 + $0xdc8] sm:$0xff] }
 0x271   :  { %4548 = vmatprep.subr.bf16.mxu1 %v4547_v25  ;;  %v2087_v25 = vld [vmem:[#allocation10 + $0xcb0] sm:$0xff]  ;;  %v4563_v63 = vpack.c.bf16 %v2220_v18, %v2217_v16  ;;  %v2104_v16 = vld [vmem:[#allocation10 + $0xd38] sm:$0xff] }
 0x272   :  { %4266 = vmatpush1.bf16.msra.mxu0 %v4265_v0  ;;  %v1678_v0 = vmax.f32 %v5162_v56, 0.0  ;;  %v2108_v18 = vld [vmem:[#allocation10 + $0xd58] sm:$0xff]  ;;  %v2183_v1 = vld [vmem:[#allocation10 + $0xfb0] sm:$0xff] }
 0x273   :  { %4268 = vmatprep.subr.bf16.mxu0 %v4267_v30  ;;  %v2226_v30 = vld [vmem:[#allocation10 + $0x1108] sm:$0xff] }
 0x274   :  { %4550 = vmatpush3.bf16.msra.mxu1 %v4549_v32 }
 0x275   :  { %4552 = vmatprep.subr.bf16.mxu1 %v4551_v33 }
 0x276   :  { %4270 = vmatpush1.bf16.msra.mxu0 %v4269_v55  ;;  %v4287_v55 = vpack.c.bf16 %v2093_v42, %v2090_v31  ;;  %v2199_v31 = vld [vmem:[#allocation10 + $0x1030] sm:$0xff]  ;;  %v2202_v42 = vld [vmem:[#allocation10 + $0x1048] sm:$0xff] }
 0x277   :  { %4272 = vmatprep.subr.bf16.mxu0 %v4271_v37  ;;  %v2096_v37 = vld [vmem:[#allocation10 + $0xcf8] sm:$0xff]  ;;  %v4585_v11 = vpack.c.bf16 %v2202_v42, %v2199_v31  ;;  %v716_v31 = vrot.slane %v5125_v4, %v5050_v5 }
 0x278   :  { %4554 = vmatpush3.bf16.msra.mxu1 %v4553_v20  ;;  %v4571_v20 = vpack.c.bf16 %v2232_v36, %v2229_v43  ;;  %v4291_v61 = vpack.c.bf16 %v2099_v50, %v2096_v37  ;;  %v2116_v43 = vld [vmem:[#allocation10 + $0xd98] sm:$0xff]  ;;  %v2205_v37 = vld [vmem:[#allocation10 + $0x1060] sm:$0xff] }
 0x279   :  { %2570 = vmatmul.mubr.f32.vlgmr.msra.gmra.mrb[8].mxu0 %v1663_v17  ;;  %4556 = vmatprep.subr.bf16.mxu1 %v4555_v44  ;;  %v2084_v17 = vld [vmem:[#allocation10 + $0xc98] sm:$0xff]  ;;  %v2235_v44 = vld [vmem:[#allocation10 + $0x1150] sm:$0xff] }
 0x27a   :  { %2575 = vmatprep.mubr.f32.mxu0 %v1676_v10  ;;  %4274 = vmatpush1.bf16.msra.mxu0 %v4273_v24  ;;  %v2172_v10 = vld [vmem:[#allocation10 + $0xf58] sm:$0xff]  ;;  %v4283_v59 = vpack.c.bf16 %v2087_v25, %v2084_v17  ;;  %v2095_v24 = vld [vmem:[#allocation10 + $0xcf0] sm:$0xff]  ;;  %v4575_v28 = vpack.c.bf16 %v2238_v39, %v2235_v44  ;;  %v2193_v17 = vld [vmem:[#allocation10 + $0x1000] sm:$0xff] }
 0x27b   :  { %4276 = vmatprep.subr.bf16.mxu0 %v4275_v46  ;;  %v4565_v32 = vpack.c.bf16 %v2172_v10, %v2169_v47  ;;  %v2105_v46 = vld [vmem:[#allocation10 + $0xd40] sm:$0xff]  ;;  %v4293_v52 = vpack.c.bf16 %v2098_v57, %v2095_v24  ;;  %v2196_v25 = vld [vmem:[#allocation10 + $0x1018] sm:$0xff]  ;;  %v2250_v47 = vld [vmem:[#allocation10 + $0x11c8] sm:$0xff] }
 0x27c   :  { %4558 = vmatpush3.bf16.msra.mxu1 %v4557_v58  ;;  %v2187_v58 = vld [vmem:[#allocation10 + $0xfd0] sm:$0xff]  ;;  %v4295_v9 = vpack.c.bf16 %v2105_v46, %v2102_v53  ;;  %v2120_v36 = vld [vmem:[#allocation10 + $0xdb8] sm:$0xff]  ;;  %v2129_v44 = vld [vmem:[#allocation10 + $0xe00] sm:$0xff] }
 0x27d   :  { %2576 = vmatmul.mubr.f32.gmra.mrb[10].mxu0 %v1675_v7  ;;  %4560 = vmatprep.subr.bf16.mxu1 %v4559_v41  ;;  %v2086_v7 = vld [vmem:[#allocation10 + $0xca8] sm:$0xff]  ;;  %v2241_v41 = vld [vmem:[#allocation10 + $0x1180] sm:$0xff]  ;;  %v4577_v22 = vpack.c.bf16 %v2190_v62, %v2187_v58  ;;  %v2208_v50 = vld [vmem:[#allocation10 + $0x1078] sm:$0xff] }
 0x27e   :  { %4278 = vmatpush1.bf16.msra.mxu0 %v4277_v14  ;;  %2646 = vmatprep.mubr.f32.mxu0 %v1666_v34  ;;  %v4567_v34 = vpack.c.bf16 %v2226_v30, %v2223_v27  ;;  %v4285_v33 = vpack.c.bf16 %v2086_v7, %v2083_v12  ;;  %v2101_v14 = vld [vmem:[#allocation10 + $0xd20] sm:$0xff]  ;;  %v4579_v49 = vpack.c.bf16 %v2244_v6, %v2241_v41  ;;  %v2110_v27 = vld [vmem:[#allocation10 + $0xd68] sm:$0xff]  ;;  %v2128_v53 = vld [vmem:[#allocation10 + $0xdf8] sm:$0xff] }
 0x27f   :  { %3101 = vmatmul.mubr.f32.vlgmr.msra.gmra.mrb[32].mxu1 %v1665_v2  ;;  %4280 = vmatprep.subr.bf16.mxu0 %v4279_v38  ;;  %v2111_v38 = vld [vmem:[#allocation10 + $0xd70] sm:$0xff]  ;;  %v2114_v30 = vld [vmem:[#allocation10 + $0xd88] sm:$0xff]  ;;  %v4581_v12 = vpack.c.bf16 %v2196_v25, %v2193_v17  ;;  %v4589_v39 = vpack.c.bf16 %v2208_v50, %v2205_v37  ;;  %v2125_v57 = vld [vmem:[#allocation10 + $0xde0] sm:$0xff] }
 0x280   :  { %3105 = vmatprep.mubr.f32.mxu1 %v1678_v0  ;;  %4562 = vmatpush3.bf16.msra.mxu1 %v4561_v54  ;;  %v4297_v54 = vpack.c.bf16 %v2104_v16, %v2101_v14  ;;  %v4299_v10 = vpack.c.bf16 %v2111_v38, %v2108_v18  ;;  %v2132_v46 = vld [vmem:[#allocation10 + $0xe18] sm:$0xff]  ;;  %v2131_v62 = vld [vmem:[#allocation10 + $0xe10] sm:$0xff]  ;;  %v2138_v41 = vld [vmem:[#allocation10 + $0xe48] sm:$0xff] }
 0x281   :  { %4564 = vmatprep.subr.bf16.mxu1 %v4563_v63  ;;  %v2247_v63 = vld [vmem:[#allocation10 + $0x11b0] sm:$0xff]  ;;  %v2141_v6 = vld [vmem:[#allocation10 + $0xe60] sm:$0xff]  ;;  %v2140_v18 = vld [vmem:[#allocation10 + $0xe58] sm:$0xff] }
 0x282   :  { %4282 = vmatpush1.bf16.msra.mxu0 %v4281_v26  ;;  %v2107_v26 = vld [vmem:[#allocation10 + $0xd50] sm:$0xff]  ;;  %v4583_v7 = vpack.c.bf16 %v2250_v47, %v2247_v63  ;;  %v4319_v14 = vpack.c.bf16 %v2141_v6, %v2138_v41  ;;  %v2137_v16 = vld [vmem:[#allocation10 + $0xe40] sm:$0xff]  ;;  %v2144_v38 = vld [vmem:[#allocation10 + $0xe78] sm:$0xff] }
 0x283   :  { %3106 = vmatmul.mubr.f32.gmra.mrb[34].mxu1 %v1677_v35  ;;  %4284 = vmatprep.subr.bf16.mxu0 %v4283_v59  ;;  %v2117_v59 = vld [vmem:[#allocation10 + $0xda0] sm:$0xff]  ;;  %v2143_v25 = vld [vmem:[#allocation10 + $0xe70] sm:$0xff]  ;;  %v2150_v63 = vld [vmem:[#allocation10 + $0xea8] sm:$0xff] }
 0x284   :  { %4566 = vmatpush3.bf16.msra.mxu1 %v4565_v32  ;;  %v4301_v32 = vpack.c.bf16 %v2110_v27, %v2107_v26  ;;  %v4303_v29 = vpack.c.bf16 %v2117_v59, %v2114_v30  ;;  %v2153_v47 = vld [vmem:[#allocation10 + $0xec0] sm:$0xff]  ;;  %v2152_v30 = vld [vmem:[#allocation10 + $0xeb8] sm:$0xff] }
 0x285   :  { %4568 = vmatprep.subr.bf16.mxu1 %v4567_v34  ;;  %v2253_v34 = vld [vmem:[#allocation10 + $0x11e0] sm:$0xff]  ;;  %v4327_v26 = vpack.c.bf16 %v2153_v47, %v2150_v63  ;;  %v2156_v59 = vld [vmem:[#allocation10 + $0xed8] sm:$0xff]  ;;  %v2194_v63 = vld [vmem:[#allocation10 + $0x1008] sm:$0xff] }
 0x286   :  { %4286 = vmatpush1.bf16.msra.mxu0 %v4285_v33  ;;  %v2113_v33 = vld [vmem:[#allocation10 + $0xd80] sm:$0xff]  ;;  %v4587_v15 = vpack.c.bf16 %v2256_v8, %v2253_v34  ;;  %v2158_v34 = vld [vmem:[#allocation10 + $0xee8] sm:$0xff]  ;;  %v720_v8 = vrot.slane %v5125_v4, %v687_v48  ;;  %v2164_v50 = vld [vmem:[#allocation10 + $0xf18] sm:$0xff] }
 0x287   :  { %4288 = vmatprep.subr.bf16.mxu0 %v4287_v55  ;;  %v2123_v55 = vld [vmem:[#allocation10 + $0xdd0] sm:$0xff]  ;;  %v2149_v27 = vld [vmem:[#allocation10 + $0xea0] sm:$0xff]  ;;  %v2176_v41 = vld [vmem:[#allocation10 + $0xf78] sm:$0xff] }
 0x288   :  { %4570 = vmatpush3.bf16.msra.mxu1 %v4569_v23  ;;  %v4305_v23 = vpack.c.bf16 %v2116_v43, %v2113_v33  ;;  %v2165_v33 = vld [vmem:[#allocation10 + $0xf20] sm:$0xff]  ;;  %v2180_v6 = vld [vmem:[#allocation10 + $0xf98] sm:$0xff]  ;;  %v2198_v47 = vld [vmem:[#allocation10 + $0x1028] sm:$0xff] }
 0x289   :  { %4572 = vmatprep.subr.bf16.mxu1 %v4571_v20  ;;  %v4307_v20 = vpack.c.bf16 %v2123_v55, %v2120_v36  ;;  %v2161_v37 = vld [vmem:[#allocation10 + $0xf00] sm:$0xff] }
 0x28a   :  { %4290 = vmatpush1.bf16.msra.mxu0 %v4289_v60  ;;  %v2126_v60 = vld [vmem:[#allocation10 + $0xde8] sm:$0xff]  ;;  %v4337_v4 = vpack.c.bf16 %v2164_v50, %v2161_v37  ;;  %v2212_v37 = vld [vmem:[#allocation10 + $0x1098] sm:$0xff] }
 0x28b   :  { %4292 = vmatprep.subr.bf16.mxu0 %v4291_v61  ;;  %v4309_v61 = vpack.c.bf16 %v2122_v40, %v2119_v45  ;;  %v4311_v24 = vpack.c.bf16 %v2129_v44, %v2126_v60  ;;  %v2171_v45 = vld [vmem:[#allocation10 + $0xf50] sm:$0xff] }
 0x28c   :  { %4574 = vmatpush3.bf16.msra.mxu1 %v4573_v51  ;;  %v2135_v51 = vld [vmem:[#allocation10 + $0xe30] sm:$0xff] }
 0x28d   :  { %4576 = vmatprep.subr.bf16.mxu1 %v4575_v28  ;;  %v4313_v28 = vpack.c.bf16 %v2128_v53, %v2125_v57  ;;  %v4315_v58 = vpack.c.bf16 %v2135_v51, %v2132_v46  ;;  %v2174_v53 = vld [vmem:[#allocation10 + $0xf68] sm:$0xff]  ;;  %v2177_v46 = vld [vmem:[#allocation10 + $0xf80] sm:$0xff] }
 0x28e   :  { %4294 = vmatpush1.bf16.msra.mxu0 %v4293_v52  ;;  %v2134_v52 = vld [vmem:[#allocation10 + $0xe28] sm:$0xff] }
 0x28f   :  { %4296 = vmatprep.subr.bf16.mxu0 %v4295_v9  ;;  %v4317_v9 = vpack.c.bf16 %v2134_v52, %v2131_v62  ;;  %v4343_v62 = vpack.c.bf16 %v2177_v46, %v2174_v53  ;;  %v2173_v52 = vld [vmem:[#allocation10 + $0xf60] sm:$0xff] }
 0x290   :  { %4578 = vmatpush3.bf16.msra.mxu1 %v4577_v22  ;;  %v2147_v22 = vld [vmem:[#allocation10 + $0xe90] sm:$0xff]  ;;  %v4345_v56 = vpack.c.bf16 %v2176_v41, %v2173_v52  ;;  %v2225_v53 = vld [vmem:[#allocation10 + $0x1100] sm:$0xff]  ;;  %v2224_v52 = vld [vmem:[#allocation10 + $0x10f8] sm:$0xff] }
 0x291   :  { %4580 = vmatprep.subr.bf16.mxu1 %v4579_v49  ;;  %v4321_v49 = vpack.c.bf16 %v2140_v18, %v2137_v16  ;;  %v4323_v17 = vpack.c.bf16 %v2147_v22, %v2144_v38  ;;  %v2189_v16 = vld [vmem:[#allocation10 + $0xfe0] sm:$0xff]  ;;  %v2228_v41 = vld [vmem:[#allocation10 + $0x1118] sm:$0xff] }
 0x292   :  { %4298 = vmatpush1.bf16.msra.mxu0 %v4297_v54  ;;  %v2146_v54 = vld [vmem:[#allocation10 + $0xe88] sm:$0xff]  ;;  %v2185_v22 = vld [vmem:[#allocation10 + $0xfc0] sm:$0xff] }
 0x293   :  { %4300 = vmatprep.subr.bf16.mxu0 %v4299_v10  ;;  %v4325_v10 = vpack.c.bf16 %v2146_v54, %v2143_v25  ;;  %v2191_v54 = vld [vmem:[#allocation10 + $0xff0] sm:$0xff] }
 0x294   :  { %4582 = vmatpush3.bf16.msra.mxu1 %v4581_v12  ;;  %v2159_v12 = vld [vmem:[#allocation10 + $0xef0] sm:$0xff] }
 0x295   :  { %4584 = vmatprep.subr.bf16.mxu1 %v4583_v7  ;;  %v4329_v7 = vpack.c.bf16 %v2152_v30, %v2149_v27  ;;  %v4331_v42 = vpack.c.bf16 %v2159_v12, %v2156_v59  ;;  %v2197_v30 = vld [vmem:[#allocation10 + $0x1020] sm:$0xff]  ;;  %v2200_v59 = vld [vmem:[#allocation10 + $0x1038] sm:$0xff] }
 0x296   :  { %4302 = vmatpush1.bf16.msra.mxu0 %v4301_v32  ;;  %v2155_v32 = vld [vmem:[#allocation10 + $0xed0] sm:$0xff]  ;;  %v2204_v12 = vld [vmem:[#allocation10 + $0x1058] sm:$0xff] }
 0x297   :  { %4304 = vmatprep.subr.bf16.mxu0 %v4303_v29  ;;  %v2162_v29 = vld [vmem:[#allocation10 + $0xf08] sm:$0xff]  ;;  %v4333_v36 = vpack.c.bf16 %v2158_v34, %v2155_v32  ;;  %v2203_v32 = vld [vmem:[#allocation10 + $0x1050] sm:$0xff] }
 0x298   :  { %4586 = vmatpush3.bf16.msra.mxu1 %v4585_v11  ;;  %v2206_v34 = vld [vmem:[#allocation10 + $0x1068] sm:$0xff] }
 0x299   :  { %4588 = vmatprep.subr.bf16.mxu1 %v4587_v15  ;;  %v4335_v15 = vpack.c.bf16 %v2165_v33, %v2162_v29  ;;  %v2213_v29 = vld [vmem:[#allocation10 + $0x10a0] sm:$0xff] }
 0x29a   :  { %4306 = vmatpush1.bf16.msra.mxu0 %v4305_v23 }
 0x29b   :  { %4308 = vmatprep.subr.bf16.mxu0 %v4307_v20  ;;  %v2168_v20 = vld [vmem:[#allocation10 + $0xf38] sm:$0xff] }
 0x29c   :  { %4590 = vmatpush3.bf16.msra.mxu1 %v4589_v39  ;;  %v4339_v39 = vpack.c.bf16 %v2171_v45, %v2168_v20  ;;  %v2219_v20 = vld [vmem:[#allocation10 + $0x10d0] sm:$0xff] }
 0x29e   :  { %4310 = vmatpush1.bf16.msra.mxu0 %v4309_v61  ;;  %v2167_v61 = vld [vmem:[#allocation10 + $0xf30] sm:$0xff] }
 0x29f   :  { %4312 = vmatprep.subr.bf16.mxu0 %v4311_v24  ;;  %v2170_v24 = vld [vmem:[#allocation10 + $0xf48] sm:$0xff] }
 0x2a2   :  { %4314 = vmatpush1.bf16.msra.mxu0 %v4313_v28 }
 0x2a3   :  { %4316 = vmatprep.subr.bf16.mxu0 %v4315_v58  ;;  %v4341_v58 = vpack.c.bf16 %v2170_v24, %v2167_v61  ;;  %v2222_v24 = vld [vmem:[#allocation10 + $0x10e8] sm:$0xff] }
 0x2a6   :  { %4318 = vmatpush1.bf16.msra.mxu0 %v4317_v9  ;;  %v2182_v9 = vld [vmem:[#allocation10 + $0xfa8] sm:$0xff] }
 0x2a7   :  { %4320 = vmatprep.subr.bf16.mxu0 %v4319_v14  ;;  %v2186_v14 = vld [vmem:[#allocation10 + $0xfc8] sm:$0xff] }
 0x2a8   :  { %v4351_v38 = vpack.c.bf16 %v2189_v16, %v2186_v14  ;;  %v2237_v14 = vld [vmem:[#allocation10 + $0x1160] sm:$0xff] }
 0x2aa   :  { %4322 = vmatpush1.bf16.msra.mxu0 %v4321_v49  ;;  %v2188_v49 = vld [vmem:[#allocation10 + $0xfd8] sm:$0xff] }
 0x2ab   :  { %4324 = vmatprep.subr.bf16.mxu0 %v4323_v17  ;;  %v4353_v17 = vpack.c.bf16 %v2188_v49, %v2185_v22  ;;  %v2236_v22 = vld [vmem:[#allocation10 + $0x1158] sm:$0xff] }
 0x2ac   :  { %v2240_v49 = vld [vmem:[#allocation10 + $0x1178] sm:$0xff] }
 0x2ae   :  { %4326 = vmatpush1.bf16.msra.mxu0 %v4325_v10  ;;  %v2201_v10 = vld [vmem:[#allocation10 + $0x1040] sm:$0xff] }
 0x2af   :  { %4328 = vmatprep.subr.bf16.mxu0 %v4327_v26  ;;  %v4357_v26 = vpack.c.bf16 %v2194_v63, %v2191_v54  ;;  %v4359_v27 = vpack.c.bf16 %v2201_v10, %v2198_v47  ;;  %v2242_v54 = vld [vmem:[#allocation10 + $0x1188] sm:$0xff]  ;;  %v2249_v47 = vld [vmem:[#allocation10 + $0x11c0] sm:$0xff] }
 0x2b0   :  { %v2246_v63 = vld [vmem:[#allocation10 + $0x11a8] sm:$0xff] }
 0x2b2   :  { %4330 = vmatpush1.bf16.msra.mxu0 %v4329_v7  ;;  %v1646_v43 = vpop.f32.mrb[12].mxu1  ;;  %v2207_v7 = vld [vmem:[#allocation10 + $0x1070] sm:$0xff] }
 0x2b3   :  { %v5187_v55 = vadd.f32 %v1646_v43, %v716_v31  ;;  %v1648_v11 = vpop.f32.mrb[13].mxu1  ;;  %4332 = vmatprep.subr.bf16.mxu0 %v4331_v42  ;;  %v4363_v42 = vpack.c.bf16 %v2207_v7, %v2204_v12  ;;  %v4365_v43 = vpack.c.bf16 %v2206_v34, %v2203_v32  ;;  %v2255_v12 = vld [vmem:[#allocation10 + $0x11f0] sm:$0xff]  ;;  %v2257_v7 = vld [vmem:[#allocation12] sm:$0x7]  ;;  %v2254_v34 = vld [vmem:[#allocation10 + $0x11e8] sm:$0xff] }
 0x2b4   :  { %v4612_v23 = vadd.f32 %v1648_v11, %v720_v8  ;;  %v2251_v32 = vld [vmem:[#allocation10 + $0x11d0] sm:$0xff] }
 0x2b5   :  { %v1667_v40 = vmax.f32 %v5187_v55, 0.0 }
 0x2b6   :  { %v1668_v13 = vmax.f32 %v4612_v23, 0.0  ;;  %4334 = vmatpush1.bf16.msra.mxu0 %v4333_v36  ;;  %v1652_v48 = vpop.f32.mrb[14].mxu1  ;;  %v2216_v23 = vld [vmem:[#allocation10 + $0x10b8] sm:$0xff] }
 0x2b7   :  { %v5190_v60 = vadd.f32 %v1652_v48, %v716_v31  ;;  %v1654_v44 = vpop.f32.mrb[15].mxu1  ;;  %4336 = vmatprep.subr.bf16.mxu0 %v4335_v15  ;;  %v4361_v31 = vpack.c.bf16 %v2200_v59, %v2197_v30  ;;  %v2209_v15 = vld [vmem:[#allocation10 + $0x1080] sm:$0xff]  ;;  %v2248_v30 = vld [vmem:[#allocation10 + $0x11b8] sm:$0xff] }
 0x2b8   :  { %v5192_v57 = vadd.f32 %v1654_v44, %v720_v8  ;;  %3175 = vmatprep.mubr.f32.mxu1 %v1668_v13  ;;  %v2210_v8 = vld [vmem:[#allocation10 + $0x1088] sm:$0xff]  ;;  %v2215_v44 = vld [vmem:[#allocation10 + $0x10b0] sm:$0xff]  ;;  %v2252_v59 = vld [vmem:[#allocation10 + $0x11d8] sm:$0xff] }
 0x2b9   :  { %v1679_v51 = vmax.f32 %v5190_v60, 0.0  ;;  %2647 = vmatmul.mubr.f32.vlgmr.msra.gmra.mrb[8].mxu0 %v1665_v2  ;;  %3176 = vmatmul.mubr.f32.vlgmr.msra.gmra.mrb[36].mxu1 %v1667_v40  ;;  %v4347_v2 = vpack.c.bf16 %v2183_v1, %v2180_v6  ;;  %v4367_v11 = vpack.c.bf16 %v2213_v29, %v2210_v8  ;;  %v2231_v6 = vld [vmem:[#allocation10 + $0x1130] sm:$0xff]  ;;  %v2270_v8 = vrot.slane %v2257_v7, %v5050_v5 }
 0x2ba   :  { %v1680_v28 = vmax.f32 %v5192_v57, 0.0  ;;  %2652 = vmatprep.mubr.f32.mxu0 %v1678_v0  ;;  %4338 = vmatpush1.bf16.msra.mxu0 %v4337_v4  ;;  %v2179_v0 = vld [vmem:[#allocation10 + $0xf90] sm:$0xff]  ;;  %v4371_v4 = vpack.c.bf16 %v2219_v20, %v2216_v23 }
 0x2bb   :  { %4340 = vmatprep.subr.bf16.mxu0 %v4339_v39  ;;  %v4349_v18 = vpack.c.bf16 %v2182_v9, %v2179_v0  ;;  %v2218_v39 = vld [vmem:[#allocation10 + $0x10c8] sm:$0xff] }
 0x2bc   :  { %3180 = vmatprep.mubr.f32.mxu1 %v1680_v28  ;;  %v4373_v46 = vpack.c.bf16 %v2218_v39, %v2215_v44  ;;  %v2230_v0 = vld [vmem:[#allocation10 + $0x1128] sm:$0xff] }
 0x2bd   :  { %2653 = vmatmul.mubr.f32.gmra.mrb[10].mxu0 %v1677_v35  ;;  %3181 = vmatmul.mubr.f32.gmra.mrb[38].mxu1 %v1679_v51  ;;  %v2195_v35 = vld [vmem:[#allocation10 + $0x1010] sm:$0xff]  ;;  %v2234_v9 = vld [vmem:[#allocation10 + $0x1148] sm:$0xff] }
 0x2be   :  { %4342 = vmatpush1.bf16.msra.mxu0 %v4341_v58  ;;  %2723 = vmatprep.mubr.f32.mxu0 %v1668_v13  ;;  %v4355_v25 = vpack.c.bf16 %v2195_v35, %v2192_v3  ;;  %v4369_v13 = vpack.c.bf16 %v2212_v37, %v2209_v15  ;;  %v4375_v58 = vpack.c.bf16 %v2225_v53, %v2222_v24  ;;  %v2243_v3 = vld [vmem:[#allocation10 + $0x1190] sm:$0xff] }
 0x2bf   :  { %4344 = vmatprep.subr.bf16.mxu0 %v4343_v62  ;;  %v2221_v62 = vld [vmem:[#allocation10 + $0x10e0] sm:$0xff] }
 0x2c0   :  { %v4377_v1 = vpack.c.bf16 %v2224_v52, %v2221_v62 }
 0x2c2   :  { %4346 = vmatpush1.bf16.msra.mxu0 %v4345_v56  ;;  %v4379_v56 = vpack.c.bf16 %v2231_v6, %v2228_v41 }
 0x2c3   :  { %4348 = vmatprep.subr.bf16.mxu0 %v4347_v2  ;;  %v2227_v2 = vld [vmem:[#allocation10 + $0x1110] sm:$0xff] }
 0x2c4   :  { %v4381_v16 = vpack.c.bf16 %v2230_v0, %v2227_v2 }
 0x2c6   :  { %4350 = vmatpush1.bf16.msra.mxu0 %v4349_v18  ;;  %v4383_v18 = vpack.c.bf16 %v2237_v14, %v2234_v9 }
 0x2c7   :  { %4352 = vmatprep.subr.bf16.mxu0 %v4351_v38  ;;  %v2233_v38 = vld [vmem:[#allocation10 + $0x1140] sm:$0xff] }
 0x2c8   :  { %v4385_v35 = vpack.c.bf16 %v2236_v22, %v2233_v38 }
 0x2ca   :  { %4354 = vmatpush1.bf16.msra.mxu0 %v4353_v17  ;;  %v4387_v17 = vpack.c.bf16 %v2243_v3, %v2240_v49  ;;  %v2262_v3 = vrot.slane %v2257_v7, %v5002_v19 }
 0x2cb   :  { %4356 = vmatprep.subr.bf16.mxu0 %v4355_v25  ;;  %v2239_v25 = vld [vmem:[#allocation10 + $0x1170] sm:$0xff] }
 0x2cc   :  { %v4389_v10 = vpack.c.bf16 %v2242_v54, %v2239_v25 }
 0x2ce   :  { %4358 = vmatpush1.bf16.msra.mxu0 %v4357_v26  ;;  %v4391_v26 = vpack.c.bf16 %v2249_v47, %v2246_v63 }
 0x2cf   :  { %4360 = vmatprep.subr.bf16.mxu0 %v4359_v27  ;;  %v2245_v27 = vld [vmem:[#allocation10 + $0x11a0] sm:$0xff] }
 0x2d2   :  { %4362 = vmatpush1.bf16.msra.mxu0 %v4361_v31  ;;  %v3243_v33 = vpop.f32.mrb[16].mxu1  ;;  %v4393_v31 = vpack.c.bf16 %v2248_v30, %v2245_v27 }
 0x2d3   :  { %v3244_v36 = vpop.f32.mrb[17].mxu1  ;;  %4364 = vmatprep.subr.bf16.mxu0 %v4363_v42  ;;  %v4395_v42 = vpack.c.bf16 %v2255_v12, %v2252_v59 }
 0x2d4   :  { %v5208_v50 = vadd.f32 %v3244_v36, %v3243_v33  ;;  %v4397_v33 = vpack.c.bf16 %v2254_v34, %v2251_v32 }
 0x2d6   :  { %4366 = vmatpush1.bf16.msra.mxu0 %v4365_v43  ;;  %v3246_v45 = vpop.f32.mrb[18].mxu1  ;;  %v2803_v36 = vadd.f32 %v5208_v50, %v2270_v8 }
 0x2d7   :  { %v3247_v48 = vpop.f32.mrb[19].mxu1  ;;  %4368 = vmatprep.subr.bf16.mxu0 %v4367_v11 }
 0x2d8   :  { %v3248_v61 = vadd.f32 %v3247_v48, %v3246_v45 }
 0x2da   :  { %4370 = vmatpush1.bf16.msra.mxu0 %v4369_v13  ;;  %v2808_v20 = vadd.f32 %v3248_v61, %v2270_v8 }
 0x2db   :  { %4372 = vmatprep.subr.bf16.mxu0 %v4371_v4 }
 0x2de   :  { %4374 = vmatpush1.bf16.msra.mxu0 %v4373_v46 }
 0x2df   :  { %4376 = vmatprep.subr.bf16.mxu0 %v4375_v58 }
 0x2e2   :  { %4378 = vmatpush1.bf16.msra.mxu0 %v4377_v1 }
 0x2e3   :  { %4380 = vmatprep.subr.bf16.mxu0 %v4379_v56 }
 0x2e6   :  { %4382 = vmatpush1.bf16.msra.mxu0 %v4381_v16 }
 0x2e7   :  { %4384 = vmatprep.subr.bf16.mxu0 %v4383_v18 }
 0x2ea   :  { %4386 = vmatpush1.bf16.msra.mxu0 %v4385_v35  ;;  %v2266_v35 = vrot.slane %v2257_v7, %v5007_v21 }
 0x2eb   :  { %4388 = vmatprep.subr.bf16.mxu0 %v4387_v17 }
 0x2ee   :  { %4390 = vmatpush1.bf16.msra.mxu0 %v4389_v10 }
 0x2ef   :  { %4392 = vmatprep.subr.bf16.mxu0 %v4391_v26 }
 0x2f2   :  { %4394 = vmatpush1.bf16.msra.mxu0 %v4393_v31  ;;  %v3281_v29 = vpop.f32.mrb[20].mxu1 }
 0x2f3   :  { %v3282_v43 = vpop.f32.mrb[21].mxu1  ;;  %4396 = vmatprep.subr.bf16.mxu0 %v4395_v42 }
 0x2f4   :  { %v3283_v11 = vadd.f32 %v3282_v43, %v3281_v29 }
 0x2f6   :  { %v2878_v15 = vadd.f32 %v3283_v11, %v2803_v36  ;;  %4398 = vmatpush1.bf16.msra.mxu0 %v4397_v33  ;;  %v3284_v37 = vpop.f32.mrb[22].mxu1 }
 0x2f7   :  { %v3285_v23 = vpop.f32.mrb[23].mxu1 }
 0x2f8   :  { %v3286_v45 = vadd.f32 %v3285_v23, %v3284_v37 }
 0x2f9   :  { %2724 = vmatmul.mubr.f32.vlgmr.msra.gmra.mrb[8].mxu0 %v1667_v40 }
 0x2fa   :  { %v2883_v13 = vadd.f32 %v3286_v45, %v2808_v20  ;;  %2729 = vmatprep.mubr.f32.mxu0 %v1680_v28 }
 0x2fd   :  { %2730 = vmatmul.mubr.f32.gmra.mrb[10].mxu0 %v1679_v51 }
 0x312   :  { %v3319_v5 = vpop.f32.mrb[24].mxu1 }
 0x313   :  { %v3320_v48 = vpop.f32.mrb[25].mxu1 }
 0x314   :  { %v3321_v50 = vadd.f32 %v3320_v48, %v3319_v5 }
 0x316   :  { %v2953_v4 = vadd.f32 %v3321_v50, %v2878_v15  ;;  %v3322_v44 = vpop.f32.mrb[26].mxu1 }
 0x317   :  { %v3323_v39 = vpop.f32.mrb[27].mxu1 }
 0x318   :  { %v3324_v24 = vadd.f32 %v3323_v39, %v3322_v44 }
 0x31a   :  { %v2958_v53 = vadd.f32 %v3324_v24, %v2883_v13 }
 0x332   :  { %v3357_v61 = vpop.f32.mrb[28].mxu1 }
 0x333   :  { %v3358_v46 = vpop.f32.mrb[29].mxu1 }
 0x334   :  { %v3359_v58 = vadd.f32 %v3358_v46, %v3357_v61 }
 0x336   :  { %v3028_v55 = vadd.f32 %v3359_v58, %v2953_v4  ;;  %v3360_v40 = vpop.f32.mrb[30].mxu1 }
 0x337   :  { %v3361_v62 = vpop.f32.mrb[31].mxu1 }
 0x338   :  { %v3362_v52 = vadd.f32 %v3361_v62, %v3360_v40 }
 0x33a   :  { %v3033_v57 = vadd.f32 %v3362_v52, %v2958_v53 }
 0x352   :  { %v3395_v28 = vpop.f32.mrb[32].mxu1 }
 0x353   :  { %v3396_v41 = vpop.f32.mrb[33].mxu1 }
 0x354   :  { %v3397_v60 = vadd.f32 %v3396_v41, %v3395_v28 }
 0x356   :  { %v3103_v51 = vadd.f32 %v3397_v60, %v3028_v55  ;;  %v3398_v6 = vpop.f32.mrb[34].mxu1 }
 0x357   :  { %v3399_v1 = vpop.f32.mrb[35].mxu1 }
 0x358   :  { %v3400_v56 = vadd.f32 %v3399_v1, %v3398_v6 }
 0x35a   :  { %v3108_v2 = vadd.f32 %v3400_v56, %v3033_v57 }
 0x38c   :  { %v3433_v0 = vpop.f32.mrb[36].mxu1 }
 0x38d   :  { %v3434_v9 = vpop.f32.mrb[37].mxu1 }
 0x38e   :  { %v3435_v14 = vadd.f32 %v3434_v9, %v3433_v0 }
 0x390   :  { %v3178_v16 = vadd.f32 %v3435_v14, %v3103_v51  ;;  %v3436_v18 = vpop.f32.mrb[38].mxu1 }
 0x391   :  { %v3437_v38 = vpop.f32.mrb[39].mxu1 }
 0x392   :  { %3188 = vst [vmem:[#allocation13 + $0x10] sm:$0xff] %v3178_v16  ;;  %v3438_v22 = vadd.f32 %v3437_v38, %v3436_v18 }
 0x394   :  { %v3183_v49 = vadd.f32 %v3438_v22, %v3108_v2 }
 0x396   :  { %3191 = vst [vmem:[#allocation13 + $0x28] sm:$0xff] %v3183_v49 }
 0x3cc   :  { %v2725_v17 = vpop.f32.mrb[8].mxu0 }
 0x3cd   :  { %v4615_v25 = vadd.f32 %v2725_v17, %v2262_v3  ;;  %v2727_v54 = vpop.f32.mrb[9].mxu0 }
 0x3ce   :  { %v4616_v63 = vadd.f32 %v2727_v54, %v2266_v35 }
 0x3cf   :  { %3186 = vst [vmem:[#allocation13] sm:$0xff] %v4615_v25 }
 0x3d0   :  { %3187 = vst [vmem:[#allocation13 + $0x8] sm:$0xff] %v4616_v63  ;;  %v2731_v47 = vpop.f32.mrb[10].mxu0 }
 0x3d1   :  { %v4617_v10 = vadd.f32 %v2731_v47, %v2262_v3  ;;  %v2733_v26 = vpop.f32.mrb[11].mxu0 }
 0x3d2   :  { %v4618_v27 = vadd.f32 %v2733_v26, %v2266_v35 }
 0x3d3   :  { %3189 = vst [vmem:[#allocation13 + $0x18] sm:$0xff] %v4617_v10 }
 0x3d4   :  { %3190 = vst [vmem:[#allocation13 + $0x20] sm:$0xff] %v4618_v27 }
 0x3d5   :  { %4803 = shalt.err (!%p4800_p2)
}
 0x3d6   :  { %s4804_s11 = scalar_lea.hbm %s5241_s6, 768 }
 0x3d7   :  { %p4805_p3 = scmp.ne.s32.totalorder %s5241_s6, %s4804_s11  ;;  %p4808_p4 = scmp.lt.u32.totalorder %s4804_s11, %s5241_s6 }
 0x3d9   :  { %p4810_p5 = pnand %p4808_p4, %p4805_p3 }
 0x3db   :  { %4813 = shalt.err (!%p4810_p5)
}
 0x3dc   :  { %3203 = dma.vmem_to_hbm [thread:$0]  %s3198_s4, 768, %s5241_s6, [#allocation6], %s4827_s0, %s4827_s0, %s4828_s21  }
 0x3dd   :  { %4820 = dma.done.wait [#allocation6], 768  }
 0x3de   :  { %4821 = vsyncadd [#allocation6], 4294966528 }
 0x3df   :  { %3207 = vsyncpa [#allocation5], 1 }
 0x3e0   :  { %3208 = vsyncpa [#allocation8], 1 }
 0x3e1   :  { %3209 = vsyncpa [#allocation11], 1 }
 0x3e2   :  { %3210 = vsyncpa [#allocation6], 1 }

</bundles_post_ra>
